<compile_context>
chip_gen: v5e
topology: v5e:2x2
jax: 0.10.0
libtpu: 0.0.40
codegen_flags: <defaults>
</compile_context>

<pallas_src>
import jax
import jax.numpy as jnp
from jax.experimental import pallas as pl
from jax.experimental.pallas import tpu as pltpu


def _round_up(x, n):
    return ((x + n - 1) // n) * n


def _num_tensorcores():
    """2 on v7x (2 TCs/chip), 1 on v5e/v6e.  Defaults to 1 if undetectable."""
    try:
        kind = jax.devices()[0].device_kind.lower()
    except Exception:  # pragma: no cover - defensive
        return 1
    return 2 if ("v7" in kind or "7x" in kind) else 1


def _mlp3_kernel(x_ref, w1_ref, b1_ref, w2_ref, b2_ref, w3_ref, b3_ref, o_ref):
    """Fused Linear->ReLU->Linear->ReLU->Linear on one row-tile.

    x_ref : (tm, D_in)            native dtype
    w*_ref: (D_in_l, D_out_l)     pre-transposed (in, out), native dtype
    b*_ref: (1, D_out_l)          f32
    o_ref : (tm, D_out)
    """
    x = x_ref[...]

    h1 = jnp.dot(x, w1_ref[...], preferred_element_type=jnp.float32) + b1_ref[...]
    h1 = jnp.maximum(h1, 0.0).astype(w2_ref.dtype)     # ReLU (layer 0)

    h2 = jnp.dot(h1, w2_ref[...], preferred_element_type=jnp.float32) + b2_ref[...]
    h2 = jnp.maximum(h2, 0.0).astype(w3_ref.dtype)     # ReLU (layer 1)

    out = jnp.dot(h2, w3_ref[...], preferred_element_type=jnp.float32) + b3_ref[...]
    o_ref[...] = out.astype(o_ref.dtype)               # last layer: no ReLU


def mlp_ref(x, params):
    """Pure-JAX reference of the PyTorch forward (params in (out, in) layout)."""
    n = len(params)
    for i, (w, b) in enumerate(params):
        x = x @ w.T + b
        if i < n - 1:
            x = jnp.maximum(x, 0.0)
    return x


def prepare_mlp_params(params):
    """One-time layout prep (hoisted out of the hot path):
    weights -> (in, out), biases -> f32 (1, N) rows."""
    return tuple((w.T, b.reshape(1, -1).astype(jnp.float32)) for w, b in params)


def _mlp_ref_prepared(x, prepared, out_dtype):
    """Fallback path for tiny M, using the already-prepared (in,out) params."""
    n = len(prepared)
    h = x
    for i, (wt, b) in enumerate(prepared):
        h = h @ wt + b
        if i < n - 1:
            h = jnp.maximum(h, 0.0)
    return h.astype(out_dtype)


def mlp_pallas(x, prepared_params, *, tile_m=None, min_rows_for_pallas=128):
    """x: (..., input_dim). prepared_params: output of prepare_mlp_params for a
    3-layer MLP — ((W1t, b1), (W2t, b2), (W3t, b3)), W*t in (in, out) layout."""
    (w1t, b1r), (w2t, b2r), (w3t, b3r) = prepared_params
    in_dim = x.shape[-1]
    h1_dim = w1t.shape[1]
    h2_dim = w2t.shape[1]
    out_dim = w3t.shape[1]
    lead_shape = x.shape[:-1]

    x2d = x.reshape(-1, in_dim)
    m = x2d.shape[0]

    # Tiny problems: fixed launch/DMA/prologue cost dominates — let XLA fuse it.
    if m < min_rows_for_pallas:
        out = _mlp_ref_prepared(x2d, prepared_params, x.dtype)
        return out.reshape(*lead_shape, out_dim)

    # --- grid / tile selection (step count is the only lever at these FLOPs) ---
    num_tc = _num_tensorcores()
    m8 = _round_up(max(m, 8), 8)
    if tile_m is None:
        # One balanced tile per TensorCore: grid=(1,) on v5e/v6e, grid=(2,) on v7x.
        tm = _round_up(pl.cdiv(m8, num_tc), 8)
        tm = min(tm, 1024)                       # cap so huge M still fits VMEM
    else:
        tm = _round_up(min(tile_m, m8), 8)       # never trust unaligned tile_m
    m_pad = _round_up(m, tm)
    if m_pad != m:
        x2d = jnp.pad(x2d, ((0, m_pad - m), (0, 0)))
    grid = (m_pad // tm,)

    full = lambda i: (0, 0)  # weights/biases: same full block every step (resident)

    itemsize = jnp.dtype(x.dtype).itemsize
    flops = 2 * m_pad * (in_dim * h1_dim + h1_dim * h2_dim + h2_dim * out_dim)
    bytes_accessed = (
        m_pad * in_dim * itemsize
        + (w1t.size + w2t.size + w3t.size) * jnp.dtype(w1t.dtype).itemsize
        + (b1r.size + b2r.size + b3r.size) * 4
        + m_pad * out_dim * itemsize
    )

    out = pl.pallas_call(
        _mlp3_kernel,
        out_shape=jax.ShapeDtypeStruct((m_pad, out_dim), x.dtype),
        grid_spec=pltpu.PrefetchScalarGridSpec(
            num_scalar_prefetch=0,
            grid=grid,
            in_specs=[
                pl.BlockSpec((tm, in_dim), lambda i: (i, 0)),
                pl.BlockSpec(w1t.shape, full),
                pl.BlockSpec(b1r.shape, full),
                pl.BlockSpec(w2t.shape, full),
                pl.BlockSpec(b2r.shape, full),
                pl.BlockSpec(w3t.shape, full),
                pl.BlockSpec(b3r.shape, full),
            ],
            out_specs=pl.BlockSpec((tm, out_dim), lambda i: (i, 0)),
        ),
        compiler_params=pltpu.CompilerParams(
            dimension_semantics=("parallel",),          # row tiles across TCs (v7x)
            vmem_limit_bytes=32 * 1024 * 1024,          # explicit, safe on v5e/v6e/v7x
        ),
        cost_estimate=pl.CostEstimate(
            flops=flops, transcendentals=0, bytes_accessed=bytes_accessed),
    )(x2d, w1t, b1r, w2t, b2r, w3t, b3r)

    if m_pad != m:
        out = out[:m]
    return out.reshape(*lead_shape, out_dim)


def init_mlp_params(key, input_dim, hidden_dim, output_dim, num_layers,
                    dtype=jnp.float32):
    """Deterministic synthetic init matching nn.Linear shapes (out, in)."""
    h = [hidden_dim] * (num_layers - 1)
    dims = list(zip([input_dim] + h, h + [output_dim]))
    params = []
    for (n_in, n_out) in dims:
        key, kw, kb = jax.random.split(key, 3)
        bound = 1.0 / (n_in ** 0.5)
        w = jax.random.uniform(kw, (n_out, n_in), dtype, -bound, bound)
        b = jax.random.uniform(kb, (n_out,), dtype, -bound, bound)
        params.append((w, b))
    return params


if __name__ == "__main__":
    key = jax.random.PRNGKey(0)

    # Realistic deformable-DETR bbox-head shapes: hidden=256, 300 queries,
    # output_dim=4, num_layers=3.  M = 2*300 = 600:
    #   v5e/v6e -> grid=(1,) single 600-row tile; v7x -> grid=(2,) 304-row tiles.
    batch, num_queries = 2, 300
    input_dim, hidden_dim, output_dim, num_layers = 256, 256, 4, 3

    kx, kp, kx2, kp2 = jax.random.split(key, 4)
    x = jax.random.normal(kx, (batch, num_queries, input_dim), jnp.float32)
    params = init_mlp_params(kp, input_dim, hidden_dim, output_dim, num_layers)
    prepared = prepare_mlp_params(params)      # one-time layout prep (not per call)

    out = mlp_pallas(x, prepared)
    out = jax.block_until_ready(out)
    ref = mlp_ref(x, params)
    assert out.shape == (batch, num_queries, output_dim), out.shape
    assert jnp.allclose(out, ref, atol=1e-4, rtol=1e-4), \
        float(jnp.max(jnp.abs(out - ref)))

    # Tiny-shape path (M=16 < min_rows_for_pallas): falls back to XLA-fused ref.
    x_small = jax.random.normal(kx2, (2, 8, 32), jnp.float32)
    params_small = init_mlp_params(kp2, 32, 64, 4, 3)
    prepared_small = prepare_mlp_params(params_small)
    out_small = jax.block_until_ready(mlp_pallas(x_small, prepared_small))
    ref_small = mlp_ref(x_small, params_small)
    assert out_small.shape == (2, 8, 4), out_small.shape
    assert jnp.allclose(out_small, ref_small, atol=1e-5, rtol=1e-5), \
        float(jnp.max(jnp.abs(out_small - ref_small)))

    # Also exercise an explicit multi-step tiling (covers the padded-grid path).
    out_tiled = jax.block_until_ready(mlp_pallas(x, prepared, tile_m=128))
    assert jnp.allclose(out_tiled, ref, atol=1e-4, rtol=1e-4), \
        float(jnp.max(jnp.abs(out_tiled - ref)))

    print("KERNEL_OK")
</pallas_src>

<mosaic_0001>
module attributes {stable_mosaic.version = 11 : i64} {
  func.func @_mlp3_kernel(%arg0: i32, %arg1: memref<600x256xf32, #tpu.memory_space<vmem>>, %arg2: memref<256x256xf32, #tpu.memory_space<vmem>>, %arg3: memref<1x256xf32, #tpu.memory_space<vmem>>, %arg4: memref<256x256xf32, #tpu.memory_space<vmem>>, %arg5: memref<1x256xf32, #tpu.memory_space<vmem>>, %arg6: memref<256x4xf32, #tpu.memory_space<vmem>>, %arg7: memref<1x4xf32, #tpu.memory_space<vmem>>, %arg8: memref<600x4xf32, #tpu.memory_space<vmem>>) attributes {dimension_semantics = [#tpu.dimension_semantics<parallel>], iteration_bounds = array<i64: 1>, scalar_prefetch = 0 : i64, scratch_operands = 0 : i64, tpu.core_type = #tpu.core_type<tc>, window_params = [{transform_indices = @transform_0, window_bounds = array<i64: 600, 256>}, {pipeline_mode = #tpu.pipeline_mode<synchronous>, transform_indices = @transform_1, window_bounds = array<i64: 256, 256>}, {pipeline_mode = #tpu.pipeline_mode<synchronous>, transform_indices = @transform_2, window_bounds = array<i64: 1, 256>}, {pipeline_mode = #tpu.pipeline_mode<synchronous>, transform_indices = @transform_3, window_bounds = array<i64: 256, 256>}, {pipeline_mode = #tpu.pipeline_mode<synchronous>, transform_indices = @transform_4, window_bounds = array<i64: 1, 256>}, {pipeline_mode = #tpu.pipeline_mode<synchronous>, transform_indices = @transform_5, window_bounds = array<i64: 256, 4>}, {pipeline_mode = #tpu.pipeline_mode<synchronous>, transform_indices = @transform_6, window_bounds = array<i64: 1, 4>}, {transform_indices = @transform_7, window_bounds = array<i64: 600, 4>}]} {
    %c0 = arith.constant 0 : index
    %c0_0 = arith.constant 0 : index
    %0 = vector.load %arg1[%c0, %c0_0] : memref<600x256xf32, #tpu.memory_space<vmem>>, vector<600x256xf32>
    %c0_1 = arith.constant 0 : index
    %c0_2 = arith.constant 0 : index
    %1 = vector.load %arg2[%c0_1, %c0_2] : memref<256x256xf32, #tpu.memory_space<vmem>>, vector<256x256xf32>
    %cst = arith.constant dense<0.000000e+00> : vector<600x256xf32>
    %2 = tpu.matmul %0, %1, %cst {dimension_numbers = #tpu.dot_dimension_numbers<[1], [0], [0], [1], [0, 0, 1, 1], [], []>} : vector<600x256xf32>, vector<256x256xf32>, vector<600x256xf32> -> vector<600x256xf32>
    %c0_3 = arith.constant 0 : index
    %c0_4 = arith.constant 0 : index
    %3 = vector.load %arg3[%c0_3, %c0_4] : memref<1x256xf32, #tpu.memory_space<vmem>>, vector<1x256xf32>
    %4 = vector.broadcast %3 : vector<1x256xf32> to vector<600x256xf32>
    %5 = arith.addf %2, %4 : vector<600x256xf32>
    %cst_5 = arith.constant 0.000000e+00 : f32
    %6 = vector.broadcast %cst_5 : f32 to vector<600x256xf32>
    %7 = arith.maximumf %5, %6 : vector<600x256xf32>
    %c0_6 = arith.constant 0 : index
    %c0_7 = arith.constant 0 : index
    %8 = vector.load %arg4[%c0_6, %c0_7] : memref<256x256xf32, #tpu.memory_space<vmem>>, vector<256x256xf32>
    %cst_8 = arith.constant dense<0.000000e+00> : vector<600x256xf32>
    %9 = tpu.matmul %7, %8, %cst_8 {dimension_numbers = #tpu.dot_dimension_numbers<[1], [0], [0], [1], [0, 0, 1, 1], [], []>} : vector<600x256xf32>, vector<256x256xf32>, vector<600x256xf32> -> vector<600x256xf32>
    %c0_9 = arith.constant 0 : index
    %c0_10 = arith.constant 0 : index
    %10 = vector.load %arg5[%c0_9, %c0_10] : memref<1x256xf32, #tpu.memory_space<vmem>>, vector<1x256xf32>
    %11 = vector.broadcast %10 : vector<1x256xf32> to vector<600x256xf32>
    %12 = arith.addf %9, %11 : vector<600x256xf32>
    %cst_11 = arith.constant 0.000000e+00 : f32
    %13 = vector.broadcast %cst_11 : f32 to vector<600x256xf32>
    %14 = arith.maximumf %12, %13 : vector<600x256xf32>
    %c0_12 = arith.constant 0 : index
    %c0_13 = arith.constant 0 : index
    %15 = vector.load %arg6[%c0_12, %c0_13] : memref<256x4xf32, #tpu.memory_space<vmem>>, vector<256x4xf32>
    %cst_14 = arith.constant dense<0.000000e+00> : vector<600x4xf32>
    %16 = tpu.matmul %14, %15, %cst_14 {dimension_numbers = #tpu.dot_dimension_numbers<[1], [0], [0], [1], [0, 0, 1, 1], [], []>} : vector<600x256xf32>, vector<256x4xf32>, vector<600x4xf32> -> vector<600x4xf32>
    %c0_15 = arith.constant 0 : index
    %c0_16 = arith.constant 0 : index
    %17 = vector.load %arg7[%c0_15, %c0_16] : memref<1x4xf32, #tpu.memory_space<vmem>>, vector<1x4xf32>
    %18 = vector.broadcast %17 : vector<1x4xf32> to vector<600x4xf32>
    %19 = arith.addf %16, %18 : vector<600x4xf32>
    %c0_17 = arith.constant 0 : index
    %c0_18 = arith.constant 0 : index
    %20 = vector.load %arg8[%c0_17, %c0_18] : memref<600x4xf32, #tpu.memory_space<vmem>>, vector<600x4xf32>
    tpu.vector_store %arg8[%c0_17, %c0_18], %19 {strides = array<i32>} : memref<600x4xf32, #tpu.memory_space<vmem>>, vector<600x4xf32>,
    return
  }
  func.func @transform_0(%arg0: i32) -> (i32, i32) {
    %c0_i32 = arith.constant 0 : i32
    %c0_i32_0 = arith.constant 0 : i32
    return %arg0, %c0_i32 : i32, i32
  }
  func.func @transform_1(%arg0: i32) -> (i32, i32) {
    %c0_i32 = arith.constant 0 : i32
    %c0_i32_0 = arith.constant 0 : i32
    %c0_i32_1 = arith.constant 0 : i32
    return %c0_i32, %c0_i32_0 : i32, i32
  }
  func.func @transform_2(%arg0: i32) -> (i32, i32) {
    %c0_i32 = arith.constant 0 : i32
    %c0_i32_0 = arith.constant 0 : i32
    %c0_i32_1 = arith.constant 0 : i32
    return %c0_i32, %c0_i32_0 : i32, i32
  }
  func.func @transform_3(%arg0: i32) -> (i32, i32) {
    %c0_i32 = arith.constant 0 : i32
    %c0_i32_0 = arith.constant 0 : i32
    %c0_i32_1 = arith.constant 0 : i32
    return %c0_i32, %c0_i32_0 : i32, i32
  }
  func.func @transform_4(%arg0: i32) -> (i32, i32) {
    %c0_i32 = arith.constant 0 : i32
    %c0_i32_0 = arith.constant 0 : i32
    %c0_i32_1 = arith.constant 0 : i32
    return %c0_i32, %c0_i32_0 : i32, i32
  }
  func.func @transform_5(%arg0: i32) -> (i32, i32) {
    %c0_i32 = arith.constant 0 : i32
    %c0_i32_0 = arith.constant 0 : i32
    %c0_i32_1 = arith.constant 0 : i32
    return %c0_i32, %c0_i32_0 : i32, i32
  }
  func.func @transform_6(%arg0: i32) -> (i32, i32) {
    %c0_i32 = arith.constant 0 : i32
    %c0_i32_0 = arith.constant 0 : i32
    %c0_i32_1 = arith.constant 0 : i32
    return %c0_i32, %c0_i32_0 : i32, i32
  }
  func.func @transform_7(%arg0: i32) -> (i32, i32) {
    %c0_i32 = arith.constant 0 : i32
    %c0_i32_0 = arith.constant 0 : i32
    return %arg0, %c0_i32 : i32, i32
  }
}

</mosaic_0001>

<bundles_post_ra>
// kernel: tpu_custom_call.1
= control target key start
LH: loop header
LB: loop body
LE: loop exit
PB: predicated region body
PF: predicated region fallthrough
CT: control target
= control target key end

     0   :  { %12 = vsyncpa [#allocation3], 0  ;;  %s6324_s0 = inlined_call_operand.hbm [shape: f32[600,256], index: 0, kind: input, shape index: {}]   ;;  %s6325_s1 = inlined_call_operand.hbm [shape: f32[256,256], index: 1, kind: input, shape index: {}]   ;;  %s6326_s2 = inlined_call_operand.vmem [shape: f32[1,256], index: 2, kind: input, shape index: {}]   ;;  %s6327_s3 = inlined_call_operand.hbm [shape: f32[256,256], index: 3, kind: input, shape index: {}]   ;;  %s6328_s4 = inlined_call_operand.vmem [shape: f32[1,256], index: 4, kind: input, shape index: {}]   ;;  %s6329_s5 = inlined_call_operand.vmem [shape: f32[256,4], index: 5, kind: input, shape index: {}]   ;;  %s6330_s6 = inlined_call_operand.vmem [shape: f32[1,4], index: 6, kind: input, shape index: {}]   ;;  %s6331_s7 = inlined_call_operand.vmem [shape: f32[600,4], index: 7, kind: output, shape index: {}]  }
   0x1   :  { %13 = vsyncpa [#allocation5], 0  ;;  %s31_s26 = sshll.u32 %s6325_s1, 4  ;;  %s3429_s27 = smov [#allocation4]   ;;  %s32_s26 = int_to_ptr.hbm [resolvable:$true] %s31_s26 }
   0x2   :  { %s33_s28 = sshll.u32 %s3429_s27, 4  ;;  %s18_s8 = sshll.u32 %s6324_s0, 4  ;;  %s34_s28 = int_to_ptr.vmem [resolvable:$true] %s33_s28  ;;  %s19_s8 = int_to_ptr.hbm [resolvable:$true] %s18_s8 }
   0x3   :  { %s3430_s9 = smov 256   ;;  %s3431_s10 = smov 16  }
   0x4   :  { %39 = dma.hbm_to_vmem [thread:$0]  %s32_s26, 8192, %s34_s28, [#allocation5], %s3430_s9, %s3430_s9, %s3431_s10  }
   0x5   :  { %s3432_s11 = smov [#allocation2]   ;;  %s46_s15 = sshll.u32 %s6327_s3, 4  ;;  %s47_s15 = int_to_ptr.hbm [resolvable:$true] %s46_s15 }
   0x6   :  { %s20_s12 = sshll.u32 %s3432_s11, 4  ;;  %s3433_s1 = smov [#allocation6]   ;;  %s21_s12 = int_to_ptr.vmem [resolvable:$true] %s20_s12 }
   0x7   :  { %26 = dma.hbm_to_vmem [thread:$0]  %s19_s8, 19200, %s21_s12, [#allocation3], %s3430_s9, %s3430_s9, %s3431_s10  }
   0x8   :  { %s48_s16 = sshll.u32 %s3433_s1, 4  ;;  %s49_s16 = int_to_ptr.vmem [resolvable:$true] %s48_s16 }
   0x9   :  { %54 = dma.hbm_to_vmem [thread:$0]  %s47_s15, 8192, %s49_s16, [#allocation5], %s3430_s9, %s3430_s9, %s3431_s10  }
   0xa   :  { %3425 = dma.done.wait [#allocation3], 19200  }
   0xb   :  { %3426 = vsyncadd [#allocation3], 4294948096 }
   0xc   :  { %3427 = dma.done.wait [#allocation5], 16384  }
   0xd   :  { %3428 = vsyncadd [#allocation5], 4294950912  ;;  %v253_v0 = vld [vmem:[#allocation4 + $0xf0] sm:$0xff]  ;;  %v251_v2 = vld [vmem:[#allocation4 + $0xe0] sm:$0xff]  ;;  %vm3119_vm0 = vcmask 31744  }
   0xe   :  { %v285_v1 = vld [vmem:[#allocation4 + $0x1f0] sm:$0xff]  ;;  %293 = vmatpush.msra.mxu0 %v253_v0  ;;  %3201 = vmatpush.msra.mxu2 %v253_v0  ;;  %v283_v3 = vld [vmem:[#allocation4 + $0x1e0] sm:$0xff]  ;;  %v150_v34 = vld [vmem:[#allocation2 + $0x268] sm:$0xff] }
   0xf   :  { %3217 = vmatpush.msra.mxu3 %v285_v1  ;;  %v249_v4 = vld [vmem:[#allocation4 + $0xd0] sm:$0xff]  ;;  %535 = vmatpush.msra.mxu1 %v285_v1  ;;  %v247_v6 = vld [vmem:[#allocation4 + $0xc0] sm:$0xff]  ;;  %v254_v35 = vld [vmem:[#allocation4 + $0xf8] sm:$0xff] }
  0x10   :  { %294 = vmatpush.msra.mxu0 %v251_v2  ;;  %3202 = vmatpush.msra.mxu2 %v251_v2  ;;  %v281_v5 = vld [vmem:[#allocation4 + $0x1d0] sm:$0xff]  ;;  %v279_v7 = vld [vmem:[#allocation4 + $0x1c0] sm:$0xff]  ;;  %v286_v36 = vld [vmem:[#allocation4 + $0x1f8] sm:$0xff] }
  0x11   :  { %3218 = vmatpush.msra.mxu3 %v283_v3  ;;  %536 = vmatpush.msra.mxu1 %v283_v3  ;;  %v245_v8 = vld [vmem:[#allocation4 + $0xb0] sm:$0xff]  ;;  %v243_v10 = vld [vmem:[#allocation4 + $0xa0] sm:$0xff]  ;;  %v252_v37 = vld [vmem:[#allocation4 + $0xe8] sm:$0xff] }
  0x12   :  { %295 = vmatpush.msra.mxu0 %v249_v4  ;;  %3203 = vmatpush.msra.mxu2 %v249_v4  ;;  %v277_v9 = vld [vmem:[#allocation4 + $0x1b0] sm:$0xff]  ;;  %v275_v11 = vld [vmem:[#allocation4 + $0x1a0] sm:$0xff]  ;;  %v284_v38 = vld [vmem:[#allocation4 + $0x1e8] sm:$0xff] }
  0x13   :  { %3219 = vmatpush.msra.mxu3 %v281_v5  ;;  %537 = vmatpush.msra.mxu1 %v281_v5  ;;  %v241_v12 = vld [vmem:[#allocation4 + $0x90] sm:$0xff]  ;;  %v239_v14 = vld [vmem:[#allocation4 + $0x80] sm:$0xff]  ;;  %v250_v39 = vld [vmem:[#allocation4 + $0xd8] sm:$0xff] }
  0x14   :  { %296 = vmatpush.msra.mxu0 %v247_v6  ;;  %3204 = vmatpush.msra.mxu2 %v247_v6  ;;  %v273_v13 = vld [vmem:[#allocation4 + $0x190] sm:$0xff]  ;;  %v271_v15 = vld [vmem:[#allocation4 + $0x180] sm:$0xff]  ;;  %v282_v40 = vld [vmem:[#allocation4 + $0x1d8] sm:$0xff] }
  0x15   :  { %3220 = vmatpush.msra.mxu3 %v279_v7  ;;  %538 = vmatpush.msra.mxu1 %v279_v7  ;;  %v237_v16 = vld [vmem:[#allocation4 + $0x70] sm:$0xff]  ;;  %v235_v18 = vld [vmem:[#allocation4 + $0x60] sm:$0xff]  ;;  %v152_v43 = vld [vmem:[#allocation2 + $0x278] sm:$0xff] }
  0x16   :  { %297 = vmatpush.msra.mxu0 %v245_v8  ;;  %3205 = vmatpush.msra.mxu2 %v245_v8  ;;  %v269_v17 = vld [vmem:[#allocation4 + $0x170] sm:$0xff]  ;;  %v267_v19 = vld [vmem:[#allocation4 + $0x160] sm:$0xff]  ;;  %v154_v46 = vld [vmem:[#allocation2 + $0x288] sm:$0xff] }
  0x17   :  { %3221 = vmatpush.msra.mxu3 %v277_v9  ;;  %539 = vmatpush.msra.mxu1 %v277_v9  ;;  %v233_v20 = vld [vmem:[#allocation4 + $0x50] sm:$0xff]  ;;  %v231_v22 = vld [vmem:[#allocation4 + $0x40] sm:$0xff]  ;;  %v156_v49 = vld [vmem:[#allocation2 + $0x298] sm:$0xff] }
  0x18   :  { %298 = vmatpush.msra.mxu0 %v243_v10  ;;  %3206 = vmatpush.msra.mxu2 %v243_v10  ;;  %v265_v21 = vld [vmem:[#allocation4 + $0x150] sm:$0xff]  ;;  %v263_v23 = vld [vmem:[#allocation4 + $0x140] sm:$0xff]  ;;  %v248_v50 = vld [vmem:[#allocation4 + $0xc8] sm:$0xff] }
  0x19   :  { %3222 = vmatpush.msra.mxu3 %v275_v11  ;;  %540 = vmatpush.msra.mxu1 %v275_v11  ;;  %v229_v24 = vld [vmem:[#allocation4 + $0x30] sm:$0xff]  ;;  %v227_v26 = vld [vmem:[#allocation4 + $0x20] sm:$0xff]  ;;  %v280_v51 = vld [vmem:[#allocation4 + $0x1c8] sm:$0xff] }
  0x1a   :  { %299 = vmatpush.msra.mxu0 %v241_v12  ;;  %3207 = vmatpush.msra.mxu2 %v241_v12  ;;  %v261_v25 = vld [vmem:[#allocation4 + $0x130] sm:$0xff]  ;;  %v259_v27 = vld [vmem:[#allocation4 + $0x120] sm:$0xff]  ;;  %v158_v54 = vld [vmem:[#allocation2 + $0x2a8] sm:$0xff] }
  0x1b   :  { %3223 = vmatpush.msra.mxu3 %v273_v13  ;;  %541 = vmatpush.msra.mxu1 %v273_v13  ;;  %v225_v28 = vld [vmem:[#allocation4 + $0x10] sm:$0xff]  ;;  %v223_v30 = vld [vmem:[#allocation4] sm:$0xff]  ;;  %v160_v57 = vld [vmem:[#allocation2 + $0x2b8] sm:$0xff] }
  0x1c   :  { %300 = vmatpush.msra.mxu0 %v239_v14  ;;  %3208 = vmatpush.msra.mxu2 %v239_v14  ;;  %v257_v29 = vld [vmem:[#allocation4 + $0x110] sm:$0xff]  ;;  %v255_v31 = vld [vmem:[#allocation4 + $0x100] sm:$0xff]  ;;  %v246_v58 = vld [vmem:[#allocation4 + $0xb8] sm:$0xff] }
  0x1d   :  { %3224 = vmatpush.msra.mxu3 %v271_v15  ;;  %542 = vmatpush.msra.mxu1 %v271_v15  ;;  %v73_v32 = vld [vmem:[#allocation2] sm:$0xff]  ;;  %v75_v41 = vld [vmem:[#allocation2 + $0x10] sm:$0xff]  ;;  %v278_v59 = vld [vmem:[#allocation4 + $0x1b8] sm:$0xff] }
  0x1e   :  { %301 = vmatpush.msra.mxu0 %v237_v16  ;;  %3209 = vmatpush.msra.mxu2 %v237_v16  ;;  %v149_v33 = vld [vmem:[#allocation2 + $0x260] sm:$0xff]  ;;  %v151_v42 = vld [vmem:[#allocation2 + $0x270] sm:$0xff]  ;;  %v162_v62 = vld [vmem:[#allocation2 + $0x2c8] sm:$0xff] }
  0x1f   :  { %3225 = vmatpush.msra.mxu3 %v269_v17  ;;  %543 = vmatpush.msra.mxu1 %v269_v17  ;;  %v77_v44 = vld [vmem:[#allocation2 + $0x20] sm:$0xff]  ;;  %v79_v47 = vld [vmem:[#allocation2 + $0x30] sm:$0xff]  ;;  %v164_v1 = vld [vmem:[#allocation2 + $0x2d8] sm:$0xff] }
  0x20   :  { %302 = vmatpush.msra.mxu0 %v235_v18  ;;  %3210 = vmatpush.msra.mxu2 %v235_v18  ;;  %v153_v45 = vld [vmem:[#allocation2 + $0x280] sm:$0xff]  ;;  %v155_v48 = vld [vmem:[#allocation2 + $0x290] sm:$0xff]  ;;  %v244_v2 = vld [vmem:[#allocation4 + $0xa8] sm:$0xff] }
  0x21   :  { %3226 = vmatpush.msra.mxu3 %v267_v19  ;;  %544 = vmatpush.msra.mxu1 %v267_v19  ;;  %v81_v52 = vld [vmem:[#allocation2 + $0x40] sm:$0xff]  ;;  %v83_v55 = vld [vmem:[#allocation2 + $0x50] sm:$0xff]  ;;  %v276_v3 = vld [vmem:[#allocation4 + $0x1a8] sm:$0xff] }
  0x22   :  { %303 = vmatpush.msra.mxu0 %v233_v20  ;;  %3211 = vmatpush.msra.mxu2 %v233_v20  ;;  %v157_v53 = vld [vmem:[#allocation2 + $0x2a0] sm:$0xff]  ;;  %v159_v56 = vld [vmem:[#allocation2 + $0x2b0] sm:$0xff]  ;;  %v166_v6 = vld [vmem:[#allocation2 + $0x2e8] sm:$0xff] }
  0x23   :  { %3227 = vmatpush.msra.mxu3 %v265_v21  ;;  %545 = vmatpush.msra.mxu1 %v265_v21  ;;  %v85_v60 = vld [vmem:[#allocation2 + $0x60] sm:$0xff]  ;;  %v87_v63 = vld [vmem:[#allocation2 + $0x70] sm:$0xff]  ;;  %v168_v9 = vld [vmem:[#allocation2 + $0x2f8] sm:$0xff] }
  0x24   :  { %304 = vmatpush.msra.mxu0 %v231_v22  ;;  %3212 = vmatpush.msra.mxu2 %v231_v22  ;;  %v161_v61 = vld [vmem:[#allocation2 + $0x2c0] sm:$0xff]  ;;  %v163_v0 = vld [vmem:[#allocation2 + $0x2d0] sm:$0xff]  ;;  %v242_v10 = vld [vmem:[#allocation4 + $0x98] sm:$0xff] }
  0x25   :  { %3228 = vmatpush.msra.mxu3 %v263_v23  ;;  %546 = vmatpush.msra.mxu1 %v263_v23  ;;  %v89_v4 = vld [vmem:[#allocation2 + $0x80] sm:$0xff]  ;;  %v91_v7 = vld [vmem:[#allocation2 + $0x90] sm:$0xff]  ;;  %v170_v13 = vld [vmem:[#allocation2 + $0x308] sm:$0xff] }
  0x26   :  { %305 = vmatpush.msra.mxu0 %v229_v24  ;;  %3213 = vmatpush.msra.mxu2 %v229_v24  ;;  %v165_v5 = vld [vmem:[#allocation2 + $0x2e0] sm:$0xff]  ;;  %v167_v8 = vld [vmem:[#allocation2 + $0x2f0] sm:$0xff]  ;;  %v274_v14 = vld [vmem:[#allocation4 + $0x198] sm:$0xff] }
  0x27   :  { %3229 = vmatpush.msra.mxu3 %v261_v25  ;;  %547 = vmatpush.msra.mxu1 %v261_v25  ;;  %v93_v11 = vld [vmem:[#allocation2 + $0xa0] sm:$0xff]  ;;  %v95_v15 = vld [vmem:[#allocation2 + $0xb0] sm:$0xff]  ;;  %v172_v17 = vld [vmem:[#allocation2 + $0x318] sm:$0xff] }
  0x28   :  { %306 = vmatpush.msra.mxu0 %v227_v26  ;;  %3214 = vmatpush.msra.mxu2 %v227_v26  ;;  %v169_v12 = vld [vmem:[#allocation2 + $0x300] sm:$0xff]  ;;  %v171_v16 = vld [vmem:[#allocation2 + $0x310] sm:$0xff]  ;;  %v174_v20 = vld [vmem:[#allocation2 + $0x328] sm:$0xff] }
  0x29   :  { %3230 = vmatpush.msra.mxu3 %v259_v27  ;;  %548 = vmatpush.msra.mxu1 %v259_v27  ;;  %v97_v18 = vld [vmem:[#allocation2 + $0xc0] sm:$0xff]  ;;  %v3483_v22 = vld [vmem:[#allocation2 + $0x8] sm:$0xff]  ;;  %v240_v23 = vld [vmem:[#allocation4 + $0x88] sm:$0xff] }
  0x2a   :  { %307 = vmatpush.msra.mxu0 %v225_v28  ;;  %3215 = vmatpush.msra.mxu2 %v225_v28  ;;  %v173_v19 = vld [vmem:[#allocation2 + $0x320] sm:$0xff]  ;;  %v99_v25 = vld [vmem:[#allocation2 + $0xd0] sm:$0xff]  ;;  %v176_v27 = vld [vmem:[#allocation2 + $0x338] sm:$0xff] }
  0x2b   :  { %3231 = vmatpush.msra.mxu3 %v257_v29  ;;  %549 = vmatpush.msra.mxu1 %v257_v29  ;;  %v1441_v21 = vld [vmem:[#allocation6 + $0xf0] sm:$0xff]  ;;  %v175_v26 = vld [vmem:[#allocation2 + $0x330] sm:$0xff]  ;;  %v272_v28 = vld [vmem:[#allocation4 + $0x188] sm:$0xff] }
  0x2c   :  { %308 = vmatpush.msra.mxu0 %v223_v30  ;;  %3216 = vmatpush.msra.mxu2 %v223_v30  ;;  %v1473_v24 = vld [vmem:[#allocation6 + $0x1f0] sm:$0xff]  ;;  %v3486_v29 = vld [vmem:[#allocation2 + $0x18] sm:$0xff] }
  0x2d   :  { %3232 = vmatpush.msra.mxu3 %v255_v31  ;;  %309 = vmatmul.f32.vlgmr.msra.gmra.mxu0 %v73_v32  ;;  %v101_v30 = vld [vmem:[#allocation2 + $0xe0] sm:$0xff]  ;;  %v178_v32 = vld [vmem:[#allocation2 + $0x348] sm:$0xff] }
  0x2e   :  { %423 = vmatmul.f32.vlgmr.msra.gmra.mxu2 %v149_v33  ;;  %665 = vmatmul.f32.vlgmr.msra.gmra.mxu3 %v150_v34  ;;  %v3489_v33 = vld [vmem:[#allocation2 + $0x28] sm:$0xff]  ;;  %v103_v34 = vld [vmem:[#allocation2 + $0xf0] sm:$0xff] }
  0x2f   :  { %777 = vmatpush.msrb.mxu2 %v254_v35  ;;  %1019 = vmatpush.msrb.mxu3 %v286_v36  ;;  %v179_v35 = vld [vmem:[#allocation2 + $0x350] sm:$0xff]  ;;  %v180_v36 = vld [vmem:[#allocation2 + $0x358] sm:$0xff] }
  0x30   :  { %550 = vmatpush.msra.mxu1 %v255_v31  ;;  %1481 = vmatpush.msrb.mxu0 %v1441_v21  ;;  %v177_v31 = vld [vmem:[#allocation2 + $0x340] sm:$0xff] }
  0x31   :  { %778 = vmatpush.msrb.mxu2 %v252_v37  ;;  %1020 = vmatpush.msrb.mxu3 %v284_v38  ;;  %v1439_v37 = vld [vmem:[#allocation6 + $0xe0] sm:$0xff]  ;;  %v238_v38 = vld [vmem:[#allocation4 + $0x78] sm:$0xff] }
  0x32   :  { %551 = vmatmul.f32.vlgmr.msra.gmra.mxu1 %v3483_v22  ;;  %1482 = vmatpush.msrb.mxu0 %v1439_v37  ;;  %v191_v37 = vld [vmem:[#allocation2 + $0x3b0] sm:$0xff] }
  0x33   :  { %779 = vmatpush.msrb.mxu2 %v250_v39  ;;  %1021 = vmatpush.msrb.mxu3 %v282_v40  ;;  %v1471_v39 = vld [vmem:[#allocation6 + $0x1e0] sm:$0xff]  ;;  %v270_v40 = vld [vmem:[#allocation4 + $0x178] sm:$0xff] }
  0x34   :  { %1723 = vmatpush.msrb.mxu1 %v1473_v24  ;;  %v189_v24 = vld [vmem:[#allocation2 + $0x3a0] sm:$0xff] }
  0x35   :  { %312 = vmatmul.f32.gmra.mxu0 %v75_v41  ;;  %780 = vmatpush.msrb.mxu2 %v248_v50  ;;  %v3492_v41 = vld [vmem:[#allocation2 + $0x38] sm:$0xff] }
  0x36   :  { %426 = vmatmul.f32.gmra.mxu2 %v151_v42  ;;  %668 = vmatmul.f32.gmra.mxu3 %v152_v43  ;;  %v105_v43 = vld [vmem:[#allocation2 + $0x100] sm:$0xff] }
  0x37   :  { %1022 = vmatpush.msrb.mxu3 %v280_v51  ;;  %781 = vmatpush.msrb.mxu2 %v246_v58  ;;  %v236_v58 = vld [vmem:[#allocation4 + $0x68] sm:$0xff] }
  0x38   :  { %1724 = vmatpush.msrb.mxu1 %v1471_v39 }
  0x39   :  { %1023 = vmatpush.msrb.mxu3 %v278_v59  ;;  %782 = vmatpush.msrb.mxu2 %v244_v2  ;;  %v1469_v59 = vld [vmem:[#allocation6 + $0x1d0] sm:$0xff] }
  0x3a   :  { %554 = vmatmul.f32.gmra.mxu1 %v3486_v29  ;;  %v109_v2 = vld [vmem:[#allocation2 + $0x120] sm:$0xff] }
  0x3b   :  { %1024 = vmatpush.msrb.mxu3 %v276_v3  ;;  %783 = vmatpush.msrb.mxu2 %v242_v10  ;;  %v185_v3 = vld [vmem:[#allocation2 + $0x380] sm:$0xff] }
  0x3c   :  { %1725 = vmatpush.msrb.mxu1 %v1469_v59  ;;  %v3550_v59 = vld [vmem:[#allocation2 + $0xa8] sm:$0xff] }
  0x3d   :  { %315 = vmatmul.f32.gmra.mxu0 %v77_v44  ;;  %1025 = vmatpush.msrb.mxu3 %v274_v14  ;;  %v287_v44 = vld [vmem:[%s6326_s2] sm:$0x3] }
  0x3e   :  { %429 = vmatmul.f32.gmra.mxu2 %v153_v45  ;;  %671 = vmatmul.f32.gmra.mxu3 %v154_v46  ;;  %v181_v45 = vld [vmem:[#allocation2 + $0x360] sm:$0xff]  ;;  %v182_v46 = vld [vmem:[#allocation2 + $0x368] sm:$0xff] }
  0x3f   :  { %784 = vmatpush.msrb.mxu2 %v240_v23  ;;  %1026 = vmatpush.msrb.mxu3 %v272_v28  ;;  %v113_v23 = vld [vmem:[#allocation2 + $0x140] sm:$0xff]  ;;  %v1467_v28 = vld [vmem:[#allocation6 + $0x1c0] sm:$0xff] }
  0x40   :  { %1726 = vmatpush.msrb.mxu1 %v1467_v28 }
  0x41   :  { %785 = vmatpush.msrb.mxu2 %v238_v38  ;;  %1027 = vmatpush.msrb.mxu3 %v270_v40  ;;  %v192_v38 = vld [vmem:[#allocation2 + $0x3b8] sm:$0xff] }
  0x42   :  { %557 = vmatmul.f32.gmra.mxu1 %v3489_v33  ;;  %v3542_v40 = vld [vmem:[#allocation2 + $0x98] sm:$0xff] }
  0x43   :  { %786 = vmatpush.msrb.mxu2 %v236_v58  ;;  %v1465_v58 = vld [vmem:[#allocation6 + $0x1b0] sm:$0xff] }
  0x44   :  { %1727 = vmatpush.msrb.mxu1 %v1465_v58 }
  0x45   :  { %318 = vmatmul.f32.gmra.mxu0 %v79_v47  ;;  %v3500_v47 = vperm.slane %v287_v44, 0 }
  0x46   :  { %432 = vmatmul.f32.gmra.mxu2 %v155_v48  ;;  %674 = vmatmul.f32.gmra.mxu3 %v156_v49  ;;  %v3502_v48 = vld [vmem:[#allocation2 + $0x48] sm:$0xff] }
  0x4a   :  { %560 = vmatmul.f32.gmra.mxu1 %v3492_v41 }
  0x4d   :  { %321 = vmatmul.f32.gmra.mxu0 %v81_v52 }
  0x4e   :  { %435 = vmatmul.f32.gmra.mxu2 %v157_v53  ;;  %677 = vmatmul.f32.gmra.mxu3 %v158_v54  ;;  %v107_v53 = vld [vmem:[#allocation2 + $0x110] sm:$0xff] }
  0x4f   :  { %v183_v54 = vld [vmem:[#allocation2 + $0x370] sm:$0xff] }
  0x52   :  { %563 = vmatmul.f32.gmra.mxu1 %v3502_v48 }
  0x55   :  { %324 = vmatmul.f32.gmra.mxu0 %v83_v55  ;;  %v184_v55 = vld [vmem:[#allocation2 + $0x378] sm:$0xff] }
  0x56   :  { %438 = vmatmul.f32.gmra.mxu2 %v159_v56  ;;  %680 = vmatmul.f32.gmra.mxu3 %v160_v57  ;;  %v1437_v57 = vld [vmem:[#allocation6 + $0xd0] sm:$0xff] }
  0x57   :  { %1483 = vmatpush.msrb.mxu0 %v1437_v57  ;;  %v264_v57 = vld [vmem:[#allocation4 + $0x148] sm:$0xff] }
  0x5d   :  { %327 = vmatmul.f32.gmra.mxu0 %v85_v60  ;;  %v268_v60 = vld [vmem:[#allocation4 + $0x168] sm:$0xff] }
  0x5e   :  { %441 = vmatmul.f32.gmra.mxu2 %v161_v61  ;;  %683 = vmatmul.f32.gmra.mxu3 %v162_v62  ;;  %v3510_v61 = vld [vmem:[#allocation2 + $0x58] sm:$0xff] }
  0x5f   :  { %1028 = vmatpush.msrb.mxu3 %v268_v60  ;;  %566 = vmatmul.f32.gmra.mxu1 %v3510_v61 }
  0x65   :  { %330 = vmatmul.f32.gmra.mxu0 %v87_v63 }
  0x66   :  { %444 = vmatmul.f32.gmra.mxu2 %v163_v0  ;;  %686 = vmatmul.f32.gmra.mxu3 %v164_v1 }
  0x6d   :  { %333 = vmatmul.f32.gmra.mxu0 %v89_v4  ;;  %v186_v4 = vld [vmem:[#allocation2 + $0x388] sm:$0xff] }
  0x6e   :  { %447 = vmatmul.f32.gmra.mxu2 %v165_v5  ;;  %689 = vmatmul.f32.gmra.mxu3 %v166_v6  ;;  %v3518_v6 = vld [vmem:[#allocation2 + $0x68] sm:$0xff] }
  0x6f   :  { %569 = vmatmul.f32.gmra.mxu1 %v3518_v6 }
  0x75   :  { %336 = vmatmul.f32.gmra.mxu0 %v91_v7 }
  0x76   :  { %450 = vmatmul.f32.gmra.mxu2 %v167_v8  ;;  %692 = vmatmul.f32.gmra.mxu3 %v168_v9 }
  0x7d   :  { %339 = vmatmul.f32.gmra.mxu0 %v93_v11  ;;  %v111_v11 = vld [vmem:[#allocation2 + $0x130] sm:$0xff] }
  0x7e   :  { %453 = vmatmul.f32.gmra.mxu2 %v169_v12  ;;  %695 = vmatmul.f32.gmra.mxu3 %v170_v13  ;;  %v187_v12 = vld [vmem:[#allocation2 + $0x390] sm:$0xff]  ;;  %v188_v13 = vld [vmem:[#allocation2 + $0x398] sm:$0xff] }
  0x85   :  { %342 = vmatmul.f32.gmra.mxu0 %v95_v15  ;;  %v234_v15 = vld [vmem:[#allocation4 + $0x58] sm:$0xff] }
  0x86   :  { %456 = vmatmul.f32.gmra.mxu2 %v171_v16  ;;  %698 = vmatmul.f32.gmra.mxu3 %v172_v17  ;;  %v1435_v16 = vld [vmem:[#allocation6 + $0xc0] sm:$0xff]  ;;  %v3526_v17 = vld [vmem:[#allocation2 + $0x78] sm:$0xff] }
  0x87   :  { %787 = vmatpush.msrb.mxu2 %v234_v15  ;;  %1484 = vmatpush.msrb.mxu0 %v1435_v16  ;;  %v121_v15 = vld [vmem:[#allocation2 + $0x180] sm:$0xff] }
  0x88   :  { %572 = vmatmul.f32.gmra.mxu1 %v3526_v17  ;;  %v197_v16 = vld [vmem:[#allocation2 + $0x3e0] sm:$0xff] }
  0x8d   :  { %345 = vmatmul.f32.gmra.mxu0 %v97_v18 }
  0x8e   :  { %459 = vmatmul.f32.gmra.mxu2 %v173_v19  ;;  %701 = vmatmul.f32.gmra.mxu3 %v174_v20 }
  0x95   :  { %348 = vmatmul.f32.gmra.mxu0 %v99_v25  ;;  %v190_v25 = vld [vmem:[#allocation2 + $0x3a8] sm:$0xff] }
  0x96   :  { %462 = vmatmul.f32.gmra.mxu2 %v175_v26  ;;  %704 = vmatmul.f32.gmra.mxu3 %v176_v27  ;;  %v266_v27 = vld [vmem:[#allocation4 + $0x158] sm:$0xff] }
  0x97   :  { %1029 = vmatpush.msrb.mxu3 %v266_v27  ;;  %v3566_v27 = vld [vmem:[#allocation2 + $0xc8] sm:$0xff] }
  0x99   :  { %1030 = vmatpush.msrb.mxu3 %v264_v57  ;;  %v202_v57 = vld [vmem:[#allocation2 + $0x408] sm:$0xff] }
  0x9d   :  { %351 = vmatmul.f32.gmra.mxu0 %v101_v30  ;;  %v3534_v30 = vld [vmem:[#allocation2 + $0x88] sm:$0xff] }
  0x9e   :  { %465 = vmatmul.f32.gmra.mxu2 %v177_v31  ;;  %707 = vmatmul.f32.gmra.mxu3 %v178_v32 }
  0x9f   :  { %575 = vmatmul.f32.gmra.mxu1 %v3534_v30 }
  0xa5   :  { %354 = vmatmul.f32.gmra.mxu0 %v103_v34 }
  0xa6   :  { %468 = vmatmul.f32.gmra.mxu2 %v179_v35  ;;  %710 = vmatmul.f32.gmra.mxu3 %v180_v36  ;;  %v115_v36 = vld [vmem:[#allocation2 + $0x150] sm:$0xff] }
  0xa7   :  { %578 = vmatmul.f32.gmra.mxu1 %v3542_v40 }
  0xaa   :  { %v3495_v42 = vpop.f32.mrf.mxu0 }
  0xad   :  { %357 = vmatmul.f32.gmra.mxu0 %v105_v43 }
  0xae   :  { %471 = vmatmul.f32.gmra.mxu2 %v181_v45  ;;  %713 = vmatmul.f32.gmra.mxu3 %v182_v46 }
  0xaf   :  { %581 = vmatmul.f32.gmra.mxu1 %v3550_v59 }
  0xb1   :  { %v424_v49 = vpop.f32.mrf.mxu2  ;;  %v666_v50 = vpop.f32.mrf.mxu3 }
  0xb2   :  { %v425_v51 = vadd.f32 %v424_v49, %v3500_v47  ;;  %v3506_v52 = vpop.f32.mrf.mxu0  ;;  %v117_v49 = vld [vmem:[#allocation2 + $0x160] sm:$0xff] }
  0xb4   :  { %v3508_v56 = vadd.f32 %v666_v50, %v425_v51  ;;  %v193_v50 = vld [vmem:[#allocation2 + $0x3c0] sm:$0xff]  ;;  %v194_v51 = vld [vmem:[#allocation2 + $0x3c8] sm:$0xff] }
  0xb5   :  { %360 = vmatmul.f32.gmra.mxu0 %v107_v53 }
  0xb6   :  { %6652 = vst [vmem:[#allocation9_spill] sm:$0xff] %v3508_v56  ;;  %474 = vmatmul.f32.gmra.mxu2 %v183_v54  ;;  %716 = vmatmul.f32.gmra.mxu3 %v184_v55  ;;  %v232_v54 = vld [vmem:[#allocation4 + $0x48] sm:$0xff]  ;;  %v1433_v55 = vld [vmem:[#allocation6 + $0xb0] sm:$0xff] }
  0xb7   :  { %788 = vmatpush.msrb.mxu2 %v232_v54  ;;  %1485 = vmatpush.msrb.mxu0 %v1433_v55  ;;  %v125_v54 = vld [vmem:[#allocation2 + $0x1a0] sm:$0xff] }
  0xb8   :  { %v201_v55 = vld [vmem:[#allocation2 + $0x400] sm:$0xff] }
  0xb9   :  { %v427_v62 = vpop.f32.mrf.mxu2  ;;  %v669_v63 = vpop.f32.mrf.mxu3  ;;  %v145_v56 = vld [vmem:[#allocation2 + $0x240] sm:$0xff] }
  0xba   :  { %v428_v0 = vadd.f32 %v427_v62, %v3500_v47  ;;  %v3514_v1 = vpop.f32.mrf.mxu0 }
  0xbc   :  { %v3516_v5 = vadd.f32 %v669_v63, %v428_v0 }
  0xbd   :  { %363 = vmatmul.f32.gmra.mxu0 %v109_v2  ;;  %v119_v2 = vld [vmem:[#allocation2 + $0x170] sm:$0xff] }
  0xbe   :  { %6653 = vst [vmem:[#allocation10_spill] sm:$0xff] %v3516_v5  ;;  %477 = vmatmul.f32.gmra.mxu2 %v185_v3  ;;  %719 = vmatmul.f32.gmra.mxu3 %v186_v4  ;;  %v195_v3 = vld [vmem:[#allocation2 + $0x3d0] sm:$0xff]  ;;  %v196_v4 = vld [vmem:[#allocation2 + $0x3d8] sm:$0xff] }
  0xc1   :  { %v430_v7 = vpop.f32.mrf.mxu2  ;;  %v672_v8 = vpop.f32.mrf.mxu3 }
  0xc2   :  { %v431_v9 = vadd.f32 %v430_v7, %v3500_v47  ;;  %v3522_v10 = vpop.f32.mrf.mxu0 }
  0xc4   :  { %v3524_v14 = vadd.f32 %v672_v8, %v431_v9  ;;  %v3558_v8 = vld [vmem:[#allocation2 + $0xb8] sm:$0xff] }
  0xc5   :  { %366 = vmatmul.f32.gmra.mxu0 %v111_v11  ;;  %584 = vmatmul.f32.gmra.mxu1 %v3558_v8 }
  0xc6   :  { %6654 = vst [vmem:[#allocation11_spill] sm:$0xff] %v3524_v14  ;;  %480 = vmatmul.f32.gmra.mxu2 %v187_v12  ;;  %722 = vmatmul.f32.gmra.mxu3 %v188_v13 }
  0xc9   :  { %v433_v18 = vpop.f32.mrf.mxu2  ;;  %v675_v19 = vpop.f32.mrf.mxu3 }
  0xca   :  { %v434_v20 = vadd.f32 %v433_v18, %v3500_v47  ;;  %v3530_v21 = vpop.f32.mrf.mxu0  ;;  %v198_v18 = vld [vmem:[#allocation2 + $0x3e8] sm:$0xff] }
  0xcc   :  { %v3532_v26 = vadd.f32 %v675_v19, %v434_v20  ;;  %v230_v20 = vld [vmem:[#allocation4 + $0x38] sm:$0xff] }
  0xcd   :  { %369 = vmatmul.f32.gmra.mxu0 %v113_v23  ;;  %v1431_v23 = vld [vmem:[#allocation6 + $0xa0] sm:$0xff]  ;;  %789 = vmatpush.msrb.mxu2 %v230_v20  ;;  %v1461_v20 = vld [vmem:[#allocation6 + $0x190] sm:$0xff] }
  0xce   :  { %6655 = vst [vmem:[#allocation12_spill] sm:$0xff] %v3532_v26  ;;  %483 = vmatmul.f32.gmra.mxu2 %v189_v24  ;;  %725 = vmatmul.f32.gmra.mxu3 %v190_v25  ;;  %v262_v24 = vld [vmem:[#allocation4 + $0x138] sm:$0xff]  ;;  %v1463_v25 = vld [vmem:[#allocation6 + $0x1a0] sm:$0xff] }
  0xcf   :  { %1486 = vmatpush.msrb.mxu0 %v1431_v23  ;;  %1031 = vmatpush.msrb.mxu3 %v262_v24  ;;  %v3590_v23 = vld [vmem:[#allocation2 + $0xf8] sm:$0xff] }
  0xd0   :  { %1728 = vmatpush.msrb.mxu1 %v1463_v25 }
  0xd1   :  { %v436_v31 = vpop.f32.mrf.mxu2  ;;  %v678_v32 = vpop.f32.mrf.mxu3  ;;  %587 = vmatmul.f32.gmra.mxu1 %v3566_v27 }
  0xd2   :  { %v437_v34 = vadd.f32 %v436_v31, %v3500_v47  ;;  %v3538_v35 = vpop.f32.mrf.mxu0  ;;  %1729 = vmatpush.msrb.mxu1 %v1461_v20  ;;  %v3610_v20 = vld [vmem:[#allocation2 + $0x118] sm:$0xff] }
  0xd4   :  { %v3540_v39 = vadd.f32 %v678_v32, %v437_v34 }
  0xd5   :  { %372 = vmatmul.f32.gmra.mxu0 %v115_v36  ;;  %v123_v36 = vld [vmem:[#allocation2 + $0x190] sm:$0xff] }
  0xd6   :  { %6656 = vst [vmem:[#allocation13_spill] sm:$0xff] %v3540_v39  ;;  %486 = vmatmul.f32.gmra.mxu2 %v191_v37  ;;  %728 = vmatmul.f32.gmra.mxu3 %v192_v38  ;;  %v199_v37 = vld [vmem:[#allocation2 + $0x3f0] sm:$0xff]  ;;  %v200_v38 = vld [vmem:[#allocation2 + $0x3f8] sm:$0xff] }
  0xd9   :  { %v439_v43 = vpop.f32.mrf.mxu2  ;;  %v681_v44 = vpop.f32.mrf.mxu3 }
  0xda   :  { %v440_v45 = vadd.f32 %v439_v43, %v3500_v47  ;;  %v3546_v46 = vpop.f32.mrf.mxu0 }
  0xdc   :  { %v3548_v53 = vadd.f32 %v681_v44, %v440_v45  ;;  %v3574_v44 = vld [vmem:[#allocation2 + $0xd8] sm:$0xff] }
  0xdd   :  { %375 = vmatmul.f32.gmra.mxu0 %v117_v49  ;;  %590 = vmatmul.f32.gmra.mxu1 %v3574_v44 }
  0xde   :  { %6657 = vst [vmem:[#allocation14_spill] sm:$0xff] %v3548_v53  ;;  %489 = vmatmul.f32.gmra.mxu2 %v193_v50  ;;  %731 = vmatmul.f32.gmra.mxu3 %v194_v51  ;;  %v1415_v53 = vld [vmem:[#allocation6 + $0x20] sm:$0xff] }
  0xe1   :  { %v442_v60 = vpop.f32.mrf.mxu2  ;;  %v684_v62 = vpop.f32.mrf.mxu3 }
  0xe2   :  { %v443_v63 = vadd.f32 %v442_v60, %v3500_v47  ;;  %v3554_v0 = vpop.f32.mrf.mxu0  ;;  %v228_v60 = vld [vmem:[#allocation4 + $0x28] sm:$0xff] }
  0xe3   :  { %790 = vmatpush.msrb.mxu2 %v228_v60  ;;  %v131_v60 = vld [vmem:[#allocation2 + $0x1d0] sm:$0xff] }
  0xe4   :  { %v3556_v7 = vadd.f32 %v684_v62, %v443_v63  ;;  %v3582_v62 = vld [vmem:[#allocation2 + $0xe8] sm:$0xff]  ;;  %v1429_v63 = vld [vmem:[#allocation6 + $0x90] sm:$0xff] }
  0xe5   :  { %378 = vmatmul.f32.gmra.mxu0 %v119_v2  ;;  %593 = vmatmul.f32.gmra.mxu1 %v3582_v62 }
  0xe6   :  { %6658 = vst [vmem:[#allocation15_spill] sm:$0xff] %v3556_v7  ;;  %492 = vmatmul.f32.gmra.mxu2 %v195_v3  ;;  %734 = vmatmul.f32.gmra.mxu3 %v196_v4  ;;  %v1417_v7 = vld [vmem:[#allocation6 + $0x30] sm:$0xff] }
  0xe7   :  { %1487 = vmatpush.msrb.mxu0 %v1429_v63  ;;  %v207_v63 = vld [vmem:[#allocation2 + $0x430] sm:$0xff] }
  0xe9   :  { %v445_v9 = vpop.f32.mrf.mxu2  ;;  %v687_v11 = vpop.f32.mrf.mxu3 }
  0xea   :  { %v446_v12 = vadd.f32 %v445_v9, %v3500_v47  ;;  %v3562_v13 = vpop.f32.mrf.mxu0 }
  0xec   :  { %v3564_v19 = vadd.f32 %v687_v11, %v446_v12  ;;  %v127_v11 = vld [vmem:[#allocation2 + $0x1b0] sm:$0xff] }
  0xed   :  { %381 = vmatmul.f32.gmra.mxu0 %v121_v15  ;;  %v203_v12 = vld [vmem:[#allocation2 + $0x410] sm:$0xff]  ;;  %v204_v15 = vld [vmem:[#allocation2 + $0x418] sm:$0xff]  ;;  %596 = vmatmul.f32.gmra.mxu1 %v3590_v23 }
  0xee   :  { %6659 = vst [vmem:[#allocation16_spill] sm:$0xff] %v3564_v19  ;;  %495 = vmatmul.f32.gmra.mxu2 %v197_v16  ;;  %737 = vmatmul.f32.gmra.mxu3 %v198_v18  ;;  %v260_v18 = vld [vmem:[#allocation4 + $0x128] sm:$0xff]  ;;  %v1442_v19 = vld [vmem:[#allocation6 + $0xf8] sm:$0xff] }
  0xef   :  { %1032 = vmatpush.msrb.mxu3 %v260_v18  ;;  %v1459_v18 = vld [vmem:[#allocation6 + $0x180] sm:$0xff] }
  0xf0   :  { %1730 = vmatpush.msrb.mxu1 %v1459_v18  ;;  %v211_v18 = vld [vmem:[#allocation2 + $0x450] sm:$0xff] }
  0xf1   :  { %v448_v28 = vpop.f32.mrf.mxu2  ;;  %v690_v31 = vpop.f32.mrf.mxu3 }
  0xf2   :  { %v449_v32 = vadd.f32 %v448_v28, %v3500_v47  ;;  %v3570_v34 = vpop.f32.mrf.mxu0 }
  0xf4   :  { %v3572_v43 = vadd.f32 %v690_v31, %v449_v32  ;;  %v129_v32 = vld [vmem:[#allocation2 + $0x1c0] sm:$0xff] }
  0xf5   :  { %384 = vmatmul.f32.gmra.mxu0 %v123_v36  ;;  %v205_v36 = vld [vmem:[#allocation2 + $0x420] sm:$0xff] }
  0xf6   :  { %6660 = vst [vmem:[#allocation17_spill] sm:$0xff] %v3572_v43  ;;  %498 = vmatmul.f32.gmra.mxu2 %v199_v37  ;;  %740 = vmatmul.f32.gmra.mxu3 %v200_v38  ;;  %v206_v37 = vld [vmem:[#allocation2 + $0x428] sm:$0xff]  ;;  %v139_v43 = vld [vmem:[#allocation2 + $0x210] sm:$0xff] }
  0xf9   :  { %v451_v45 = vpop.f32.mrf.mxu2  ;;  %v693_v49 = vpop.f32.mrf.mxu3 }
  0xfa   :  { %v452_v50 = vadd.f32 %v451_v45, %v3500_v47  ;;  %v3578_v51 = vpop.f32.mrf.mxu0  ;;  %v3598_v45 = vpop.f32.mrf.mxu1 }
  0xfc   :  { %v3580_v58 = vadd.f32 %v693_v49, %v452_v50  ;;  %v3600_v49 = vld [vmem:[#allocation2 + $0x108] sm:$0xff] }
  0xfd   :  { %387 = vmatmul.f32.gmra.mxu0 %v125_v54  ;;  %599 = vmatmul.f32.gmra.mxu1 %v3600_v49 }
  0xfe   :  { %6661 = vst [vmem:[#allocation18_spill] sm:$0xff] %v3580_v58  ;;  %501 = vmatmul.f32.gmra.mxu2 %v201_v55  ;;  %743 = vmatmul.f32.gmra.mxu3 %v202_v57 }
 0x101   :  { %v454_v2 = vpop.f32.mrf.mxu2  ;;  %v696_v3 = vpop.f32.mrf.mxu3 }
 0x102   :  { %v455_v4 = vadd.f32 %v454_v2, %v3500_v47  ;;  %v3586_v9 = vpop.f32.mrf.mxu0  ;;  %v208_v2 = vld [vmem:[#allocation2 + $0x438] sm:$0xff] }
 0x104   :  { %v3588_v16 = vadd.f32 %v696_v3, %v455_v4  ;;  %v3608_v4 = vpop.f32.mrf.mxu1 }
 0x105   :  { %390 = vmatmul.f32.gmra.mxu0 %v127_v11  ;;  %v226_v11 = vld [vmem:[#allocation4 + $0x18] sm:$0xff]  ;;  %602 = vmatmul.f32.gmra.mxu1 %v3610_v20 }
 0x106   :  { %6662 = vst [vmem:[#allocation19_spill] sm:$0xff] %v3588_v16  ;;  %504 = vmatmul.f32.gmra.mxu2 %v203_v12  ;;  %746 = vmatmul.f32.gmra.mxu3 %v204_v15  ;;  %v258_v12 = vld [vmem:[#allocation4 + $0x118] sm:$0xff]  ;;  %v1427_v15 = vld [vmem:[#allocation6 + $0x80] sm:$0xff] }
 0x107   :  { %791 = vmatpush.msrb.mxu2 %v226_v11  ;;  %1033 = vmatpush.msrb.mxu3 %v258_v12 }
 0x108   :  { %1488 = vmatpush.msrb.mxu0 %v1427_v15  ;;  %v135_v15 = vld [vmem:[#allocation2 + $0x1f0] sm:$0xff] }
 0x109   :  { %v457_v24 = vpop.f32.mrf.mxu2  ;;  %v699_v25 = vpop.f32.mrf.mxu3 }
 0x10a   :  { %v458_v28 = vadd.f32 %v457_v24, %v3500_v47  ;;  %v3594_v31 = vpop.f32.mrf.mxu0 }
 0x10c   :  { %v3596_v38 = vadd.f32 %v699_v25, %v458_v28 }
 0x10d   :  { %393 = vmatmul.f32.gmra.mxu0 %v129_v32 }
 0x10e   :  { %6663 = vst [vmem:[#allocation20_spill] sm:$0xff] %v3596_v38  ;;  %507 = vmatmul.f32.gmra.mxu2 %v205_v36  ;;  %749 = vmatmul.f32.gmra.mxu3 %v206_v37  ;;  %v133_v36 = vld [vmem:[#allocation2 + $0x1e0] sm:$0xff] }
 0x10f   :  { %v209_v37 = vld [vmem:[#allocation2 + $0x440] sm:$0xff] }
 0x111   :  { %v460_v50 = vpop.f32.mrf.mxu2  ;;  %v702_v54 = vpop.f32.mrf.mxu3 }
 0x112   :  { %v461_v55 = vadd.f32 %v460_v50, %v3500_v47  ;;  %v3604_v57 = vpop.f32.mrf.mxu0  ;;  %v210_v50 = vld [vmem:[#allocation2 + $0x448] sm:$0xff] }
 0x114   :  { %v3606_v3 = vadd.f32 %v702_v54, %v461_v55  ;;  %v3618_v55 = vpop.f32.mrf.mxu1 }
 0x115   :  { %396 = vmatmul.f32.gmra.mxu0 %v131_v60  ;;  %v3620_v60 = vld [vmem:[#allocation2 + $0x128] sm:$0xff] }
 0x116   :  { %6664 = vst [vmem:[#allocation21_spill] sm:$0xff] %v3606_v3  ;;  %510 = vmatmul.f32.gmra.mxu2 %v207_v63  ;;  %752 = vmatmul.f32.gmra.mxu3 %v208_v2 }
 0x117   :  { %605 = vmatmul.f32.gmra.mxu1 %v3620_v60 }
 0x119   :  { %v463_v24 = vpop.f32.mrf.mxu2  ;;  %v705_v25 = vpop.f32.mrf.mxu3 }
 0x11a   :  { %v464_v28 = vadd.f32 %v463_v24, %v3500_v47  ;;  %v3614_v32 = vpop.f32.mrf.mxu0  ;;  %v212_v24 = vld [vmem:[#allocation2 + $0x458] sm:$0xff] }
 0x11c   :  { %v3616_v54 = vadd.f32 %v705_v25, %v464_v28  ;;  %v224_v28 = vld [vmem:[#allocation4 + $0x8] sm:$0xff] }
 0x11d   :  { %399 = vmatmul.f32.gmra.mxu0 %v133_v36  ;;  %v3628_v36 = vpop.f32.mrf.mxu1  ;;  %792 = vmatpush.msrb.mxu2 %v224_v28 }
 0x11e   :  { %6665 = vst [vmem:[#allocation22_spill] sm:$0xff] %v3616_v54  ;;  %513 = vmatmul.f32.gmra.mxu2 %v209_v37  ;;  %755 = vmatmul.f32.gmra.mxu3 %v210_v50  ;;  %v256_v37 = vld [vmem:[#allocation4 + $0x108] sm:$0xff]  ;;  %v1425_v50 = vld [vmem:[#allocation6 + $0x70] sm:$0xff] }
 0x11f   :  { %1034 = vmatpush.msrb.mxu3 %v256_v37  ;;  %v3630_v54 = vld [vmem:[#allocation2 + $0x138] sm:$0xff]  ;;  %1489 = vmatpush.msrb.mxu0 %v1425_v50  ;;  %v3640_v37 = vld [vmem:[#allocation2 + $0x148] sm:$0xff]  ;;  %v1423_v50 = vld [vmem:[#allocation6 + $0x60] sm:$0xff] }
 0x120   :  { %608 = vmatmul.f32.gmra.mxu1 %v3630_v54  ;;  %6668 = vst [vmem:[#allocation25_spill] sm:$0xff] %v3640_v37  ;;  %1965 = vmatpush.msra.mxu2 %v1442_v19  ;;  %v1455_v19 = vld [vmem:[#allocation6 + $0x160] sm:$0xff] }
 0x121   :  { %v466_v63 = vpop.f32.mrf.mxu2  ;;  %v708_v2 = vpop.f32.mrf.mxu3  ;;  %1490 = vmatpush.msrb.mxu0 %v1423_v50  ;;  %v3650_v50 = vld [vmem:[#allocation2 + $0x158] sm:$0xff] }
 0x122   :  { %v467_v11 = vadd.f32 %v466_v63, %v3500_v47  ;;  %v3624_v12 = vpop.f32.mrf.mxu0  ;;  %v1457_v63 = vld [vmem:[#allocation6 + $0x170] sm:$0xff]  ;;  %6670 = vst [vmem:[#allocation27_spill] sm:$0xff] %v3650_v50 }
 0x123   :  { %1731 = vmatpush.msrb.mxu1 %v1457_v63 }
 0x124   :  { %v3626_v25 = vadd.f32 %v708_v2, %v467_v11 }
 0x125   :  { %402 = vmatmul.f32.gmra.mxu0 %v135_v15  ;;  %v137_v15 = vld [vmem:[#allocation2 + $0x200] sm:$0xff]  ;;  %v3638_v28 = vpop.f32.mrf.mxu1  ;;  %1732 = vmatpush.msrb.mxu1 %v1455_v19 }
 0x126   :  { %6666 = vst [vmem:[#allocation23_spill] sm:$0xff] %v3626_v25  ;;  %516 = vmatmul.f32.gmra.mxu2 %v211_v18  ;;  %758 = vmatmul.f32.gmra.mxu3 %v212_v24  ;;  %v213_v18 = vld [vmem:[#allocation2 + $0x460] sm:$0xff]  ;;  %v214_v24 = vld [vmem:[#allocation2 + $0x468] sm:$0xff] }
 0x128   :  { %611 = vmatmul.f32.gmra.mxu1 %v3640_v37  ;;  %v147_v37 = vld [vmem:[#allocation2 + $0x250] sm:$0xff] }
 0x129   :  { %v469_v3 = vpop.f32.mrf.mxu2  ;;  %v711_v38 = vpop.f32.mrf.mxu3 }
 0x12a   :  { %v470_v2 = vadd.f32 %v469_v3, %v3500_v47  ;;  %v3634_v11 = vpop.f32.mrf.mxu0 }
 0x12c   :  { %v3636_v25 = vadd.f32 %v711_v38, %v470_v2  ;;  %v1421_v38 = vld [vmem:[#allocation6 + $0x50] sm:$0xff]  ;;  %v215_v2 = vld [vmem:[#allocation2 + $0x470] sm:$0xff] }
 0x12d   :  { %405 = vmatmul.f32.gmra.mxu0 %v137_v15  ;;  %v216_v15 = vld [vmem:[#allocation2 + $0x478] sm:$0xff] }
 0x12e   :  { %6667 = vst [vmem:[#allocation24_spill] sm:$0xff] %v3636_v25  ;;  %519 = vmatmul.f32.gmra.mxu2 %v213_v18  ;;  %761 = vmatmul.f32.gmra.mxu3 %v214_v24  ;;  %v1419_v24 = vld [vmem:[#allocation6 + $0x40] sm:$0xff]  ;;  %v3648_v25 = vpop.f32.mrf.mxu1 }
 0x12f   :  { %1491 = vmatpush.msrb.mxu0 %v1421_v38  ;;  %v217_v38 = vld [vmem:[#allocation2 + $0x480] sm:$0xff] }
 0x130   :  { %614 = vmatmul.f32.gmra.mxu1 %v3650_v50  ;;  %v222_v50 = vld [vmem:[#allocation2 + $0x4a8] sm:$0xff] }
 0x131   :  { %v472_v63 = vpop.f32.mrf.mxu2  ;;  %v714_v16 = vpop.f32.mrf.mxu3  ;;  %1492 = vmatpush.msrb.mxu0 %v1419_v24  ;;  %v1413_v24 = vld [vmem:[#allocation6 + $0x10] sm:$0xff] }
 0x132   :  { %v473_v3 = vadd.f32 %v472_v63, %v3500_v47  ;;  %v3644_v58 = vpop.f32.mrf.mxu0  ;;  %v1474_v63 = vld [vmem:[#allocation6 + $0x1f8] sm:$0xff] }
 0x133   :  { %2207 = vmatpush.msra.mxu3 %v1474_v63  ;;  %1493 = vmatpush.msrb.mxu0 %v1417_v7  ;;  %v1411_v7 = vld [vmem:[#allocation6] sm:$0xff] }
 0x134   :  { %v3646_v18 = vadd.f32 %v714_v16, %v473_v3  ;;  %v141_v3 = vld [vmem:[#allocation2 + $0x220] sm:$0xff] }
 0x135   :  { %408 = vmatmul.f32.gmra.mxu0 %v139_v43 }
 0x136   :  { %6669 = vst [vmem:[#allocation26_spill] sm:$0xff] %v3646_v18  ;;  %522 = vmatmul.f32.gmra.mxu2 %v215_v2  ;;  %764 = vmatmul.f32.gmra.mxu3 %v216_v15  ;;  %v218_v2 = vld [vmem:[#allocation2 + $0x488] sm:$0xff]  ;;  %v3658_v63 = vpop.f32.mrf.mxu1 }
 0x137   :  { %1494 = vmatpush.msrb.mxu0 %v1415_v53  ;;  %v3660_v18 = vld [vmem:[#allocation2 + $0x168] sm:$0xff] }
 0x138   :  { %6672 = vst [vmem:[#allocation29_spill] sm:$0xff] %v3660_v18  ;;  %617 = vmatmul.f32.gmra.mxu1 %v3660_v18  ;;  %v221_v18 = vld [vmem:[#allocation2 + $0x4a0] sm:$0xff] }
 0x139   :  { %v475_v39 = vpop.f32.mrf.mxu2  ;;  %v717_v26 = vpop.f32.mrf.mxu3  ;;  %1495 = vmatpush.msrb.mxu0 %v1413_v24  ;;  %v3670_v24 = vld [vmem:[#allocation2 + $0x178] sm:$0xff] }
 0x13a   :  { %v476_v43 = vadd.f32 %v475_v39, %v3500_v47  ;;  %v3654_v16 = vpop.f32.mrf.mxu0  ;;  %6674 = vst [vmem:[#allocation31_spill] sm:$0xff] %v3670_v24 }
 0x13b   :  { %1496 = vmatpush.msrb.mxu0 %v1411_v7 }
 0x13c   :  { %v3656_v15 = vadd.f32 %v717_v26, %v476_v43  ;;  %v143_v43 = vld [vmem:[#allocation2 + $0x230] sm:$0xff] }
 0x13d   :  { %411 = vmatmul.f32.gmra.mxu0 %v141_v3  ;;  %v219_v3 = vld [vmem:[#allocation2 + $0x490] sm:$0xff] }
 0x13e   :  { %6671 = vst [vmem:[#allocation28_spill] sm:$0xff] %v3656_v15  ;;  %525 = vmatmul.f32.gmra.mxu2 %v217_v38  ;;  %767 = vmatmul.f32.gmra.mxu3 %v218_v2  ;;  %v220_v38 = vld [vmem:[#allocation2 + $0x498] sm:$0xff]  ;;  %v3668_v15 = vpop.f32.mrf.mxu1 }
 0x140   :  { %620 = vmatmul.f32.gmra.mxu1 %v3670_v24 }
 0x141   :  { %v478_v39 = vpop.f32.mrf.mxu2  ;;  %v720_v14 = vpop.f32.mrf.mxu3 }
 0x142   :  { %v479_v26 = vadd.f32 %v478_v39, %v3500_v47  ;;  %v3664_v53 = vpop.f32.mrf.mxu0 }
 0x144   :  { %v3666_v2 = vadd.f32 %v720_v14, %v479_v26 }
 0x145   :  { %414 = vmatmul.f32.gmra.mxu0 %v143_v43  ;;  %v1453_v43 = vld [vmem:[#allocation6 + $0x150] sm:$0xff] }
 0x146   :  { %6673 = vst [vmem:[#allocation30_spill] sm:$0xff] %v3666_v2  ;;  %528 = vmatmul.f32.gmra.mxu2 %v219_v3  ;;  %770 = vmatmul.f32.gmra.mxu3 %v220_v38  ;;  %v3678_v26 = vpop.f32.mrf.mxu1  ;;  %v3680_v3 = vld [vmem:[#allocation2 + $0x188] sm:$0xff] }
 0x147   :  { %1733 = vmatpush.msrb.mxu1 %v1453_v43 }
 0x148   :  { %623 = vmatmul.f32.gmra.mxu1 %v3680_v3 }
 0x149   :  { %v481_v19 = vpop.f32.mrf.mxu2  ;;  %v723_v7 = vpop.f32.mrf.mxu3 }
 0x14a   :  { %v482_v39 = vadd.f32 %v481_v19, %v3500_v47  ;;  %v3674_v5 = vpop.f32.mrf.mxu0 }
 0x14c   :  { %v3676_v14 = vadd.f32 %v723_v7, %v482_v39  ;;  %v3693_v39 = vld [vmem:[#allocation2 + $0x198] sm:$0xff] }
 0x14d   :  { %417 = vmatmul.f32.gmra.mxu0 %v145_v56  ;;  %v311_v56 = vadd.f32 %v3495_v42, %v3500_v47  ;;  %6677 = vst [vmem:[#allocation34_spill] sm:$0xff] %v3693_v39 }
 0x14e   :  { %6675 = vst [vmem:[#allocation32_spill] sm:$0xff] %v3676_v14  ;;  %531 = vmatmul.f32.gmra.mxu2 %v221_v18  ;;  %773 = vmatmul.f32.gmra.mxu3 %v222_v50  ;;  %v3239_v50 = vld [vmem:[#allocation2] sm:$0xff]  ;;  %v3691_v7 = vpop.f32.mrf.mxu1 }
 0x14f   :  { %v3696_v43 = vadd.f32 %v3598_v45, %v311_v56  ;;  %v3240_v45 = vld [vmem:[#allocation2 + $0x10] sm:$0xff]  ;;  %v1440_v56 = vld [vmem:[#allocation6 + $0xe8] sm:$0xff] }
 0x150   :  { %626 = vmatmul.f32.gmra.mxu1 %v3693_v39  ;;  %1966 = vmatpush.msra.mxu2 %v1440_v56 }
 0x151   :  { %v484_v38 = vpop.f32.mrf.mxu2  ;;  %v726_v2 = vpop.f32.mrf.mxu3  ;;  %6678 = vst [vmem:[#allocation35_spill] sm:$0xff] %v3696_v43 }
 0x152   :  { %v485_v19 = vadd.f32 %v484_v38, %v3500_v47  ;;  %v3684_v24 = vpop.f32.mrf.mxu0 }
 0x154   :  { %v3688_v18 = vadd.f32 %v726_v2, %v485_v19 }
 0x155   :  { %420 = vmatmul.f32.gmra.mxu0 %v147_v37  ;;  %v314_v37 = vadd.f32 %v3506_v52, %v3500_v47 }
 0x156   :  { %6676 = vst [vmem:[#allocation33_spill] sm:$0xff] %v3688_v18  ;;  %793 = vmatmul.f32.vlgmr.msrb.gmra.mxu2 %v3239_v50  ;;  %1035 = vmatmul.f32.vlgmr.msrb.gmra.mxu3 %v3483_v22  ;;  %v6358_v22 = vmax.f32 %v3696_v43, 0.0  ;;  %v3710_v50 = vpop.f32.mrf.mxu1  ;;  %v3712_v18 = vld [vmem:[#allocation2 + $0x1a8] sm:$0xff] }
 0x157   :  { %v3715_v39 = vadd.f32 %v3608_v4, %v314_v37  ;;  %v3241_v4 = vld [vmem:[#allocation2 + $0x20] sm:$0xff]  ;;  %v1451_v37 = vld [vmem:[#allocation6 + $0x140] sm:$0xff] }
 0x158   :  { %629 = vmatmul.f32.gmra.mxu1 %v3712_v18 }
 0x159   :  { %v487_v38 = vpop.f32.mrf.mxu2  ;;  %v729_v14 = vpop.f32.mrf.mxu3  ;;  %6680 = vst [vmem:[#allocation37_spill] sm:$0xff] %v3715_v39  ;;  %1734 = vmatpush.msrb.mxu1 %v1451_v37  ;;  %v3750_v37 = vld [vmem:[#allocation2 + $0x1c8] sm:$0xff] }
 0x15a   :  { %v488_v42 = vadd.f32 %v487_v38, %v3500_v47  ;;  %v3700_v2 = vpop.f32.mrf.mxu0  ;;  %v1472_v38 = vld [vmem:[#allocation6 + $0x1e8] sm:$0xff] }
 0x15b   :  { %2208 = vmatpush.msra.mxu3 %v1472_v38  ;;  %v3731_v38 = vld [vmem:[#allocation2 + $0x1b8] sm:$0xff] }
 0x15c   :  { %v3705_v19 = vadd.f32 %v729_v14, %v488_v42 }
 0x15d   :  { %1497 = vmatmul.f32.vlgmr.msrb.gmra.mxu0 %v6358_v22  ;;  %v6361_v22 = vmax.f32 %v3715_v39, 0.0 }
 0x15e   :  { %6679 = vst [vmem:[#allocation36_spill] sm:$0xff] %v3705_v19  ;;  %796 = vmatmul.f32.gmra.mxu2 %v3240_v45  ;;  %1038 = vmatmul.f32.gmra.mxu3 %v3486_v29  ;;  %v317_v29 = vadd.f32 %v3514_v1, %v3500_v47  ;;  %v3729_v56 = vpop.f32.mrf.mxu1 }
 0x160   :  { %632 = vmatmul.f32.gmra.mxu1 %v3731_v38 }
 0x161   :  { %v490_v52 = vpop.f32.mrf.mxu2  ;;  %v732_v14 = vpop.f32.mrf.mxu3 }
 0x162   :  { %v491_v42 = vadd.f32 %v490_v52, %v3500_v47  ;;  %v3719_v45 = vpop.f32.mrf.mxu0  ;;  %v3734_v52 = vadd.f32 %v3618_v55, %v317_v29  ;;  %v3242_v55 = vld [vmem:[#allocation2 + $0x30] sm:$0xff] }
 0x164   :  { %v3724_v43 = vadd.f32 %v732_v14, %v491_v42  ;;  %6682 = vst [vmem:[#allocation39_spill] sm:$0xff] %v3734_v52 }
 0x165   :  { %1500 = vmatmul.f32.gmra.mxu0 %v6361_v22 }
 0x166   :  { %6681 = vst [vmem:[#allocation38_spill] sm:$0xff] %v3724_v43  ;;  %799 = vmatmul.f32.gmra.mxu2 %v3241_v4  ;;  %1041 = vmatmul.f32.gmra.mxu3 %v3489_v33  ;;  %v320_v33 = vadd.f32 %v3522_v10, %v3500_v47  ;;  %v6363_v4 = vmax.f32 %v3734_v52, 0.0  ;;  %v3748_v29 = vpop.f32.mrf.mxu1 }
 0x168   :  { %635 = vmatmul.f32.gmra.mxu1 %v3750_v37 }
 0x169   :  { %v493_v1 = vpop.f32.mrf.mxu2  ;;  %v735_v19 = vpop.f32.mrf.mxu3 }
 0x16a   :  { %v494_v14 = vadd.f32 %v493_v1, %v3500_v47  ;;  %v3738_v42 = vpop.f32.mrf.mxu0  ;;  %v3753_v1 = vadd.f32 %v3628_v36, %v320_v33  ;;  %v3243_v36 = vld [vmem:[#allocation2 + $0x40] sm:$0xff] }
 0x16b   :  { %v1449_v33 = vld [vmem:[#allocation6 + $0x130] sm:$0xff] }
 0x16c   :  { %v3743_v22 = vadd.f32 %v735_v19, %v494_v14  ;;  %6684 = vst [vmem:[#allocation41_spill] sm:$0xff] %v3753_v1  ;;  %1735 = vmatpush.msrb.mxu1 %v1449_v33  ;;  %v3788_v33 = vld [vmem:[#allocation2 + $0x1e8] sm:$0xff] }
 0x16d   :  { %1503 = vmatmul.f32.gmra.mxu0 %v6363_v4 }
 0x16e   :  { %6683 = vst [vmem:[#allocation40_spill] sm:$0xff] %v3743_v22  ;;  %802 = vmatmul.f32.gmra.mxu2 %v3242_v55  ;;  %1044 = vmatmul.f32.gmra.mxu3 %v3492_v41  ;;  %v323_v55 = vadd.f32 %v3530_v21, %v3500_v47  ;;  %v6367_v41 = vmax.f32 %v3753_v1, 0.0  ;;  %v3767_v52 = vpop.f32.mrf.mxu1 }
 0x170   :  { %v3772_v22 = vadd.f32 %v3638_v28, %v323_v55  ;;  %v3244_v28 = vld [vmem:[#allocation2 + $0x50] sm:$0xff] }
 0x171   :  { %v496_v39 = vpop.f32.mrf.mxu2  ;;  %v738_v10 = vpop.f32.mrf.mxu3 }
 0x172   :  { %v497_v19 = vadd.f32 %v496_v39, %v3500_v47  ;;  %v3757_v14 = vpop.f32.mrf.mxu0  ;;  %v3769_v39 = vld [vmem:[#allocation2 + $0x1d8] sm:$0xff]  ;;  %6686 = vst [vmem:[#allocation43_spill] sm:$0xff] %v3772_v22 }
 0x173   :  { %638 = vmatmul.f32.gmra.mxu1 %v3769_v39 }
 0x174   :  { %v3762_v4 = vadd.f32 %v738_v10, %v497_v19 }
 0x175   :  { %1506 = vmatmul.f32.gmra.mxu0 %v6367_v41 }
 0x176   :  { %6685 = vst [vmem:[#allocation42_spill] sm:$0xff] %v3762_v4  ;;  %805 = vmatmul.f32.gmra.mxu2 %v3243_v36  ;;  %1047 = vmatmul.f32.gmra.mxu3 %v3502_v48  ;;  %v326_v48 = vadd.f32 %v3538_v35, %v3500_v47  ;;  %v6369_v36 = vmax.f32 %v3772_v22, 0.0  ;;  %v3786_v55 = vpop.f32.mrf.mxu1  ;;  %v1470_v22 = vld [vmem:[#allocation6 + $0x1d8] sm:$0xff] }
 0x177   :  { %2209 = vmatpush.msra.mxu3 %v1470_v22  ;;  %v3246_v22 = vld [vmem:[#allocation2 + $0x70] sm:$0xff] }
 0x179   :  { %v499_v21 = vpop.f32.mrf.mxu2  ;;  %v741_v43 = vpop.f32.mrf.mxu3 }
 0x17a   :  { %v500_v10 = vadd.f32 %v499_v21, %v3500_v47  ;;  %v3776_v19 = vpop.f32.mrf.mxu0  ;;  %v3791_v21 = vadd.f32 %v3648_v25, %v326_v48  ;;  %v3245_v25 = vld [vmem:[#allocation2 + $0x60] sm:$0xff]  ;;  %v1438_v48 = vld [vmem:[#allocation6 + $0xd8] sm:$0xff] }
 0x17b   :  { %641 = vmatmul.f32.gmra.mxu1 %v3788_v33  ;;  %1967 = vmatpush.msra.mxu2 %v1438_v48  ;;  %v3826_v48 = vld [vmem:[#allocation2 + $0x208] sm:$0xff] }
 0x17c   :  { %v3781_v41 = vadd.f32 %v741_v43, %v500_v10  ;;  %6688 = vst [vmem:[#allocation45_spill] sm:$0xff] %v3791_v21 }
 0x17d   :  { %1509 = vmatmul.f32.gmra.mxu0 %v6369_v36 }
 0x17e   :  { %6687 = vst [vmem:[#allocation44_spill] sm:$0xff] %v3781_v41  ;;  %808 = vmatmul.f32.gmra.mxu2 %v3244_v28  ;;  %1050 = vmatmul.f32.gmra.mxu3 %v3510_v61  ;;  %v329_v28 = vadd.f32 %v3546_v46, %v3500_v47  ;;  %v6373_v61 = vmax.f32 %v3791_v21, 0.0  ;;  %v3805_v41 = vpop.f32.mrf.mxu1  ;;  %v3810_v46 = vld [vmem:[#allocation2 + $0x1f8] sm:$0xff] }
 0x180   :  { %v3808_v4 = vadd.f32 %v3658_v63, %v329_v28 }
 0x181   :  { %v502_v1 = vpop.f32.mrf.mxu2  ;;  %v744_v35 = vpop.f32.mrf.mxu3 }
 0x182   :  { %v503_v43 = vadd.f32 %v502_v1, %v3500_v47  ;;  %v3795_v10 = vpop.f32.mrf.mxu0  ;;  %v1447_v1 = vld [vmem:[#allocation6 + $0x120] sm:$0xff]  ;;  %6690 = vst [vmem:[#allocation47_spill] sm:$0xff] %v3808_v4  ;;  %v6375_v21 = vmax.f32 %v3808_v4, 0.0  ;;  %v3845_v4 = vld [vmem:[#allocation2 + $0x218] sm:$0xff] }
 0x183   :  { %1736 = vmatpush.msrb.mxu1 %v1447_v1 }
 0x184   :  { %v3800_v36 = vadd.f32 %v744_v35, %v503_v43  ;;  %644 = vmatmul.f32.gmra.mxu1 %v3810_v46 }
 0x185   :  { %1512 = vmatmul.f32.gmra.mxu0 %v6373_v61  ;;  %v332_v61 = vadd.f32 %v3554_v0, %v3500_v47 }
 0x186   :  { %6689 = vst [vmem:[#allocation46_spill] sm:$0xff] %v3800_v36  ;;  %811 = vmatmul.f32.gmra.mxu2 %v3245_v25  ;;  %1053 = vmatmul.f32.gmra.mxu3 %v3518_v6  ;;  %v3824_v28 = vpop.f32.mrf.mxu1 }
 0x187   :  { %v3829_v1 = vadd.f32 %v3668_v15, %v332_v61  ;;  %v3247_v15 = vld [vmem:[#allocation2 + $0x80] sm:$0xff] }
 0x189   :  { %v505_v35 = vpop.f32.mrf.mxu2  ;;  %v747_v43 = vpop.f32.mrf.mxu3  ;;  %6692 = vst [vmem:[#allocation49_spill] sm:$0xff] %v3829_v1 }
 0x18a   :  { %v506_v25 = vadd.f32 %v505_v35, %v3500_v47  ;;  %v3814_v6 = vpop.f32.mrf.mxu0 }
 0x18c   :  { %v3819_v63 = vadd.f32 %v747_v43, %v506_v25  ;;  %647 = vmatmul.f32.gmra.mxu1 %v3826_v48 }
 0x18d   :  { %1515 = vmatmul.f32.gmra.mxu0 %v6375_v21 }
 0x18e   :  { %6691 = vst [vmem:[#allocation48_spill] sm:$0xff] %v3819_v63  ;;  %814 = vmatmul.f32.gmra.mxu2 %v3246_v22  ;;  %1056 = vmatmul.f32.gmra.mxu3 %v3526_v17  ;;  %v335_v22 = vadd.f32 %v3562_v13, %v3500_v47  ;;  %v6378_v17 = vmax.f32 %v3829_v1, 0.0  ;;  %v3843_v61 = vpop.f32.mrf.mxu1 }
 0x191   :  { %v508_v35 = vpop.f32.mrf.mxu2  ;;  %v750_v0 = vpop.f32.mrf.mxu3 }
 0x192   :  { %v509_v43 = vadd.f32 %v508_v35, %v3500_v47  ;;  %v3833_v25 = vpop.f32.mrf.mxu0  ;;  %v3848_v35 = vadd.f32 %v3678_v26, %v335_v22  ;;  %v3248_v26 = vld [vmem:[#allocation2 + $0x90] sm:$0xff]  ;;  %v1445_v22 = vld [vmem:[#allocation6 + $0x110] sm:$0xff] }
 0x193   :  { %1737 = vmatpush.msrb.mxu1 %v1445_v22  ;;  %v1436_v22 = vld [vmem:[#allocation6 + $0xc8] sm:$0xff] }
 0x194   :  { %v3838_v21 = vadd.f32 %v750_v0, %v509_v43  ;;  %6694 = vst [vmem:[#allocation51_spill] sm:$0xff] %v3848_v35  ;;  %650 = vmatmul.f32.gmra.mxu1 %v3845_v4  ;;  %1968 = vmatpush.msra.mxu2 %v1436_v22 }
 0x195   :  { %1518 = vmatmul.f32.gmra.mxu0 %v6378_v17 }
 0x196   :  { %6693 = vst [vmem:[#allocation50_spill] sm:$0xff] %v3838_v21  ;;  %817 = vmatmul.f32.gmra.mxu2 %v3247_v15  ;;  %1059 = vmatmul.f32.gmra.mxu3 %v3534_v30  ;;  %v338_v15 = vadd.f32 %v3570_v34, %v3500_v47  ;;  %v6382_v30 = vmax.f32 %v3848_v35, 0.0  ;;  %v3862_v1 = vpop.f32.mrf.mxu1 }
 0x198   :  { %v3867_v21 = vadd.f32 %v3691_v7, %v338_v15  ;;  %v3249_v7 = vld [vmem:[#allocation2 + $0xa0] sm:$0xff] }
 0x199   :  { %v511_v63 = vpop.f32.mrf.mxu2  ;;  %v753_v13 = vpop.f32.mrf.mxu3 }
 0x19a   :  { %v512_v0 = vadd.f32 %v511_v63, %v3500_v47  ;;  %v3852_v43 = vpop.f32.mrf.mxu0  ;;  %v3864_v63 = vld [vmem:[#allocation2 + $0x228] sm:$0xff]  ;;  %6696 = vst [vmem:[#allocation53_spill] sm:$0xff] %v3867_v21 }
 0x19c   :  { %v3857_v17 = vadd.f32 %v753_v13, %v512_v0  ;;  %653 = vmatmul.f32.gmra.mxu1 %v3864_v63 }
 0x19d   :  { %1521 = vmatmul.f32.gmra.mxu0 %v6382_v30 }
 0x19e   :  { %6695 = vst [vmem:[#allocation52_spill] sm:$0xff] %v3857_v17  ;;  %820 = vmatmul.f32.gmra.mxu2 %v3248_v26  ;;  %1062 = vmatmul.f32.gmra.mxu3 %v3542_v40  ;;  %v341_v40 = vadd.f32 %v3578_v51, %v3500_v47  ;;  %v6385_v26 = vmax.f32 %v3867_v21, 0.0  ;;  %v3881_v15 = vpop.f32.mrf.mxu1  ;;  %v3902_v21 = vld [vmem:[#allocation2 + $0x248] sm:$0xff] }
 0x1a0   :  { %v3886_v35 = vadd.f32 %v3710_v50, %v341_v40  ;;  %v3250_v50 = vld [vmem:[#allocation2 + $0xb0] sm:$0xff]  ;;  %v1468_v40 = vld [vmem:[#allocation6 + $0x1c8] sm:$0xff] }
 0x1a1   :  { %v514_v34 = vpop.f32.mrf.mxu2  ;;  %v756_v36 = vpop.f32.mrf.mxu3  ;;  %2210 = vmatpush.msra.mxu3 %v1468_v40  ;;  %v3921_v40 = vld [vmem:[#allocation2 + $0x258] sm:$0xff] }
 0x1a2   :  { %v515_v13 = vadd.f32 %v514_v34, %v3500_v47  ;;  %v3871_v0 = vpop.f32.mrf.mxu0  ;;  %v3883_v34 = vld [vmem:[#allocation2 + $0x238] sm:$0xff]  ;;  %6698 = vst [vmem:[#allocation55_spill] sm:$0xff] %v3886_v35 }
 0x1a4   :  { %v3876_v30 = vadd.f32 %v756_v36, %v515_v13  ;;  %656 = vmatmul.f32.gmra.mxu1 %v3883_v34 }
 0x1a5   :  { %1524 = vmatmul.f32.gmra.mxu0 %v6385_v26 }
 0x1a6   :  { %6697 = vst [vmem:[#allocation54_spill] sm:$0xff] %v3876_v30  ;;  %823 = vmatmul.f32.gmra.mxu2 %v3249_v7  ;;  %1065 = vmatmul.f32.gmra.mxu3 %v3550_v59  ;;  %v344_v59 = vadd.f32 %v3586_v9, %v3500_v47  ;;  %v6388_v7 = vmax.f32 %v3886_v35, 0.0  ;;  %v3900_v22 = vpop.f32.mrf.mxu1 }
 0x1a8   :  { %v3905_v30 = vadd.f32 %v3729_v56, %v344_v59  ;;  %v3251_v56 = vld [vmem:[#allocation2 + $0xc0] sm:$0xff] }
 0x1a9   :  { %v517_v51 = vpop.f32.mrf.mxu2  ;;  %v759_v17 = vpop.f32.mrf.mxu3 }
 0x1aa   :  { %v518_v36 = vadd.f32 %v517_v51, %v3500_v47  ;;  %v3890_v13 = vpop.f32.mrf.mxu0  ;;  %v1443_v51 = vld [vmem:[#allocation6 + $0x100] sm:$0xff]  ;;  %6700 = vst [vmem:[#allocation57_spill] sm:$0xff] %v3905_v30 }
 0x1ab   :  { %1738 = vmatpush.msrb.mxu1 %v1443_v51 }
 0x1ac   :  { %v3895_v26 = vadd.f32 %v759_v17, %v518_v36  ;;  %659 = vmatmul.f32.gmra.mxu1 %v3902_v21 }
 0x1ad   :  { %1527 = vmatmul.f32.gmra.mxu0 %v6388_v7  ;;  %v6390_v7 = vmax.f32 %v3905_v30, 0.0 }
 0x1ae   :  { %6699 = vst [vmem:[#allocation56_spill] sm:$0xff] %v3895_v26  ;;  %826 = vmatmul.f32.gmra.mxu2 %v3250_v50  ;;  %1068 = vmatmul.f32.gmra.mxu3 %v3558_v8  ;;  %v347_v8 = vadd.f32 %v3594_v31, %v3500_v47  ;;  %v3919_v59 = vpop.f32.mrf.mxu1 }
 0x1b0   :  { %v3924_v51 = vadd.f32 %v3748_v29, %v347_v8  ;;  %v3252_v29 = vld [vmem:[#allocation2 + $0xd0] sm:$0xff] }
 0x1b1   :  { %v520_v9 = vpop.f32.mrf.mxu2  ;;  %v762_v17 = vpop.f32.mrf.mxu3 }
 0x1b2   :  { %v521_v36 = vadd.f32 %v520_v9, %v3500_v47  ;;  %v3909_v50 = vpop.f32.mrf.mxu0  ;;  %6702 = vst [vmem:[#allocation59_spill] sm:$0xff] %v3924_v51 }
 0x1b4   :  { %v3914_v35 = vadd.f32 %v762_v17, %v521_v36  ;;  %662 = vmatmul.f32.gmra.mxu1 %v3921_v40 }
 0x1b5   :  { %1530 = vmatmul.f32.gmra.mxu0 %v6390_v7 }
 0x1b6   :  { %6701 = vst [vmem:[#allocation58_spill] sm:$0xff] %v3914_v35  ;;  %829 = vmatmul.f32.gmra.mxu2 %v3251_v56  ;;  %1071 = vmatmul.f32.gmra.mxu3 %v3566_v27  ;;  %v350_v56 = vadd.f32 %v3604_v57, %v3500_v47  ;;  %v6392_v27 = vmax.f32 %v3924_v51, 0.0  ;;  %v3938_v8 = vpop.f32.mrf.mxu1  ;;  %v2630_v57 = vld [vmem:[%s6329_s5 + $0xf8] sm:$0xff] }
 0x1b7   :  { %2877 = vmatpush.msra.mxu1 %v2630_v57 }
 0x1b8   :  { %v3944_v30 = vadd.f32 %v3767_v52, %v350_v56  ;;  %v3253_v52 = vld [vmem:[#allocation2 + $0xe0] sm:$0xff] }
 0x1b9   :  { %v523_v9 = vpop.f32.mrf.mxu2  ;;  %v765_v31 = vpop.f32.mrf.mxu3 }
 0x1ba   :  { %v524_v17 = vadd.f32 %v523_v9, %v3500_v47  ;;  %v3928_v36 = vpop.f32.mrf.mxu0  ;;  %v2614_v9 = vld [vmem:[%s6329_s5 + $0x78] sm:$0xff]  ;;  %6704 = vst [vmem:[#allocation61_spill] sm:$0xff] %v3944_v30  ;;  %v6396_v51 = vmax.f32 %v3944_v30, 0.0 }
 0x1bb   :  { %2635 = vmatpush.msra.mxu0 %v2614_v9 }
 0x1bc   :  { %v3933_v7 = vadd.f32 %v765_v31, %v524_v17 }
 0x1bd   :  { %1533 = vmatmul.f32.gmra.mxu0 %v6392_v27  ;;  %v353_v27 = vadd.f32 %v3614_v32, %v3500_v47 }
 0x1be   :  { %6703 = vst [vmem:[#allocation60_spill] sm:$0xff] %v3933_v7  ;;  %832 = vmatmul.f32.gmra.mxu2 %v3252_v29  ;;  %1074 = vmatmul.f32.gmra.mxu3 %v3574_v44  ;;  %v3960_v56 = vpop.f32.mrf.mxu1 }
 0x1bf   :  { %v3963_v9 = vadd.f32 %v3786_v55, %v353_v27  ;;  %v1434_v55 = vld [vmem:[#allocation6 + $0xb8] sm:$0xff] }
 0x1c0   :  { %v1466_v27 = vld [vmem:[#allocation6 + $0x1b8] sm:$0xff]  ;;  %1969 = vmatpush.msra.mxu2 %v1434_v55 }
 0x1c1   :  { %v526_v31 = vpop.f32.mrf.mxu2  ;;  %v768_v17 = vpop.f32.mrf.mxu3  ;;  %6706 = vst [vmem:[#allocation63_spill] sm:$0xff] %v3963_v9  ;;  %2211 = vmatpush.msra.mxu3 %v1466_v27 }
 0x1c2   :  { %v527_v29 = vadd.f32 %v526_v31, %v3500_v47  ;;  %v3950_v44 = vpop.f32.mrf.mxu0 }
 0x1c4   :  { %v3955_v7 = vadd.f32 %v768_v17, %v527_v29  ;;  %v356_v17 = vadd.f32 %v3624_v12, %v3500_v47  ;;  %v6398_v29 = vmax.f32 %v3963_v9, 0.0 }
 0x1c5   :  { %1536 = vmatmul.f32.gmra.mxu0 %v6396_v51 }
 0x1c6   :  { %6705 = vst [vmem:[#allocation62_spill] sm:$0xff] %v3955_v7  ;;  %835 = vmatmul.f32.gmra.mxu2 %v3253_v52  ;;  %1077 = vmatmul.f32.gmra.mxu3 %v3582_v62  ;;  %v3254_v62 = vld [vmem:[#allocation2 + $0xf0] sm:$0xff]  ;;  %v3977_v52 = vadd.f32 %v3805_v41, %v356_v17  ;;  %v3255_v41 = vld [vmem:[#allocation2 + $0x100] sm:$0xff] }
 0x1c7   :  { %v3256_v17 = vld [vmem:[%s6326_s2] sm:$0x3] }
 0x1c8   :  { %6708 = vst [vmem:[#allocation65_spill] sm:$0xff] %v3977_v52  ;;  %v3995_v55 = vperm.slane %v3256_v17, 1 }
 0x1c9   :  { %v529_v57 = vpop.f32.mrf.mxu2  ;;  %v771_v31 = vpop.f32.mrf.mxu3 }
 0x1ca   :  { %v530_v32 = vadd.f32 %v529_v57, %v3500_v47  ;;  %v3966_v35 = vpop.f32.mrf.mxu0  ;;  %v3979_v57 = vpop.f32.mrf.mxu1 }
 0x1cc   :  { %v3971_v51 = vadd.f32 %v771_v31, %v530_v32 }
 0x1cd   :  { %1539 = vmatmul.f32.gmra.mxu0 %v6398_v29 }
 0x1ce   :  { %6707 = vst [vmem:[#allocation64_spill] sm:$0xff] %v3971_v51  ;;  %838 = vmatmul.f32.gmra.mxu2 %v3254_v62  ;;  %1080 = vmatmul.f32.gmra.mxu3 %v3590_v23  ;;  %v359_v62 = vadd.f32 %v3634_v11, %v3500_v47  ;;  %v6399_v23 = vmax.f32 %v3977_v52, 0.0 }
 0x1d0   :  { %v3998_v27 = vadd.f32 %v3824_v28, %v359_v62  ;;  %v3257_v62 = vld [vmem:[#allocation2 + $0x110] sm:$0xff] }
 0x1d1   :  { %v532_v12 = vpop.f32.mrf.mxu2  ;;  %v774_v30 = vpop.f32.mrf.mxu3 }
 0x1d2   :  { %v533_v31 = vadd.f32 %v532_v12, %v3500_v47  ;;  %v3982_v32 = vpop.f32.mrf.mxu0  ;;  %6710 = vst [vmem:[#allocation67_spill] sm:$0xff] %v3998_v27 }
 0x1d4   :  { %v3987_v29 = vadd.f32 %v774_v30, %v533_v31 }
 0x1d5   :  { %1542 = vmatmul.f32.gmra.mxu0 %v6399_v23  ;;  %v4003_v23 = vpop.f32.mrf.mxu1 }
 0x1d6   :  { %6709 = vst [vmem:[#allocation66_spill] sm:$0xff] %v3987_v29  ;;  %841 = vmatmul.f32.gmra.mxu2 %v3255_v41  ;;  %1083 = vmatmul.f32.gmra.mxu3 %v3600_v49  ;;  %v362_v49 = vadd.f32 %v3644_v58, %v3500_v47  ;;  %v6401_v41 = vmax.f32 %v3998_v27, 0.0 }
 0x1d8   :  { %v4015_v17 = vadd.f32 %v3843_v61, %v362_v49  ;;  %v3258_v49 = vld [vmem:[#allocation2 + $0x120] sm:$0xff] }
 0x1d9   :  { %v794_v11 = vpop.f32.mrf.mxu2  ;;  %v1036_v12 = vpop.f32.mrf.mxu3 }
 0x1da   :  { %v795_v30 = vadd.f32 %v794_v11, %v3995_v55  ;;  %v4001_v31 = vpop.f32.mrf.mxu0  ;;  %6711 = vst [vmem:[#allocation68_spill] sm:$0xff] %v4015_v17  ;;  %v6403_v27 = vmax.f32 %v4015_v17, 0.0 }
 0x1dc   :  { %v4008_v52 = vadd.f32 %v1036_v12, %v795_v30 }
 0x1dd   :  { %1545 = vmatmul.f32.gmra.mxu0 %v6401_v41  ;;  %v365_v41 = vadd.f32 %v3654_v16, %v3500_v47  ;;  %v2629_v16 = vld [vmem:[%s6329_s5 + $0xf0] sm:$0xff] }
 0x1de   :  { %v6404_v28 = vmax.f32 %v4008_v52, 0.0  ;;  %844 = vmatmul.f32.gmra.mxu2 %v3257_v62  ;;  %1086 = vmatmul.f32.gmra.mxu3 %v3610_v20  ;;  %v4027_v20 = vpop.f32.mrf.mxu1 }
 0x1df   :  { %2878 = vmatpush.msra.mxu1 %v2629_v16 }
 0x1e0   :  { %1739 = vmatmul.f32.vlgmr.msrb.gmra.mxu1 %v6404_v28  ;;  %v368_v28 = vadd.f32 %v3664_v53, %v3500_v47 }
 0x1e1   :  { %v797_v58 = vpop.f32.mrf.mxu2  ;;  %v1039_v11 = vpop.f32.mrf.mxu3 }
 0x1e2   :  { %v798_v12 = vadd.f32 %v797_v58, %v3995_v55  ;;  %v4020_v30 = vpop.f32.mrf.mxu0  ;;  %v2613_v58 = vld [vmem:[%s6329_s5 + $0x70] sm:$0xff]  ;;  %v4059_v16 = vadd.f32 %v3881_v15, %v368_v28  ;;  %v3260_v28 = vld [vmem:[#allocation2 + $0x140] sm:$0xff] }
 0x1e3   :  { %2636 = vmatpush.msra.mxu0 %v2613_v58 }
 0x1e4   :  { %v4025_v62 = vadd.f32 %v1039_v11, %v798_v12  ;;  %v4040_v11 = vadd.f32 %v3862_v1, %v365_v41  ;;  %v3259_v41 = vld [vmem:[#allocation2 + $0x130] sm:$0xff]  ;;  %6713 = vst [vmem:[#allocation70_spill] sm:$0xff] %v4059_v16 }
 0x1e5   :  { %1548 = vmatmul.f32.gmra.mxu0 %v6403_v27 }
 0x1e6   :  { %v6409_v61 = vmax.f32 %v4025_v62, 0.0  ;;  %847 = vmatmul.f32.gmra.mxu2 %v3258_v49  ;;  %1089 = vmatmul.f32.gmra.mxu3 %v3620_v60  ;;  %6712 = vst [vmem:[#allocation69_spill] sm:$0xff] %v4040_v11  ;;  %v6407_v17 = vmax.f32 %v4040_v11, 0.0  ;;  %v4056_v58 = vpop.f32.mrf.mxu1 }
 0x1e8   :  { %1742 = vmatmul.f32.gmra.mxu1 %v6409_v61  ;;  %v1432_v61 = vld [vmem:[#allocation6 + $0xa8] sm:$0xff] }
 0x1e9   :  { %v800_v12 = vpop.f32.mrf.mxu2  ;;  %v1042_v49 = vpop.f32.mrf.mxu3  ;;  %1970 = vmatpush.msra.mxu2 %v1432_v61  ;;  %v3261_v61 = vld [vmem:[#allocation2 + $0x150] sm:$0xff] }
 0x1ea   :  { %v801_v60 = vadd.f32 %v800_v12, %v3995_v55  ;;  %v4045_v27 = vpop.f32.mrf.mxu0 }
 0x1ec   :  { %v4050_v9 = vadd.f32 %v1042_v49, %v801_v60 }
 0x1ed   :  { %1551 = vmatmul.f32.gmra.mxu0 %v6407_v17  ;;  %v371_v17 = vadd.f32 %v3674_v5, %v3500_v47 }
 0x1ee   :  { %v6408_v1 = vmax.f32 %v4050_v9, 0.0  ;;  %850 = vmatmul.f32.gmra.mxu2 %v3259_v41  ;;  %1092 = vmatmul.f32.gmra.mxu3 %v3630_v54  ;;  %v6411_v41 = vmax.f32 %v4059_v16, 0.0  ;;  %v4080_v5 = vpop.f32.mrf.mxu1 }
 0x1ef   :  { %v4076_v11 = vadd.f32 %v3900_v22, %v371_v17 }
 0x1f0   :  { %1745 = vmatmul.f32.gmra.mxu1 %v6408_v1  ;;  %v6714_v1 = vld [vmem:[#allocation25_spill] sm:$0xff] }
 0x1f1   :  { %v803_v53 = vpop.f32.mrf.mxu2  ;;  %v1045_v12 = vpop.f32.mrf.mxu3  ;;  %6715 = vst [vmem:[#allocation25_spill] sm:$0xff] %v4076_v11 }
 0x1f2   :  { %v804_v49 = vadd.f32 %v803_v53, %v3995_v55  ;;  %v4064_v60 = vpop.f32.mrf.mxu0  ;;  %v1464_v53 = vld [vmem:[#allocation6 + $0x1a8] sm:$0xff] }
 0x1f3   :  { %2212 = vmatpush.msra.mxu3 %v1464_v53  ;;  %v6716_v53 = vld [vmem:[#allocation27_spill] sm:$0xff] }
 0x1f4   :  { %v4069_v54 = vadd.f32 %v1045_v12, %v804_v49 }
 0x1f5   :  { %1554 = vmatmul.f32.gmra.mxu0 %v6411_v41 }
 0x1f6   :  { %v6413_v15 = vmax.f32 %v4069_v54, 0.0  ;;  %853 = vmatmul.f32.gmra.mxu2 %v3260_v28  ;;  %1095 = vmatmul.f32.gmra.mxu3 %v6714_v1  ;;  %v374_v1 = vadd.f32 %v3684_v24, %v3500_v47  ;;  %v6415_v28 = vmax.f32 %v4076_v11, 0.0  ;;  %v4102_v11 = vpop.f32.mrf.mxu1 }
 0x1f8   :  { %1748 = vmatmul.f32.gmra.mxu1 %v6413_v15 }
 0x1f9   :  { %v806_v12 = vpop.f32.mrf.mxu2  ;;  %v1048_v49 = vpop.f32.mrf.mxu3 }
 0x1fa   :  { %v807_v41 = vadd.f32 %v806_v12, %v3995_v55  ;;  %v4083_v16 = vpop.f32.mrf.mxu0  ;;  %v4095_v12 = vadd.f32 %v3919_v59, %v374_v1  ;;  %v3262_v1 = vld [vmem:[#allocation2 + $0x160] sm:$0xff] }
 0x1fc   :  { %v4088_v22 = vadd.f32 %v1048_v49, %v807_v41  ;;  %6717 = vst [vmem:[#allocation27_spill] sm:$0xff] %v4095_v12 }
 0x1fd   :  { %1557 = vmatmul.f32.gmra.mxu0 %v6415_v28  ;;  %v377_v28 = vadd.f32 %v3700_v2, %v3500_v47 }
 0x1fe   :  { %v6416_v17 = vmax.f32 %v4088_v22, 0.0  ;;  %856 = vmatmul.f32.gmra.mxu2 %v3261_v61  ;;  %1098 = vmatmul.f32.gmra.mxu3 %v6716_v53  ;;  %v6417_v61 = vmax.f32 %v4095_v12, 0.0 }
 0x200   :  { %1751 = vmatmul.f32.gmra.mxu1 %v6416_v17  ;;  %v6720_v17 = vld [vmem:[#allocation29_spill] sm:$0xff] }
 0x201   :  { %v809_v24 = vpop.f32.mrf.mxu2  ;;  %v1051_v15 = vpop.f32.mrf.mxu3 }
 0x202   :  { %v810_v41 = vadd.f32 %v809_v24, %v3995_v55  ;;  %v4100_v49 = vpop.f32.mrf.mxu0  ;;  %v4114_v24 = vadd.f32 %v3938_v8, %v377_v28  ;;  %v3263_v28 = vld [vmem:[#allocation2 + $0x170] sm:$0xff] }
 0x203   :  { %6718 = vst [vmem:[#allocation71_spill] sm:$0xff] %v4100_v49 }
 0x204   :  { %v4107_v53 = vadd.f32 %v1051_v15, %v810_v41  ;;  %6721 = vst [vmem:[#allocation29_spill] sm:$0xff] %v4114_v24  ;;  %v6420_v12 = vmax.f32 %v4114_v24, 0.0  ;;  %v383_v24 = vadd.f32 %v3738_v42, %v3500_v47 }
 0x205   :  { %1560 = vmatmul.f32.gmra.mxu0 %v6417_v61  ;;  %v380_v61 = vadd.f32 %v3719_v45, %v3500_v47  ;;  %v2628_v45 = vld [vmem:[%s6329_s5 + $0xe8] sm:$0xff] }
 0x206   :  { %6719 = vst [vmem:[#allocation72_spill] sm:$0xff] %v4107_v53  ;;  %v6419_v59 = vmax.f32 %v4107_v53, 0.0  ;;  %859 = vmatmul.f32.gmra.mxu2 %v3262_v1  ;;  %1101 = vmatmul.f32.gmra.mxu3 %v6720_v17  ;;  %v4126_v17 = vpop.f32.mrf.mxu1 }
 0x207   :  { %2879 = vmatpush.msra.mxu1 %v2628_v45  ;;  %v1430_v45 = vld [vmem:[#allocation6 + $0x98] sm:$0xff] }
 0x208   :  { %1754 = vmatmul.f32.gmra.mxu1 %v6419_v59  ;;  %v6723_v59 = vld [vmem:[#allocation31_spill] sm:$0xff]  ;;  %1971 = vmatpush.msra.mxu2 %v1430_v45  ;;  %v6726_v45 = vld [vmem:[#allocation34_spill] sm:$0xff] }
 0x209   :  { %v812_v2 = vpop.f32.mrf.mxu2  ;;  %v1054_v49 = vpop.f32.mrf.mxu3 }
 0x20a   :  { %v813_v15 = vadd.f32 %v812_v2, %v3995_v55  ;;  %v4119_v41 = vpop.f32.mrf.mxu0  ;;  %v2612_v2 = vld [vmem:[%s6329_s5 + $0x68] sm:$0xff] }
 0x20b   :  { %6722 = vst [vmem:[#allocation73_spill] sm:$0xff] %v4119_v41  ;;  %2637 = vmatpush.msra.mxu0 %v2612_v2 }
 0x20c   :  { %v4124_v1 = vadd.f32 %v1054_v49, %v813_v15  ;;  %v4139_v49 = vadd.f32 %v3960_v56, %v380_v61  ;;  %v3264_v61 = vld [vmem:[#allocation2 + $0x180] sm:$0xff] }
 0x20d   :  { %1563 = vmatmul.f32.gmra.mxu0 %v6420_v12 }
 0x20e   :  { %v6424_v8 = vmax.f32 %v4124_v1, 0.0  ;;  %862 = vmatmul.f32.gmra.mxu2 %v3263_v28  ;;  %1104 = vmatmul.f32.gmra.mxu3 %v6723_v59  ;;  %6724 = vst [vmem:[#allocation31_spill] sm:$0xff] %v4139_v49  ;;  %v6423_v41 = vmax.f32 %v4139_v49, 0.0  ;;  %v4155_v2 = vpop.f32.mrf.mxu1 }
 0x210   :  { %1757 = vmatmul.f32.gmra.mxu1 %v6424_v8 }
 0x211   :  { %v815_v15 = vpop.f32.mrf.mxu2  ;;  %v1057_v28 = vpop.f32.mrf.mxu3 }
 0x212   :  { %v816_v59 = vadd.f32 %v815_v15, %v3995_v55  ;;  %v4144_v12 = vpop.f32.mrf.mxu0  ;;  %v4158_v15 = vadd.f32 %v3979_v57, %v383_v24  ;;  %v3265_v24 = vld [vmem:[#allocation2 + $0x190] sm:$0xff] }
 0x214   :  { %v4149_v53 = vadd.f32 %v1057_v28, %v816_v59  ;;  %6725 = vst [vmem:[#allocation74_spill] sm:$0xff] %v4158_v15 }
 0x215   :  { %1566 = vmatmul.f32.gmra.mxu0 %v6423_v41 }
 0x216   :  { %v6425_v56 = vmax.f32 %v4149_v53, 0.0  ;;  %865 = vmatmul.f32.gmra.mxu2 %v3264_v61  ;;  %1107 = vmatmul.f32.gmra.mxu3 %v3680_v3  ;;  %v386_v61 = vadd.f32 %v3757_v14, %v3500_v47  ;;  %v6426_v3 = vmax.f32 %v4158_v15, 0.0  ;;  %v4179_v14 = vpop.f32.mrf.mxu1 }
 0x218   :  { %1760 = vmatmul.f32.gmra.mxu1 %v6425_v56  ;;  %v1462_v56 = vld [vmem:[#allocation6 + $0x198] sm:$0xff] }
 0x219   :  { %v818_v42 = vpop.f32.mrf.mxu2  ;;  %v1060_v28 = vpop.f32.mrf.mxu3  ;;  %2213 = vmatpush.msra.mxu3 %v1462_v56  ;;  %v3266_v56 = vld [vmem:[#allocation2 + $0x1a0] sm:$0xff] }
 0x21a   :  { %v819_v59 = vadd.f32 %v818_v42, %v3995_v55  ;;  %v4163_v41 = vpop.f32.mrf.mxu0  ;;  %v4175_v42 = vadd.f32 %v4003_v23, %v386_v61 }
 0x21c   :  { %v4168_v8 = vadd.f32 %v1060_v28, %v819_v59  ;;  %6727 = vst [vmem:[#allocation34_spill] sm:$0xff] %v4175_v42 }
 0x21d   :  { %1569 = vmatmul.f32.gmra.mxu0 %v6426_v3 }
 0x21e   :  { %v6429_v57 = vmax.f32 %v4168_v8, 0.0  ;;  %868 = vmatmul.f32.gmra.mxu2 %v3265_v24  ;;  %1110 = vmatmul.f32.gmra.mxu3 %v6726_v45  ;;  %v389_v24 = vadd.f32 %v3776_v19, %v3500_v47  ;;  %v6430_v45 = vmax.f32 %v4175_v42, 0.0 }
 0x220   :  { %1763 = vmatmul.f32.gmra.mxu1 %v6429_v57  ;;  %v4194_v61 = vadd.f32 %v4027_v20, %v389_v24  ;;  %v4201_v57 = vpop.f32.mrf.mxu1  ;;  %v3267_v24 = vld [vmem:[#allocation2 + $0x1b0] sm:$0xff] }
 0x221   :  { %v821_v28 = vpop.f32.mrf.mxu2  ;;  %v1063_v59 = vpop.f32.mrf.mxu3 }
 0x222   :  { %v822_v3 = vadd.f32 %v821_v28, %v3995_v55  ;;  %v4182_v15 = vpop.f32.mrf.mxu0  ;;  %6728 = vst [vmem:[#allocation75_spill] sm:$0xff] %v4194_v61 }
 0x224   :  { %v4187_v49 = vadd.f32 %v1063_v59, %v822_v3 }
 0x225   :  { %1572 = vmatmul.f32.gmra.mxu0 %v6430_v45  ;;  %v392_v45 = vadd.f32 %v3795_v10, %v3500_v47 }
 0x226   :  { %v6431_v23 = vmax.f32 %v4187_v49, 0.0  ;;  %871 = vmatmul.f32.gmra.mxu2 %v3266_v56  ;;  %1113 = vmatmul.f32.gmra.mxu3 %v3712_v18  ;;  %v6432_v56 = vmax.f32 %v4194_v61, 0.0 }
 0x228   :  { %1766 = vmatmul.f32.gmra.mxu1 %v6431_v23  ;;  %v4216_v23 = vadd.f32 %v4056_v58, %v392_v45  ;;  %v4228_v42 = vpop.f32.mrf.mxu1  ;;  %v3268_v45 = vld [vmem:[#allocation2 + $0x1c0] sm:$0xff] }
 0x229   :  { %v824_v19 = vpop.f32.mrf.mxu2  ;;  %v1066_v28 = vpop.f32.mrf.mxu3 }
 0x22a   :  { %v825_v3 = vadd.f32 %v824_v19, %v3995_v55  ;;  %v4199_v59 = vpop.f32.mrf.mxu0  ;;  %v2611_v19 = vld [vmem:[%s6329_s5 + $0x60] sm:$0xff]  ;;  %6729 = vst [vmem:[#allocation76_spill] sm:$0xff] %v4216_v23 }
 0x22b   :  { %2638 = vmatpush.msra.mxu0 %v2611_v19  ;;  %v2627_v19 = vld [vmem:[%s6329_s5 + $0xe0] sm:$0xff] }
 0x22c   :  { %v4206_v18 = vadd.f32 %v1066_v28, %v825_v3  ;;  %2880 = vmatpush.msra.mxu1 %v2627_v19 }
 0x22d   :  { %1575 = vmatmul.f32.gmra.mxu0 %v6432_v56 }
 0x22e   :  { %v6436_v20 = vmax.f32 %v4206_v18, 0.0  ;;  %874 = vmatmul.f32.gmra.mxu2 %v3267_v24  ;;  %1116 = vmatmul.f32.gmra.mxu3 %v3731_v38  ;;  %v395_v38 = vadd.f32 %v3814_v6, %v3500_v47  ;;  %v6435_v24 = vmax.f32 %v4216_v23, 0.0 }
 0x230   :  { %1769 = vmatmul.f32.gmra.mxu1 %v6436_v20  ;;  %v4238_v6 = vadd.f32 %v4080_v5, %v395_v38  ;;  %v3269_v38 = vld [vmem:[#allocation2 + $0x1d0] sm:$0xff]  ;;  %v4254_v19 = vpop.f32.mrf.mxu1 }
 0x231   :  { %v827_v10 = vpop.f32.mrf.mxu2  ;;  %v1069_v28 = vpop.f32.mrf.mxu3 }
 0x232   :  { %v828_v3 = vadd.f32 %v827_v10, %v3995_v55  ;;  %v4221_v56 = vpop.f32.mrf.mxu0  ;;  %6730 = vst [vmem:[#allocation77_spill] sm:$0xff] %v4238_v6 }
 0x234   :  { %v4226_v61 = vadd.f32 %v1069_v28, %v828_v3 }
 0x235   :  { %1578 = vmatmul.f32.gmra.mxu0 %v6435_v24 }
 0x236   :  { %v6437_v58 = vmax.f32 %v4226_v61, 0.0  ;;  %877 = vmatmul.f32.gmra.mxu2 %v3268_v45  ;;  %1119 = vmatmul.f32.gmra.mxu3 %v3750_v37  ;;  %v398_v37 = vadd.f32 %v3833_v25, %v3500_v47  ;;  %v6438_v45 = vmax.f32 %v4238_v6, 0.0  ;;  %v1428_v25 = vld [vmem:[#allocation6 + $0x88] sm:$0xff] }
 0x237   :  { %1972 = vmatpush.msra.mxu2 %v1428_v25 }
 0x238   :  { %1772 = vmatmul.f32.gmra.mxu1 %v6437_v58 }
 0x239   :  { %v830_v10 = vpop.f32.mrf.mxu2  ;;  %v1072_v28 = vpop.f32.mrf.mxu3 }
 0x23a   :  { %v831_v3 = vadd.f32 %v830_v10, %v3995_v55  ;;  %v4243_v24 = vpop.f32.mrf.mxu0  ;;  %v4257_v10 = vadd.f32 %v4102_v11, %v398_v37 }
 0x23c   :  { %v4248_v20 = vadd.f32 %v1072_v28, %v831_v3  ;;  %6731 = vst [vmem:[#allocation78_spill] sm:$0xff] %v4257_v10  ;;  %v1460_v28 = vld [vmem:[#allocation6 + $0x188] sm:$0xff] }
 0x23d   :  { %1581 = vmatmul.f32.gmra.mxu0 %v6438_v45  ;;  %2214 = vmatpush.msra.mxu3 %v1460_v28 }
 0x23e   :  { %v6440_v5 = vmax.f32 %v4248_v20, 0.0  ;;  %880 = vmatmul.f32.gmra.mxu2 %v3269_v38  ;;  %1122 = vmatmul.f32.gmra.mxu3 %v3769_v39  ;;  %v401_v39 = vadd.f32 %v3852_v43, %v3500_v47  ;;  %v6441_v38 = vmax.f32 %v4257_v10, 0.0  ;;  %v4278_v43 = vpop.f32.mrf.mxu1 }
 0x240   :  { %1775 = vmatmul.f32.gmra.mxu1 %v6440_v5  ;;  %v3270_v5 = vld [vmem:[#allocation2 + $0x1e0] sm:$0xff]  ;;  %v4274_v25 = vadd.f32 %v4126_v17, %v401_v39  ;;  %v3271_v39 = vld [vmem:[#allocation2 + $0x1f0] sm:$0xff] }
 0x241   :  { %v833_v3 = vpop.f32.mrf.mxu2  ;;  %v1075_v58 = vpop.f32.mrf.mxu3 }
 0x242   :  { %v834_v45 = vadd.f32 %v833_v3, %v3995_v55  ;;  %v4262_v6 = vpop.f32.mrf.mxu0  ;;  %6732 = vst [vmem:[#allocation79_spill] sm:$0xff] %v4274_v25 }
 0x244   :  { %v4267_v11 = vadd.f32 %v1075_v58, %v834_v45 }
 0x245   :  { %1584 = vmatmul.f32.gmra.mxu0 %v6441_v38  ;;  %v404_v38 = vadd.f32 %v3871_v0, %v3500_v47 }
 0x246   :  { %v6442_v37 = vmax.f32 %v4267_v11, 0.0  ;;  %883 = vmatmul.f32.gmra.mxu2 %v3270_v5  ;;  %1125 = vmatmul.f32.gmra.mxu3 %v3788_v33  ;;  %v6443_v5 = vmax.f32 %v4274_v25, 0.0 }
 0x248   :  { %1778 = vmatmul.f32.gmra.mxu1 %v6442_v37 }
 0x249   :  { %v836_v28 = vpop.f32.mrf.mxu2  ;;  %v1078_v58 = vpop.f32.mrf.mxu3 }
 0x24a   :  { %v837_v45 = vadd.f32 %v836_v28, %v3995_v55  ;;  %v4281_v3 = vpop.f32.mrf.mxu0  ;;  %v4293_v28 = vadd.f32 %v4155_v2, %v404_v38  ;;  %v3272_v38 = vld [vmem:[#allocation2 + $0x200] sm:$0xff] }
 0x24c   :  { %v4286_v33 = vadd.f32 %v1078_v58, %v837_v45  ;;  %6733 = vst [vmem:[#allocation80_spill] sm:$0xff] %v4293_v28  ;;  %v6445_v25 = vmax.f32 %v4293_v28, 0.0  ;;  %v3273_v28 = vld [vmem:[#allocation2 + $0x210] sm:$0xff] }
 0x24d   :  { %1587 = vmatmul.f32.gmra.mxu0 %v6443_v5  ;;  %v407_v5 = vadd.f32 %v3890_v13, %v3500_v47 }
 0x24e   :  { %v6446_v17 = vmax.f32 %v4286_v33, 0.0  ;;  %886 = vmatmul.f32.gmra.mxu2 %v3271_v39  ;;  %1128 = vmatmul.f32.gmra.mxu3 %v3810_v46  ;;  %v4303_v39 = vpop.f32.mrf.mxu1 }
 0x24f   :  { %v4315_v13 = vadd.f32 %v4179_v14, %v407_v5 }
 0x250   :  { %1781 = vmatmul.f32.gmra.mxu1 %v6446_v17  ;;  %v410_v17 = vadd.f32 %v3909_v50, %v3500_v47 }
 0x251   :  { %v839_v0 = vpop.f32.mrf.mxu2  ;;  %v1081_v37 = vpop.f32.mrf.mxu3  ;;  %6734 = vst [vmem:[#allocation81_spill] sm:$0xff] %v4315_v13  ;;  %v6449_v14 = vmax.f32 %v4315_v13, 0.0 }
 0x252   :  { %v840_v58 = vadd.f32 %v839_v0, %v3995_v55  ;;  %v4298_v45 = vpop.f32.mrf.mxu0  ;;  %v2610_v0 = vld [vmem:[%s6329_s5 + $0x58] sm:$0xff] }
 0x253   :  { %2639 = vmatpush.msra.mxu0 %v2610_v0 }
 0x254   :  { %v4305_v46 = vadd.f32 %v1081_v37, %v840_v58  ;;  %v2626_v37 = vld [vmem:[%s6329_s5 + $0xd8] sm:$0xff] }
 0x255   :  { %1590 = vmatmul.f32.gmra.mxu0 %v6445_v25  ;;  %2881 = vmatpush.msra.mxu1 %v2626_v37  ;;  %v4337_v37 = vadd.f32 %v4201_v57, %v410_v17  ;;  %v3274_v17 = vld [vmem:[#allocation2 + $0x220] sm:$0xff] }
 0x256   :  { %v6447_v2 = vmax.f32 %v4305_v46, 0.0  ;;  %889 = vmatmul.f32.gmra.mxu2 %v3272_v38  ;;  %1131 = vmatmul.f32.gmra.mxu3 %v3826_v48 }
 0x257   :  { %6736 = vst [vmem:[#allocation83_spill] sm:$0xff] %v4337_v37  ;;  %v6453_v13 = vmax.f32 %v4337_v37, 0.0 }
 0x258   :  { %1784 = vmatmul.f32.gmra.mxu1 %v6447_v2 }
 0x259   :  { %v842_v58 = vpop.f32.mrf.mxu2  ;;  %v1084_v25 = vpop.f32.mrf.mxu3 }
 0x25a   :  { %v843_v48 = vadd.f32 %v842_v58, %v3995_v55  ;;  %v4323_v38 = vpop.f32.mrf.mxu0 }
 0x25c   :  { %v4328_v5 = vadd.f32 %v1084_v25, %v843_v48 }
 0x25d   :  { %v4330_v0 = vpop.f32.mrf.mxu1  ;;  %1593 = vmatmul.f32.gmra.mxu0 %v6449_v14  ;;  %v413_v14 = vadd.f32 %v3928_v36, %v3500_v47 }
 0x25e   :  { %6735 = vst [vmem:[#allocation82_spill] sm:$0xff] %v4328_v5  ;;  %v6451_v2 = vmax.f32 %v4328_v5, 0.0  ;;  %892 = vmatmul.f32.gmra.mxu2 %v3273_v28  ;;  %1134 = vmatmul.f32.gmra.mxu3 %v3845_v4 }
 0x25f   :  { %v4356_v10 = vadd.f32 %v4228_v42, %v413_v14  ;;  %v3275_v14 = vld [vmem:[#allocation2 + $0x230] sm:$0xff] }
 0x260   :  { %1787 = vmatmul.f32.gmra.mxu1 %v6451_v2  ;;  %v1458_v2 = vld [vmem:[#allocation6 + $0x178] sm:$0xff] }
 0x261   :  { %v845_v50 = vpop.f32.mrf.mxu2  ;;  %v1087_v25 = vpop.f32.mrf.mxu3  ;;  %6739 = vst [vmem:[#allocation86_spill] sm:$0xff] %v4356_v10  ;;  %2215 = vmatpush.msra.mxu3 %v1458_v2 }
 0x262   :  { %v846_v58 = vadd.f32 %v845_v50, %v3995_v55  ;;  %v4342_v48 = vpop.f32.mrf.mxu0  ;;  %v1426_v50 = vld [vmem:[#allocation6 + $0x78] sm:$0xff] }
 0x263   :  { %6737 = vst [vmem:[#allocation84_spill] sm:$0xff] %v4342_v48  ;;  %1973 = vmatpush.msra.mxu2 %v1426_v50 }
 0x264   :  { %v4347_v28 = vadd.f32 %v1087_v25, %v846_v58 }
 0x265   :  { %v4349_v4 = vpop.f32.mrf.mxu1  ;;  %1596 = vmatmul.f32.gmra.mxu0 %v6453_v13 }
 0x266   :  { %6738 = vst [vmem:[#allocation85_spill] sm:$0xff] %v4347_v28  ;;  %v6456_v57 = vmax.f32 %v4347_v28, 0.0  ;;  %895 = vmatmul.f32.gmra.mxu2 %v3274_v17  ;;  %1137 = vmatmul.f32.gmra.mxu3 %v3864_v63  ;;  %v416_v17 = vadd.f32 %v3950_v44, %v3500_v47  ;;  %v6455_v63 = vmax.f32 %v4356_v10, 0.0  ;;  %v6752_v10 = vld [vmem:[#allocation9_spill] sm:$0xff]  ;;  %v3297_v28 = vld [vmem:[#allocation2 + $0x2f8] sm:$0xff] }
 0x268   :  { %1790 = vmatmul.f32.gmra.mxu1 %v6456_v57  ;;  %v4375_v50 = vadd.f32 %v4254_v19, %v416_v17  ;;  %v3276_v17 = vld [vmem:[#allocation2 + $0x240] sm:$0xff] }
 0x269   :  { %v848_v36 = vpop.f32.mrf.mxu2  ;;  %v1090_v25 = vpop.f32.mrf.mxu3 }
 0x26a   :  { %v849_v58 = vadd.f32 %v848_v36, %v3995_v55  ;;  %v4361_v13 = vpop.f32.mrf.mxu0  ;;  %6742 = vst [vmem:[#allocation89_spill] sm:$0xff] %v4375_v50  ;;  %v6458_v57 = vmax.f32 %v4375_v50, 0.0 }
 0x26b   :  { %6740 = vst [vmem:[#allocation87_spill] sm:$0xff] %v4361_v13 }
 0x26c   :  { %v4366_v37 = vadd.f32 %v1090_v25, %v849_v58 }
 0x26d   :  { %v4368_v42 = vpop.f32.mrf.mxu1  ;;  %1599 = vmatmul.f32.gmra.mxu0 %v6455_v63  ;;  %v419_v63 = vadd.f32 %v3966_v35, %v3500_v47 }
 0x26e   :  { %6741 = vst [vmem:[#allocation88_spill] sm:$0xff] %v4366_v37  ;;  %v6457_v2 = vmax.f32 %v4366_v37, 0.0  ;;  %898 = vmatmul.f32.gmra.mxu2 %v3275_v14  ;;  %1140 = vmatmul.f32.gmra.mxu3 %v3883_v34 }
 0x270   :  { %1793 = vmatmul.f32.gmra.mxu1 %v6457_v2 }
 0x271   :  { %v851_v44 = vpop.f32.mrf.mxu2  ;;  %v1093_v36 = vpop.f32.mrf.mxu3 }
 0x272   :  { %v852_v25 = vadd.f32 %v851_v44, %v3995_v55  ;;  %v4380_v58 = vpop.f32.mrf.mxu0  ;;  %v4394_v44 = vadd.f32 %v4278_v43, %v419_v63  ;;  %v3277_v63 = vld [vmem:[#allocation2 + $0x250] sm:$0xff] }
 0x273   :  { %6743 = vst [vmem:[#allocation90_spill] sm:$0xff] %v4380_v58 }
 0x274   :  { %v4385_v14 = vadd.f32 %v1093_v36, %v852_v25  ;;  %6745 = vst [vmem:[#allocation92_spill] sm:$0xff] %v4394_v44  ;;  %v6460_v50 = vmax.f32 %v4394_v44, 0.0 }
 0x275   :  { %v4387_v34 = vpop.f32.mrf.mxu1  ;;  %1602 = vmatmul.f32.gmra.mxu0 %v6458_v57  ;;  %v422_v57 = vadd.f32 %v3982_v32, %v3500_v47  ;;  %v2625_v47 = vld [vmem:[%s6329_s5 + $0xd0] sm:$0xff] }
 0x276   :  { %6744 = vst [vmem:[#allocation91_spill] sm:$0xff] %v4385_v14  ;;  %v6461_v19 = vmax.f32 %v4385_v14, 0.0  ;;  %901 = vmatmul.f32.gmra.mxu2 %v3276_v17  ;;  %1143 = vmatmul.f32.gmra.mxu3 %v3902_v21 }
 0x277   :  { %v4419_v32 = vadd.f32 %v4303_v39, %v422_v57  ;;  %2882 = vmatpush.msra.mxu1 %v2625_v47  ;;  %v3278_v57 = vld [vmem:[#allocation2 + $0x260] sm:$0xff]  ;;  %v1424_v47 = vld [vmem:[#allocation6 + $0x68] sm:$0xff] }
 0x278   :  { %1796 = vmatmul.f32.gmra.mxu1 %v6461_v19  ;;  %1974 = vmatpush.msra.mxu2 %v1424_v47  ;;  %v1456_v47 = vld [vmem:[#allocation6 + $0x168] sm:$0xff] }
 0x279   :  { %v854_v35 = vpop.f32.mrf.mxu2  ;;  %v1096_v36 = vpop.f32.mrf.mxu3  ;;  %6748 = vst [vmem:[#allocation95_spill] sm:$0xff] %v4419_v32  ;;  %2216 = vmatpush.msra.mxu3 %v1456_v47  ;;  %v3283_v47 = vld [vmem:[#allocation2 + $0x288] sm:$0xff] }
 0x27a   :  { %v855_v25 = vadd.f32 %v854_v35, %v3995_v55  ;;  %v4399_v2 = vpop.f32.mrf.mxu0  ;;  %v2609_v35 = vld [vmem:[%s6329_s5 + $0x50] sm:$0xff] }
 0x27b   :  { %6746 = vst [vmem:[#allocation93_spill] sm:$0xff] %v4399_v2  ;;  %2640 = vmatpush.msra.mxu0 %v2609_v35  ;;  %v3279_v35 = vld [vmem:[#allocation2 + $0x268] sm:$0xff] }
 0x27c   :  { %v4404_v17 = vadd.f32 %v1096_v36, %v855_v25 }
 0x27d   :  { %v4406_v21 = vpop.f32.mrf.mxu1  ;;  %1605 = vmatmul.f32.gmra.mxu0 %v6460_v50  ;;  %v6466_v50 = vmax.f32 %v4419_v32, 0.0  ;;  %v6471_v32 = vmax.f32 %v6752_v10, 0.0 }
 0x27e   :  { %6747 = vst [vmem:[#allocation94_spill] sm:$0xff] %v4404_v17  ;;  %v6463_v43 = vmax.f32 %v4404_v17, 0.0  ;;  %904 = vmatmul.f32.gmra.mxu2 %v3277_v63  ;;  %1146 = vmatmul.f32.gmra.mxu3 %v3921_v40 }
 0x280   :  { %1799 = vmatmul.f32.gmra.mxu1 %v6463_v43 }
 0x281   :  { %v857_v36 = vpop.f32.mrf.mxu2  ;;  %v1099_v25 = vpop.f32.mrf.mxu3 }
 0x282   :  { %v858_v40 = vadd.f32 %v857_v36, %v3995_v55  ;;  %v4424_v63 = vpop.f32.mrf.mxu0 }
 0x283   :  { %6749 = vst [vmem:[#allocation96_spill] sm:$0xff] %v4424_v63 }
 0x284   :  { %v4427_v19 = vadd.f32 %v1099_v25, %v858_v40 }
 0x285   :  { %v4429_v44 = vpop.f32.mrf.mxu1  ;;  %1608 = vmatmul.f32.gmra.mxu0 %v6466_v50 }
 0x286   :  { %6750 = vst [vmem:[#allocation97_spill] sm:$0xff] %v4427_v19  ;;  %v6468_v39 = vmax.f32 %v4427_v19, 0.0  ;;  %907 = vmatmul.f32.gmra.mxu2 %v3278_v57  ;;  %1149 = vmatmul.f32.gmra.mxu3 %v3279_v35  ;;  %v3280_v35 = vld [vmem:[#allocation2 + $0x270] sm:$0xff]  ;;  %v6755_v19 = vld [vmem:[#allocation10_spill] sm:$0xff] }
 0x287   :  { %v6475_v10 = vmax.f32 %v6755_v19, 0.0 }
 0x288   :  { %1802 = vmatmul.f32.gmra.mxu1 %v6468_v39  ;;  %v3281_v39 = vld [vmem:[#allocation2 + $0x278] sm:$0xff] }
 0x289   :  { %v860_v36 = vpop.f32.mrf.mxu2  ;;  %v1102_v43 = vpop.f32.mrf.mxu3 }
 0x28a   :  { %v861_v25 = vadd.f32 %v860_v36, %v3995_v55  ;;  %v4437_v40 = vpop.f32.mrf.mxu0 }
 0x28b   :  { %6751 = vst [vmem:[#allocation98_spill] sm:$0xff] %v4437_v40 }
 0x28c   :  { %v4440_v50 = vadd.f32 %v1102_v43, %v861_v25 }
 0x28d   :  { %v4442_v23 = vpop.f32.mrf.mxu1  ;;  %1611 = vmatmul.f32.gmra.mxu0 %v6471_v32 }
 0x28e   :  { %6753 = vst [vmem:[#allocation99_spill] sm:$0xff] %v4440_v50  ;;  %v6472_v57 = vmax.f32 %v4440_v50, 0.0  ;;  %910 = vmatmul.f32.gmra.mxu2 %v3280_v35  ;;  %1152 = vmatmul.f32.gmra.mxu3 %v3281_v39  ;;  %v3282_v35 = vld [vmem:[#allocation2 + $0x280] sm:$0xff] }
 0x290   :  { %1805 = vmatmul.f32.gmra.mxu1 %v6472_v57 }
 0x291   :  { %v863_v36 = vpop.f32.mrf.mxu2  ;;  %v1105_v40 = vpop.f32.mrf.mxu3 }
 0x292   :  { %v864_v43 = vadd.f32 %v863_v36, %v3995_v55  ;;  %v4450_v25 = vpop.f32.mrf.mxu0 }
 0x293   :  { %6754 = vst [vmem:[#allocation100_spill] sm:$0xff] %v4450_v25 }
 0x294   :  { %v4453_v32 = vadd.f32 %v1105_v40, %v864_v43  ;;  %v6758_v43 = vld [vmem:[#allocation11_spill] sm:$0xff] }
 0x295   :  { %v4455_v63 = vpop.f32.mrf.mxu1  ;;  %1614 = vmatmul.f32.gmra.mxu0 %v6475_v10  ;;  %v6479_v50 = vmax.f32 %v6758_v43, 0.0 }
 0x296   :  { %6756 = vst [vmem:[#allocation101_spill] sm:$0xff] %v4453_v32  ;;  %v6476_v39 = vmax.f32 %v4453_v32, 0.0  ;;  %913 = vmatmul.f32.gmra.mxu2 %v3282_v35  ;;  %1155 = vmatmul.f32.gmra.mxu3 %v3283_v47  ;;  %v3284_v47 = vld [vmem:[#allocation2 + $0x290] sm:$0xff] }
 0x298   :  { %1808 = vmatmul.f32.gmra.mxu1 %v6476_v39  ;;  %v3285_v39 = vld [vmem:[#allocation2 + $0x298] sm:$0xff] }
 0x299   :  { %v866_v36 = vpop.f32.mrf.mxu2  ;;  %v1108_v57 = vpop.f32.mrf.mxu3 }
 0x29a   :  { %v867_v25 = vadd.f32 %v866_v36, %v3995_v55  ;;  %v4463_v40 = vpop.f32.mrf.mxu0  ;;  %v2608_v36 = vld [vmem:[%s6329_s5 + $0x48] sm:$0xff] }
 0x29b   :  { %6757 = vst [vmem:[#allocation102_spill] sm:$0xff] %v4463_v40  ;;  %2641 = vmatpush.msra.mxu0 %v2608_v36  ;;  %v2624_v36 = vld [vmem:[%s6329_s5 + $0xc8] sm:$0xff] }
 0x29c   :  { %v4466_v17 = vadd.f32 %v1108_v57, %v867_v25  ;;  %2883 = vmatpush.msra.mxu1 %v2624_v36  ;;  %v3288_v36 = vld [vmem:[#allocation2 + $0x2b0] sm:$0xff] }
 0x29d   :  { %v4468_v10 = vpop.f32.mrf.mxu1  ;;  %1617 = vmatmul.f32.gmra.mxu0 %v6479_v50  ;;  %v6761_v50 = vld [vmem:[#allocation12_spill] sm:$0xff] }
 0x29e   :  { %6759 = vst [vmem:[#allocation103_spill] sm:$0xff] %v4466_v17  ;;  %v6481_v35 = vmax.f32 %v4466_v17, 0.0  ;;  %916 = vmatmul.f32.gmra.mxu2 %v3284_v47  ;;  %1158 = vmatmul.f32.gmra.mxu3 %v3285_v39  ;;  %v6484_v40 = vmax.f32 %v6761_v50, 0.0  ;;  %v3287_v17 = vld [vmem:[#allocation2 + $0x2a8] sm:$0xff] }
 0x2a0   :  { %1811 = vmatmul.f32.gmra.mxu1 %v6481_v35  ;;  %v3286_v35 = vld [vmem:[#allocation2 + $0x2a0] sm:$0xff] }
 0x2a1   :  { %v869_v57 = vpop.f32.mrf.mxu2  ;;  %v1111_v25 = vpop.f32.mrf.mxu3 }
 0x2a2   :  { %v870_v19 = vadd.f32 %v869_v57, %v3995_v55  ;;  %v4479_v43 = vpop.f32.mrf.mxu0 }
 0x2a3   :  { %6760 = vst [vmem:[#allocation104_spill] sm:$0xff] %v4479_v43 }
 0x2a4   :  { %v4482_v32 = vadd.f32 %v1111_v25, %v870_v19 }
 0x2a5   :  { %v4484_v47 = vpop.f32.mrf.mxu1  ;;  %1620 = vmatmul.f32.gmra.mxu0 %v6484_v40  ;;  %v6764_v40 = vld [vmem:[#allocation13_spill] sm:$0xff] }
 0x2a6   :  { %6762 = vst [vmem:[#allocation105_spill] sm:$0xff] %v4482_v32  ;;  %v6485_v39 = vmax.f32 %v4482_v32, 0.0  ;;  %919 = vmatmul.f32.gmra.mxu2 %v3286_v35  ;;  %1161 = vmatmul.f32.gmra.mxu3 %v3287_v17  ;;  %v6488_v43 = vmax.f32 %v6764_v40, 0.0 }
 0x2a8   :  { %1814 = vmatmul.f32.gmra.mxu1 %v6485_v39  ;;  %v3289_v39 = vld [vmem:[#allocation2 + $0x2b8] sm:$0xff] }
 0x2a9   :  { %v872_v19 = vpop.f32.mrf.mxu2  ;;  %v1114_v57 = vpop.f32.mrf.mxu3 }
 0x2aa   :  { %v873_v25 = vadd.f32 %v872_v19, %v3995_v55  ;;  %v4495_v50 = vpop.f32.mrf.mxu0  ;;  %v1422_v19 = vld [vmem:[#allocation6 + $0x58] sm:$0xff] }
 0x2ab   :  { %6763 = vst [vmem:[#allocation106_spill] sm:$0xff] %v4495_v50  ;;  %v1454_v50 = vld [vmem:[#allocation6 + $0x158] sm:$0xff]  ;;  %1975 = vmatpush.msra.mxu2 %v1422_v19 }
 0x2ac   :  { %v4498_v2 = vadd.f32 %v1114_v57, %v873_v25  ;;  %2217 = vmatpush.msra.mxu3 %v1454_v50 }
 0x2ad   :  { %v4500_v35 = vpop.f32.mrf.mxu1  ;;  %1623 = vmatmul.f32.gmra.mxu0 %v6488_v43  ;;  %v6767_v43 = vld [vmem:[#allocation14_spill] sm:$0xff] }
 0x2ae   :  { %6765 = vst [vmem:[#allocation107_spill] sm:$0xff] %v4498_v2  ;;  %v6490_v17 = vmax.f32 %v4498_v2, 0.0  ;;  %922 = vmatmul.f32.gmra.mxu2 %v3288_v36  ;;  %1164 = vmatmul.f32.gmra.mxu3 %v3289_v39  ;;  %v6493_v40 = vmax.f32 %v6767_v43, 0.0  ;;  %v3291_v2 = vld [vmem:[#allocation2 + $0x2c8] sm:$0xff] }
 0x2b0   :  { %1817 = vmatmul.f32.gmra.mxu1 %v6490_v17  ;;  %v3290_v17 = vld [vmem:[#allocation2 + $0x2c0] sm:$0xff] }
 0x2b1   :  { %v875_v32 = vpop.f32.mrf.mxu2  ;;  %v1117_v14 = vpop.f32.mrf.mxu3 }
 0x2b2   :  { %v876_v57 = vadd.f32 %v875_v32, %v3995_v55  ;;  %v4508_v25 = vpop.f32.mrf.mxu0 }
 0x2b3   :  { %6766 = vst [vmem:[#allocation108_spill] sm:$0xff] %v4508_v25 }
 0x2b4   :  { %v4511_v58 = vadd.f32 %v1117_v14, %v876_v57  ;;  %v6770_v57 = vld [vmem:[#allocation15_spill] sm:$0xff] }
 0x2b5   :  { %v4513_v36 = vpop.f32.mrf.mxu1  ;;  %1626 = vmatmul.f32.gmra.mxu0 %v6493_v40  ;;  %v6497_v25 = vmax.f32 %v6770_v57, 0.0 }
 0x2b6   :  { %6768 = vst [vmem:[#allocation109_spill] sm:$0xff] %v4511_v58  ;;  %v6494_v39 = vmax.f32 %v4511_v58, 0.0  ;;  %925 = vmatmul.f32.gmra.mxu2 %v3290_v17  ;;  %1167 = vmatmul.f32.gmra.mxu3 %v3291_v2  ;;  %v3292_v17 = vld [vmem:[#allocation2 + $0x2d0] sm:$0xff] }
 0x2b8   :  { %1820 = vmatmul.f32.gmra.mxu1 %v6494_v39  ;;  %v3293_v39 = vld [vmem:[#allocation2 + $0x2d8] sm:$0xff] }
 0x2b9   :  { %v878_v50 = vpop.f32.mrf.mxu2  ;;  %v1120_v32 = vpop.f32.mrf.mxu3 }
 0x2ba   :  { %v879_v19 = vadd.f32 %v878_v50, %v3995_v55  ;;  %v4521_v14 = vpop.f32.mrf.mxu0 }
 0x2bb   :  { %6769 = vst [vmem:[#allocation110_spill] sm:$0xff] %v4521_v14 }
 0x2bc   :  { %v4524_v37 = vadd.f32 %v1120_v32, %v879_v19  ;;  %v6773_v19 = vld [vmem:[#allocation16_spill] sm:$0xff] }
 0x2bd   :  { %v4526_v40 = vpop.f32.mrf.mxu1  ;;  %1629 = vmatmul.f32.gmra.mxu0 %v6497_v25  ;;  %v6500_v58 = vmax.f32 %v6773_v19, 0.0 }
 0x2be   :  { %6771 = vst [vmem:[#allocation111_spill] sm:$0xff] %v4524_v37  ;;  %v6498_v2 = vmax.f32 %v4524_v37, 0.0  ;;  %928 = vmatmul.f32.gmra.mxu2 %v3292_v17  ;;  %1170 = vmatmul.f32.gmra.mxu3 %v3293_v39  ;;  %v3294_v17 = vld [vmem:[#allocation2 + $0x2e0] sm:$0xff]  ;;  %v3296_v37 = vld [vmem:[#allocation2 + $0x2f0] sm:$0xff] }
 0x2c0   :  { %1823 = vmatmul.f32.gmra.mxu1 %v6498_v2  ;;  %v3295_v2 = vld [vmem:[#allocation2 + $0x2e8] sm:$0xff] }
 0x2c1   :  { %v881_v50 = vpop.f32.mrf.mxu2  ;;  %v1123_v43 = vpop.f32.mrf.mxu3 }
 0x2c2   :  { %v882_v14 = vadd.f32 %v881_v50, %v3995_v55  ;;  %v4534_v32 = vpop.f32.mrf.mxu0  ;;  %v2607_v50 = vld [vmem:[%s6329_s5 + $0x40] sm:$0xff] }
 0x2c3   :  { %6772 = vst [vmem:[#allocation112_spill] sm:$0xff] %v4534_v32  ;;  %2642 = vmatpush.msra.mxu0 %v2607_v50 }
 0x2c4   :  { %v4537_v13 = vadd.f32 %v1123_v43, %v882_v14  ;;  %v2623_v43 = vld [vmem:[%s6329_s5 + $0xc0] sm:$0xff] }
 0x2c5   :  { %v4539_v25 = vpop.f32.mrf.mxu1  ;;  %1632 = vmatmul.f32.gmra.mxu0 %v6500_v58  ;;  %2884 = vmatpush.msra.mxu1 %v2623_v43 }
 0x2c6   :  { %6774 = vst [vmem:[#allocation113_spill] sm:$0xff] %v4537_v13  ;;  %v6503_v39 = vmax.f32 %v4537_v13, 0.0  ;;  %931 = vmatmul.f32.gmra.mxu2 %v3294_v17  ;;  %1173 = vmatmul.f32.gmra.mxu3 %v3295_v2  ;;  %v6776_v2 = vld [vmem:[#allocation17_spill] sm:$0xff] }
 0x2c7   :  { %v6506_v57 = vmax.f32 %v6776_v2, 0.0  ;;  %v1420_v2 = vld [vmem:[#allocation6 + $0x48] sm:$0xff] }
 0x2c8   :  { %1826 = vmatmul.f32.gmra.mxu1 %v6503_v39  ;;  %1976 = vmatpush.msra.mxu2 %v1420_v2  ;;  %v3300_v2 = vld [vmem:[#allocation2 + $0x310] sm:$0xff] }
 0x2c9   :  { %v884_v14 = vpop.f32.mrf.mxu2  ;;  %v1126_v19 = vpop.f32.mrf.mxu3 }
 0x2ca   :  { %v885_v58 = vadd.f32 %v884_v14, %v3995_v55  ;;  %v4553_v17 = vpop.f32.mrf.mxu0 }
 0x2cb   :  { %6775 = vst [vmem:[#allocation114_spill] sm:$0xff] %v4553_v17 }
 0x2cc   :  { %v4556_v13 = vadd.f32 %v1126_v19, %v885_v58  ;;  %v6779_v19 = vld [vmem:[#allocation18_spill] sm:$0xff] }
 0x2cd   :  { %v4558_v39 = vpop.f32.mrf.mxu1  ;;  %1635 = vmatmul.f32.gmra.mxu0 %v6506_v57  ;;  %v6510_v17 = vmax.f32 %v6779_v19, 0.0 }
 0x2ce   :  { %6777 = vst [vmem:[#allocation115_spill] sm:$0xff] %v4556_v13  ;;  %v6507_v32 = vmax.f32 %v4556_v13, 0.0  ;;  %934 = vmatmul.f32.gmra.mxu2 %v3296_v37  ;;  %1176 = vmatmul.f32.gmra.mxu3 %v3297_v28  ;;  %v3298_v28 = vld [vmem:[#allocation2 + $0x300] sm:$0xff] }
 0x2d0   :  { %1829 = vmatmul.f32.gmra.mxu1 %v6507_v32  ;;  %v3299_v32 = vld [vmem:[#allocation2 + $0x308] sm:$0xff] }
 0x2d1   :  { %v887_v50 = vpop.f32.mrf.mxu2  ;;  %v1129_v43 = vpop.f32.mrf.mxu3 }
 0x2d2   :  { %v888_v14 = vadd.f32 %v887_v50, %v3995_v55  ;;  %v4566_v58 = vpop.f32.mrf.mxu0  ;;  %v1452_v50 = vld [vmem:[#allocation6 + $0x148] sm:$0xff] }
 0x2d3   :  { %6778 = vst [vmem:[#allocation116_spill] sm:$0xff] %v4566_v58  ;;  %2218 = vmatpush.msra.mxu3 %v1452_v50 }
 0x2d4   :  { %v4569_v48 = vadd.f32 %v1129_v43, %v888_v14 }
 0x2d5   :  { %v4571_v57 = vpop.f32.mrf.mxu1  ;;  %1638 = vmatmul.f32.gmra.mxu0 %v6510_v17  ;;  %v6782_v17 = vld [vmem:[#allocation19_spill] sm:$0xff] }
 0x2d6   :  { %6780 = vst [vmem:[#allocation117_spill] sm:$0xff] %v4569_v48  ;;  %v6513_v37 = vmax.f32 %v4569_v48, 0.0  ;;  %937 = vmatmul.f32.gmra.mxu2 %v3298_v28  ;;  %1179 = vmatmul.f32.gmra.mxu3 %v3299_v32  ;;  %v6515_v19 = vmax.f32 %v6782_v17, 0.0 }
 0x2d8   :  { %1832 = vmatmul.f32.gmra.mxu1 %v6513_v37  ;;  %v3301_v37 = vld [vmem:[#allocation2 + $0x318] sm:$0xff] }
 0x2d9   :  { %v890_v58 = vpop.f32.mrf.mxu2  ;;  %v1132_v43 = vpop.f32.mrf.mxu3 }
 0x2da   :  { %v891_v14 = vadd.f32 %v890_v58, %v3995_v55  ;;  %v4579_v13 = vpop.f32.mrf.mxu0 }
 0x2db   :  { %6781 = vst [vmem:[#allocation118_spill] sm:$0xff] %v4579_v13 }
 0x2dc   :  { %v4582_v5 = vadd.f32 %v1132_v43, %v891_v14  ;;  %v6786_v14 = vld [vmem:[#allocation20_spill] sm:$0xff] }
 0x2dd   :  { %v4584_v28 = vpop.f32.mrf.mxu1  ;;  %1641 = vmatmul.f32.gmra.mxu0 %v6515_v19  ;;  %v6519_v48 = vmax.f32 %v6786_v14, 0.0 }
 0x2de   :  { %6783 = vst [vmem:[#allocation119_spill] sm:$0xff] %v4582_v5  ;;  %v6516_v32 = vmax.f32 %v4582_v5, 0.0  ;;  %940 = vmatmul.f32.gmra.mxu2 %v3300_v2  ;;  %1182 = vmatmul.f32.gmra.mxu3 %v3301_v37  ;;  %v3302_v2 = vld [vmem:[#allocation2 + $0x320] sm:$0xff] }
 0x2df   :  { %6784 = vst [vmem:[#allocation120_spill] sm:$0xff] %v4584_v28 }
 0x2e0   :  { %1835 = vmatmul.f32.gmra.mxu1 %v6516_v32  ;;  %v3303_v32 = vld [vmem:[#allocation2 + $0x328] sm:$0xff] }
 0x2e1   :  { %v893_v58 = vpop.f32.mrf.mxu2  ;;  %v1135_v50 = vpop.f32.mrf.mxu3 }
 0x2e2   :  { %v894_v13 = vadd.f32 %v893_v58, %v3995_v55  ;;  %v4592_v43 = vpop.f32.mrf.mxu0 }
 0x2e3   :  { %6785 = vst [vmem:[#allocation121_spill] sm:$0xff] %v4592_v43 }
 0x2e4   :  { %v4595_v28 = vadd.f32 %v1135_v50, %v894_v13  ;;  %v6790_v50 = vld [vmem:[#allocation21_spill] sm:$0xff] }
 0x2e5   :  { %v4597_v19 = vpop.f32.mrf.mxu1  ;;  %1644 = vmatmul.f32.gmra.mxu0 %v6519_v48  ;;  %v6521_v5 = vmax.f32 %v6790_v50, 0.0 }
 0x2e6   :  { %6787 = vst [vmem:[#allocation122_spill] sm:$0xff] %v4595_v28  ;;  %v6520_v37 = vmax.f32 %v4595_v28, 0.0  ;;  %943 = vmatmul.f32.gmra.mxu2 %v3302_v2  ;;  %1185 = vmatmul.f32.gmra.mxu3 %v3303_v32  ;;  %v3304_v2 = vld [vmem:[#allocation2 + $0x330] sm:$0xff] }
 0x2e7   :  { %6788 = vst [vmem:[#allocation123_spill] sm:$0xff] %v4597_v19 }
 0x2e8   :  { %1838 = vmatmul.f32.gmra.mxu1 %v6520_v37  ;;  %v3305_v37 = vld [vmem:[#allocation2 + $0x338] sm:$0xff] }
 0x2e9   :  { %v896_v58 = vpop.f32.mrf.mxu2  ;;  %v1138_v17 = vpop.f32.mrf.mxu3 }
 0x2ea   :  { %v897_v43 = vadd.f32 %v896_v58, %v3995_v55  ;;  %v4605_v13 = vpop.f32.mrf.mxu0  ;;  %v2606_v58 = vld [vmem:[%s6329_s5 + $0x38] sm:$0xff] }
 0x2eb   :  { %6789 = vst [vmem:[#allocation124_spill] sm:$0xff] %v4605_v13  ;;  %2643 = vmatpush.msra.mxu0 %v2606_v58 }
 0x2ec   :  { %v4608_v19 = vadd.f32 %v1138_v17, %v897_v43  ;;  %v2622_v17 = vld [vmem:[%s6329_s5 + $0xb8] sm:$0xff] }
 0x2ed   :  { %v4610_v48 = vpop.f32.mrf.mxu1  ;;  %1647 = vmatmul.f32.gmra.mxu0 %v6521_v5  ;;  %2885 = vmatpush.msra.mxu1 %v2622_v17  ;;  %v3306_v17 = vld [vmem:[#allocation2 + $0x340] sm:$0xff] }
 0x2ee   :  { %6791 = vst [vmem:[#allocation125_spill] sm:$0xff] %v4608_v19  ;;  %v6525_v32 = vmax.f32 %v4608_v19, 0.0  ;;  %946 = vmatmul.f32.gmra.mxu2 %v3304_v2  ;;  %1188 = vmatmul.f32.gmra.mxu3 %v3305_v37  ;;  %v6794_v37 = vld [vmem:[#allocation22_spill] sm:$0xff] }
 0x2ef   :  { %6792 = vst [vmem:[#allocation126_spill] sm:$0xff] %v4610_v48  ;;  %v6528_v14 = vmax.f32 %v6794_v37, 0.0 }
 0x2f0   :  { %1841 = vmatmul.f32.gmra.mxu1 %v6525_v32  ;;  %v3307_v32 = vld [vmem:[#allocation2 + $0x348] sm:$0xff] }
 0x2f1   :  { %v899_v43 = vpop.f32.mrf.mxu2  ;;  %v1141_v5 = vpop.f32.mrf.mxu3 }
 0x2f2   :  { %v900_v50 = vadd.f32 %v899_v43, %v3995_v55  ;;  %v4624_v2 = vpop.f32.mrf.mxu0  ;;  %v1418_v43 = vld [vmem:[#allocation6 + $0x38] sm:$0xff] }
 0x2f3   :  { %6793 = vst [vmem:[#allocation127_spill] sm:$0xff] %v4624_v2  ;;  %1977 = vmatpush.msra.mxu2 %v1418_v43  ;;  %v1450_v43 = vld [vmem:[#allocation6 + $0x138] sm:$0xff] }
 0x2f4   :  { %v4627_v13 = vadd.f32 %v1141_v5, %v900_v50  ;;  %2219 = vmatpush.msra.mxu3 %v1450_v43  ;;  %v3311_v43 = vld [vmem:[#allocation2 + $0x368] sm:$0xff] }
 0x2f5   :  { %v4629_v28 = vpop.f32.mrf.mxu1  ;;  %1650 = vmatmul.f32.gmra.mxu0 %v6528_v14 }
 0x2f6   :  { %6795 = vst [vmem:[#allocation128_spill] sm:$0xff] %v4627_v13  ;;  %v6529_v58 = vmax.f32 %v4627_v13, 0.0  ;;  %949 = vmatmul.f32.gmra.mxu2 %v3306_v17  ;;  %1191 = vmatmul.f32.gmra.mxu3 %v3307_v32  ;;  %v3308_v17 = vld [vmem:[#allocation2 + $0x350] sm:$0xff]  ;;  %v6802_v13 = vld [vmem:[#allocation24_spill] sm:$0xff] }
 0x2f7   :  { %6796 = vst [vmem:[#allocation129_spill] sm:$0xff] %v4629_v28  ;;  %v6798_v28 = vld [vmem:[#allocation23_spill] sm:$0xff] }
 0x2f8   :  { %1844 = vmatmul.f32.gmra.mxu1 %v6529_v58  ;;  %v6532_v37 = vmax.f32 %v6798_v28, 0.0  ;;  %v3309_v58 = vld [vmem:[#allocation2 + $0x358] sm:$0xff]  ;;  %v6535_v28 = vmax.f32 %v6802_v13, 0.0 }
 0x2f9   :  { %v902_v2 = vpop.f32.mrf.mxu2  ;;  %v1144_v19 = vpop.f32.mrf.mxu3 }
 0x2fa   :  { %v903_v5 = vadd.f32 %v902_v2, %v3995_v55  ;;  %v4637_v50 = vpop.f32.mrf.mxu0 }
 0x2fb   :  { %6797 = vst [vmem:[#allocation130_spill] sm:$0xff] %v4637_v50 }
 0x2fc   :  { %v4640_v14 = vadd.f32 %v1144_v19, %v903_v5 }
 0x2fd   :  { %v4642_v48 = vpop.f32.mrf.mxu1  ;;  %1653 = vmatmul.f32.gmra.mxu0 %v6532_v37 }
 0x2fe   :  { %6799 = vst [vmem:[#allocation131_spill] sm:$0xff] %v4640_v14  ;;  %v6533_v32 = vmax.f32 %v4640_v14, 0.0  ;;  %952 = vmatmul.f32.gmra.mxu2 %v3308_v17  ;;  %1194 = vmatmul.f32.gmra.mxu3 %v3309_v58  ;;  %v3310_v17 = vld [vmem:[#allocation2 + $0x360] sm:$0xff] }
 0x2ff   :  { %6800 = vst [vmem:[#allocation132_spill] sm:$0xff] %v4642_v48 }
 0x300   :  { %1847 = vmatmul.f32.gmra.mxu1 %v6533_v32 }
 0x301   :  { %v905_v2 = vpop.f32.mrf.mxu2  ;;  %v1147_v50 = vpop.f32.mrf.mxu3 }
 0x302   :  { %v906_v19 = vadd.f32 %v905_v2, %v3995_v55  ;;  %v4650_v5 = vpop.f32.mrf.mxu0 }
 0x303   :  { %6801 = vst [vmem:[#allocation133_spill] sm:$0xff] %v4650_v5 }
 0x304   :  { %v4653_v37 = vadd.f32 %v1147_v50, %v906_v19  ;;  %v6806_v19 = vld [vmem:[#allocation26_spill] sm:$0xff] }
 0x305   :  { %v4655_v48 = vpop.f32.mrf.mxu1  ;;  %1656 = vmatmul.f32.gmra.mxu0 %v6535_v28  ;;  %v6539_v14 = vmax.f32 %v6806_v19, 0.0 }
 0x306   :  { %6803 = vst [vmem:[#allocation134_spill] sm:$0xff] %v4653_v37  ;;  %v6536_v58 = vmax.f32 %v4653_v37, 0.0  ;;  %955 = vmatmul.f32.gmra.mxu2 %v3310_v17  ;;  %1197 = vmatmul.f32.gmra.mxu3 %v3311_v43  ;;  %v3312_v43 = vld [vmem:[#allocation2 + $0x370] sm:$0xff] }
 0x307   :  { %6804 = vst [vmem:[#allocation135_spill] sm:$0xff] %v4655_v48 }
 0x308   :  { %1850 = vmatmul.f32.gmra.mxu1 %v6536_v58  ;;  %v3313_v58 = vld [vmem:[#allocation2 + $0x378] sm:$0xff] }
 0x309   :  { %v908_v2 = vpop.f32.mrf.mxu2  ;;  %v1150_v32 = vpop.f32.mrf.mxu3 }
 0x30a   :  { %v909_v5 = vadd.f32 %v908_v2, %v3995_v55  ;;  %v4663_v50 = vpop.f32.mrf.mxu0  ;;  %v2605_v2 = vld [vmem:[%s6329_s5 + $0x30] sm:$0xff] }
 0x30b   :  { %6805 = vst [vmem:[#allocation136_spill] sm:$0xff] %v4663_v50  ;;  %2644 = vmatpush.msra.mxu0 %v2605_v2  ;;  %v2621_v2 = vld [vmem:[%s6329_s5 + $0xb0] sm:$0xff] }
 0x30c   :  { %v4666_v48 = vadd.f32 %v1150_v32, %v909_v5  ;;  %2886 = vmatpush.msra.mxu1 %v2621_v2  ;;  %v3316_v2 = vld [vmem:[#allocation2 + $0x390] sm:$0xff] }
 0x30d   :  { %v4668_v28 = vpop.f32.mrf.mxu1  ;;  %1659 = vmatmul.f32.gmra.mxu0 %v6539_v14  ;;  %v6810_v14 = vld [vmem:[#allocation28_spill] sm:$0xff] }
 0x30e   :  { %6807 = vst [vmem:[#allocation137_spill] sm:$0xff] %v4666_v48  ;;  %v6541_v17 = vmax.f32 %v4666_v48, 0.0  ;;  %958 = vmatmul.f32.gmra.mxu2 %v3312_v43  ;;  %1200 = vmatmul.f32.gmra.mxu3 %v3313_v58  ;;  %v6544_v50 = vmax.f32 %v6810_v14, 0.0  ;;  %v3315_v48 = vld [vmem:[#allocation2 + $0x388] sm:$0xff] }
 0x30f   :  { %6808 = vst [vmem:[#allocation138_spill] sm:$0xff] %v4668_v28 }
 0x310   :  { %1853 = vmatmul.f32.gmra.mxu1 %v6541_v17  ;;  %v3314_v17 = vld [vmem:[#allocation2 + $0x380] sm:$0xff] }
 0x311   :  { %v911_v32 = vpop.f32.mrf.mxu2  ;;  %v1153_v5 = vpop.f32.mrf.mxu3 }
 0x312   :  { %v912_v13 = vadd.f32 %v911_v32, %v3995_v55  ;;  %v4679_v19 = vpop.f32.mrf.mxu0 }
 0x313   :  { %6809 = vst [vmem:[#allocation139_spill] sm:$0xff] %v4679_v19 }
 0x314   :  { %v4682_v37 = vadd.f32 %v1153_v5, %v912_v13 }
 0x315   :  { %v4684_v43 = vpop.f32.mrf.mxu1  ;;  %1662 = vmatmul.f32.gmra.mxu0 %v6544_v50  ;;  %v6814_v50 = vld [vmem:[#allocation30_spill] sm:$0xff] }
 0x316   :  { %6811 = vst [vmem:[#allocation140_spill] sm:$0xff] %v4682_v37  ;;  %v6545_v58 = vmax.f32 %v4682_v37, 0.0  ;;  %961 = vmatmul.f32.gmra.mxu2 %v3314_v17  ;;  %1203 = vmatmul.f32.gmra.mxu3 %v3315_v48  ;;  %v6547_v19 = vmax.f32 %v6814_v50, 0.0 }
 0x317   :  { %6812 = vst [vmem:[#allocation141_spill] sm:$0xff] %v4684_v43 }
 0x318   :  { %1856 = vmatmul.f32.gmra.mxu1 %v6545_v58  ;;  %v3317_v58 = vld [vmem:[#allocation2 + $0x398] sm:$0xff] }
 0x319   :  { %v914_v13 = vpop.f32.mrf.mxu2  ;;  %v1156_v32 = vpop.f32.mrf.mxu3 }
 0x31a   :  { %v915_v5 = vadd.f32 %v914_v13, %v3995_v55  ;;  %v4695_v14 = vpop.f32.mrf.mxu0  ;;  %v1416_v13 = vld [vmem:[#allocation6 + $0x28] sm:$0xff] }
 0x31b   :  { %6813 = vst [vmem:[#allocation142_spill] sm:$0xff] %v4695_v14  ;;  %v1448_v14 = vld [vmem:[#allocation6 + $0x128] sm:$0xff]  ;;  %1978 = vmatpush.msra.mxu2 %v1416_v13 }
 0x31c   :  { %v4698_v43 = vadd.f32 %v1156_v32, %v915_v5  ;;  %2220 = vmatpush.msra.mxu3 %v1448_v14 }
 0x31d   :  { %v4700_v17 = vpop.f32.mrf.mxu1  ;;  %1665 = vmatmul.f32.gmra.mxu0 %v6547_v19  ;;  %v6818_v19 = vld [vmem:[#allocation32_spill] sm:$0xff] }
 0x31e   :  { %6815 = vst [vmem:[#allocation143_spill] sm:$0xff] %v4698_v43  ;;  %v6549_v48 = vmax.f32 %v4698_v43, 0.0  ;;  %964 = vmatmul.f32.gmra.mxu2 %v3316_v2  ;;  %1206 = vmatmul.f32.gmra.mxu3 %v3317_v58  ;;  %v6551_v50 = vmax.f32 %v6818_v19, 0.0  ;;  %v3319_v43 = vld [vmem:[#allocation2 + $0x3a8] sm:$0xff] }
 0x31f   :  { %6816 = vst [vmem:[#allocation144_spill] sm:$0xff] %v4700_v17 }
 0x320   :  { %1859 = vmatmul.f32.gmra.mxu1 %v6549_v48  ;;  %v3318_v48 = vld [vmem:[#allocation2 + $0x3a0] sm:$0xff] }
 0x321   :  { %v917_v37 = vpop.f32.mrf.mxu2  ;;  %v1159_v28 = vpop.f32.mrf.mxu3 }
 0x322   :  { %v918_v32 = vadd.f32 %v917_v37, %v3995_v55  ;;  %v4708_v5 = vpop.f32.mrf.mxu0 }
 0x323   :  { %6817 = vst [vmem:[#allocation145_spill] sm:$0xff] %v4708_v5 }
 0x324   :  { %v4711_v17 = vadd.f32 %v1159_v28, %v918_v32  ;;  %v6822_v32 = vld [vmem:[#allocation33_spill] sm:$0xff] }
 0x325   :  { %v4713_v2 = vpop.f32.mrf.mxu1  ;;  %1668 = vmatmul.f32.gmra.mxu0 %v6551_v50  ;;  %v6555_v5 = vmax.f32 %v6822_v32, 0.0 }
 0x326   :  { %6819 = vst [vmem:[#allocation146_spill] sm:$0xff] %v4711_v17  ;;  %v6552_v58 = vmax.f32 %v4711_v17, 0.0  ;;  %967 = vmatmul.f32.gmra.mxu2 %v3318_v48  ;;  %1209 = vmatmul.f32.gmra.mxu3 %v3319_v43  ;;  %v3320_v48 = vld [vmem:[#allocation2 + $0x3b0] sm:$0xff] }
 0x327   :  { %6820 = vst [vmem:[#allocation147_spill] sm:$0xff] %v4713_v2 }
 0x328   :  { %1862 = vmatmul.f32.gmra.mxu1 %v6552_v58  ;;  %v3321_v58 = vld [vmem:[#allocation2 + $0x3b8] sm:$0xff] }
 0x329   :  { %v920_v14 = vpop.f32.mrf.mxu2  ;;  %v1162_v37 = vpop.f32.mrf.mxu3 }
 0x32a   :  { %v921_v13 = vadd.f32 %v920_v14, %v3995_v55  ;;  %v4721_v28 = vpop.f32.mrf.mxu0 }
 0x32b   :  { %6821 = vst [vmem:[#allocation148_spill] sm:$0xff] %v4721_v28 }
 0x32c   :  { %v4724_v2 = vadd.f32 %v1162_v37, %v921_v13  ;;  %v6826_v13 = vld [vmem:[#allocation36_spill] sm:$0xff] }
 0x32d   :  { %v4726_v50 = vpop.f32.mrf.mxu1  ;;  %1671 = vmatmul.f32.gmra.mxu0 %v6555_v5  ;;  %v6558_v17 = vmax.f32 %v6826_v13, 0.0 }
 0x32e   :  { %6823 = vst [vmem:[#allocation149_spill] sm:$0xff] %v4724_v2  ;;  %v6556_v43 = vmax.f32 %v4724_v2, 0.0  ;;  %970 = vmatmul.f32.gmra.mxu2 %v3320_v48  ;;  %1212 = vmatmul.f32.gmra.mxu3 %v3321_v58  ;;  %v3322_v48 = vld [vmem:[#allocation2 + $0x3c0] sm:$0xff]  ;;  %v3324_v2 = vld [vmem:[#allocation2 + $0x3d0] sm:$0xff] }
 0x32f   :  { %6824 = vst [vmem:[#allocation150_spill] sm:$0xff] %v4726_v50 }
 0x330   :  { %1865 = vmatmul.f32.gmra.mxu1 %v6556_v43  ;;  %v3323_v43 = vld [vmem:[#allocation2 + $0x3c8] sm:$0xff] }
 0x331   :  { %v923_v14 = vpop.f32.mrf.mxu2  ;;  %v1165_v19 = vpop.f32.mrf.mxu3 }
 0x332   :  { %v924_v28 = vadd.f32 %v923_v14, %v3995_v55  ;;  %v4734_v37 = vpop.f32.mrf.mxu0  ;;  %v2604_v14 = vld [vmem:[%s6329_s5 + $0x28] sm:$0xff] }
 0x333   :  { %6825 = vst [vmem:[#allocation151_spill] sm:$0xff] %v4734_v37  ;;  %2645 = vmatpush.msra.mxu0 %v2604_v14 }
 0x334   :  { %v4737_v50 = vadd.f32 %v1165_v19, %v924_v28  ;;  %v2620_v19 = vld [vmem:[%s6329_s5 + $0xa8] sm:$0xff] }
 0x335   :  { %v4739_v5 = vpop.f32.mrf.mxu1  ;;  %1674 = vmatmul.f32.gmra.mxu0 %v6558_v17  ;;  %2887 = vmatpush.msra.mxu1 %v2620_v19 }
 0x336   :  { %6827 = vst [vmem:[#allocation152_spill] sm:$0xff] %v4737_v50  ;;  %v6561_v58 = vmax.f32 %v4737_v50, 0.0  ;;  %973 = vmatmul.f32.gmra.mxu2 %v3322_v48  ;;  %1215 = vmatmul.f32.gmra.mxu3 %v3323_v43  ;;  %v6830_v43 = vld [vmem:[#allocation38_spill] sm:$0xff] }
 0x337   :  { %6828 = vst [vmem:[#allocation153_spill] sm:$0xff] %v4739_v5  ;;  %v6563_v32 = vmax.f32 %v6830_v43, 0.0  ;;  %v3325_v5 = vld [vmem:[#allocation2 + $0x3d8] sm:$0xff]  ;;  %v1414_v43 = vld [vmem:[#allocation6 + $0x18] sm:$0xff] }
 0x338   :  { %1868 = vmatmul.f32.gmra.mxu1 %v6561_v58  ;;  %1979 = vmatpush.msra.mxu2 %v1414_v43  ;;  %v3328_v43 = vld [vmem:[#allocation2 + $0x3f0] sm:$0xff] }
 0x339   :  { %v926_v28 = vpop.f32.mrf.mxu2  ;;  %v1168_v13 = vpop.f32.mrf.mxu3 }
 0x33a   :  { %v927_v17 = vadd.f32 %v926_v28, %v3995_v55  ;;  %v4753_v48 = vpop.f32.mrf.mxu0 }
 0x33b   :  { %6829 = vst [vmem:[#allocation154_spill] sm:$0xff] %v4753_v48 }
 0x33c   :  { %v4756_v50 = vadd.f32 %v1168_v13, %v927_v17  ;;  %v6834_v13 = vld [vmem:[#allocation40_spill] sm:$0xff] }
 0x33d   :  { %v4758_v58 = vpop.f32.mrf.mxu1  ;;  %1677 = vmatmul.f32.gmra.mxu0 %v6563_v32  ;;  %v6567_v48 = vmax.f32 %v6834_v13, 0.0 }
 0x33e   :  { %6831 = vst [vmem:[#allocation155_spill] sm:$0xff] %v4756_v50  ;;  %v6564_v37 = vmax.f32 %v4756_v50, 0.0  ;;  %976 = vmatmul.f32.gmra.mxu2 %v3324_v2  ;;  %1218 = vmatmul.f32.gmra.mxu3 %v3325_v5  ;;  %v3326_v2 = vld [vmem:[#allocation2 + $0x3e0] sm:$0xff] }
 0x33f   :  { %6832 = vst [vmem:[#allocation156_spill] sm:$0xff] %v4758_v58 }
 0x340   :  { %1871 = vmatmul.f32.gmra.mxu1 %v6564_v37  ;;  %v3327_v37 = vld [vmem:[#allocation2 + $0x3e8] sm:$0xff] }
 0x341   :  { %v929_v14 = vpop.f32.mrf.mxu2  ;;  %v1171_v19 = vpop.f32.mrf.mxu3 }
 0x342   :  { %v930_v28 = vadd.f32 %v929_v14, %v3995_v55  ;;  %v4766_v17 = vpop.f32.mrf.mxu0  ;;  %v1446_v14 = vld [vmem:[#allocation6 + $0x118] sm:$0xff] }
 0x343   :  { %6833 = vst [vmem:[#allocation157_spill] sm:$0xff] %v4766_v17  ;;  %2221 = vmatpush.msra.mxu3 %v1446_v14 }
 0x344   :  { %v4769_v58 = vadd.f32 %v1171_v19, %v930_v28 }
 0x345   :  { %v4771_v32 = vpop.f32.mrf.mxu1  ;;  %1680 = vmatmul.f32.gmra.mxu0 %v6567_v48  ;;  %v6838_v48 = vld [vmem:[#allocation42_spill] sm:$0xff] }
 0x346   :  { %6835 = vst [vmem:[#allocation158_spill] sm:$0xff] %v4769_v58  ;;  %v6569_v5 = vmax.f32 %v4769_v58, 0.0  ;;  %979 = vmatmul.f32.gmra.mxu2 %v3326_v2  ;;  %1221 = vmatmul.f32.gmra.mxu3 %v3327_v37  ;;  %v6571_v13 = vmax.f32 %v6838_v48, 0.0 }
 0x347   :  { %6836 = vst [vmem:[#allocation159_spill] sm:$0xff] %v4771_v32 }
 0x348   :  { %1874 = vmatmul.f32.gmra.mxu1 %v6569_v5  ;;  %v3329_v5 = vld [vmem:[#allocation2 + $0x3f8] sm:$0xff] }
 0x349   :  { %v932_v17 = vpop.f32.mrf.mxu2  ;;  %v1174_v19 = vpop.f32.mrf.mxu3 }
 0x34a   :  { %v933_v28 = vadd.f32 %v932_v17, %v3995_v55  ;;  %v4779_v50 = vpop.f32.mrf.mxu0 }
 0x34b   :  { %6837 = vst [vmem:[#allocation160_spill] sm:$0xff] %v4779_v50 }
 0x34c   :  { %v4782_v32 = vadd.f32 %v1174_v19, %v933_v28  ;;  %v6842_v28 = vld [vmem:[#allocation44_spill] sm:$0xff] }
 0x34d   :  { %v4784_v2 = vpop.f32.mrf.mxu1  ;;  %1683 = vmatmul.f32.gmra.mxu0 %v6571_v13  ;;  %v6575_v58 = vmax.f32 %v6842_v28, 0.0 }
 0x34e   :  { %6839 = vst [vmem:[#allocation161_spill] sm:$0xff] %v4782_v32  ;;  %v6572_v37 = vmax.f32 %v4782_v32, 0.0  ;;  %982 = vmatmul.f32.gmra.mxu2 %v3328_v43  ;;  %1224 = vmatmul.f32.gmra.mxu3 %v3329_v5  ;;  %v3330_v43 = vld [vmem:[#allocation2 + $0x400] sm:$0xff] }
 0x34f   :  { %6840 = vst [vmem:[#allocation162_spill] sm:$0xff] %v4784_v2 }
 0x350   :  { %1877 = vmatmul.f32.gmra.mxu1 %v6572_v37  ;;  %v3331_v37 = vld [vmem:[#allocation2 + $0x408] sm:$0xff] }
 0x351   :  { %v935_v17 = vpop.f32.mrf.mxu2  ;;  %v1177_v14 = vpop.f32.mrf.mxu3 }
 0x352   :  { %v936_v50 = vadd.f32 %v935_v17, %v3995_v55  ;;  %v4792_v19 = vpop.f32.mrf.mxu0 }
 0x353   :  { %6841 = vst [vmem:[#allocation163_spill] sm:$0xff] %v4792_v19 }
 0x354   :  { %v4795_v2 = vadd.f32 %v1177_v14, %v936_v50  ;;  %v6846_v14 = vld [vmem:[#allocation46_spill] sm:$0xff] }
 0x355   :  { %v4797_v13 = vpop.f32.mrf.mxu1  ;;  %1686 = vmatmul.f32.gmra.mxu0 %v6575_v58  ;;  %v6577_v32 = vmax.f32 %v6846_v14, 0.0 }
 0x356   :  { %6843 = vst [vmem:[#allocation164_spill] sm:$0xff] %v4795_v2  ;;  %v6576_v5 = vmax.f32 %v4795_v2, 0.0  ;;  %985 = vmatmul.f32.gmra.mxu2 %v3330_v43  ;;  %1227 = vmatmul.f32.gmra.mxu3 %v3331_v37  ;;  %v3332_v43 = vld [vmem:[#allocation2 + $0x410] sm:$0xff] }
 0x357   :  { %6844 = vst [vmem:[#allocation165_spill] sm:$0xff] %v4797_v13 }
 0x358   :  { %1880 = vmatmul.f32.gmra.mxu1 %v6576_v5  ;;  %v3333_v5 = vld [vmem:[#allocation2 + $0x418] sm:$0xff] }
 0x359   :  { %v938_v17 = vpop.f32.mrf.mxu2  ;;  %v1180_v48 = vpop.f32.mrf.mxu3 }
 0x35a   :  { %v939_v19 = vadd.f32 %v938_v17, %v3995_v55  ;;  %v4805_v50 = vpop.f32.mrf.mxu0  ;;  %v2603_v17 = vld [vmem:[%s6329_s5 + $0x20] sm:$0xff] }
 0x35b   :  { %6845 = vst [vmem:[#allocation166_spill] sm:$0xff] %v4805_v50  ;;  %2646 = vmatpush.msra.mxu0 %v2603_v17 }
 0x35c   :  { %v4808_v13 = vadd.f32 %v1180_v48, %v939_v19  ;;  %v2619_v48 = vld [vmem:[%s6329_s5 + $0xa0] sm:$0xff] }
 0x35d   :  { %v4810_v58 = vpop.f32.mrf.mxu1  ;;  %1689 = vmatmul.f32.gmra.mxu0 %v6577_v32  ;;  %2888 = vmatpush.msra.mxu1 %v2619_v48 }
 0x35e   :  { %6847 = vst [vmem:[#allocation167_spill] sm:$0xff] %v4808_v13  ;;  %v6581_v37 = vmax.f32 %v4808_v13, 0.0  ;;  %988 = vmatmul.f32.gmra.mxu2 %v3332_v43  ;;  %1230 = vmatmul.f32.gmra.mxu3 %v3333_v5  ;;  %v6850_v5 = vld [vmem:[#allocation48_spill] sm:$0xff] }
 0x35f   :  { %6848 = vst [vmem:[#allocation168_spill] sm:$0xff] %v4810_v58  ;;  %v6583_v28 = vmax.f32 %v6850_v5, 0.0  ;;  %v3335_v13 = vld [vmem:[#allocation2 + $0x428] sm:$0xff]  ;;  %v1412_v5 = vld [vmem:[#allocation6 + $0x8] sm:$0xff] }
 0x360   :  { %1883 = vmatmul.f32.gmra.mxu1 %v6581_v37  ;;  %v3334_v37 = vld [vmem:[#allocation2 + $0x420] sm:$0xff]  ;;  %1980 = vmatpush.msra.mxu2 %v1412_v5 }
 0x361   :  { %v941_v19 = vpop.f32.mrf.mxu2  ;;  %v1183_v32 = vpop.f32.mrf.mxu3  ;;  %v3338_v5 = vld [vmem:[#allocation2 + $0x440] sm:$0xff] }
 0x362   :  { %v942_v14 = vadd.f32 %v941_v19, %v3995_v55  ;;  %v4824_v43 = vpop.f32.mrf.mxu0 }
 0x363   :  { %6849 = vst [vmem:[#allocation169_spill] sm:$0xff] %v4824_v43 }
 0x364   :  { %v4827_v50 = vadd.f32 %v1183_v32, %v942_v14  ;;  %v6854_v14 = vld [vmem:[#allocation50_spill] sm:$0xff] }
 0x365   :  { %v4829_v2 = vpop.f32.mrf.mxu1  ;;  %1692 = vmatmul.f32.gmra.mxu0 %v6583_v28 }
 0x366   :  { %6851 = vst [vmem:[#allocation170_spill] sm:$0xff] %v4827_v50  ;;  %v6584_v17 = vmax.f32 %v4827_v50, 0.0  ;;  %991 = vmatmul.f32.gmra.mxu2 %v3334_v37  ;;  %1233 = vmatmul.f32.gmra.mxu3 %v3335_v13  ;;  %v3336_v37 = vld [vmem:[#allocation2 + $0x430] sm:$0xff]  ;;  %v1444_v50 = vld [vmem:[#allocation6 + $0x108] sm:$0xff] }
 0x367   :  { %6852 = vst [vmem:[#allocation171_spill] sm:$0xff] %v4829_v2  ;;  %v6587_v2 = vmax.f32 %v6854_v14, 0.0  ;;  %2222 = vmatpush.msra.mxu3 %v1444_v50 }
 0x368   :  { %1886 = vmatmul.f32.gmra.mxu1 %v6584_v17  ;;  %v3337_v17 = vld [vmem:[#allocation2 + $0x438] sm:$0xff] }
 0x369   :  { %v944_v48 = vpop.f32.mrf.mxu2  ;;  %v1186_v19 = vpop.f32.mrf.mxu3 }
 0x36a   :  { %v945_v43 = vadd.f32 %v944_v48, %v3995_v55  ;;  %v4837_v32 = vpop.f32.mrf.mxu0 }
 0x36b   :  { %6853 = vst [vmem:[#allocation172_spill] sm:$0xff] %v4837_v32 }
 0x36c   :  { %v4840_v58 = vadd.f32 %v1186_v19, %v945_v43 }
 0x36d   :  { %v4842_v28 = vpop.f32.mrf.mxu1  ;;  %1695 = vmatmul.f32.gmra.mxu0 %v6587_v2  ;;  %v6858_v2 = vld [vmem:[#allocation52_spill] sm:$0xff] }
 0x36e   :  { %6855 = vst [vmem:[#allocation173_spill] sm:$0xff] %v4840_v58  ;;  %v6589_v13 = vmax.f32 %v4840_v58, 0.0  ;;  %994 = vmatmul.f32.gmra.mxu2 %v3336_v37  ;;  %1236 = vmatmul.f32.gmra.mxu3 %v3337_v17  ;;  %v6591_v14 = vmax.f32 %v6858_v2, 0.0  ;;  %v3339_v17 = vld [vmem:[#allocation2 + $0x448] sm:$0xff] }
 0x36f   :  { %6856 = vst [vmem:[#allocation174_spill] sm:$0xff] %v4842_v28 }
 0x370   :  { %1889 = vmatmul.f32.gmra.mxu1 %v6589_v13 }
 0x371   :  { %v947_v43 = vpop.f32.mrf.mxu2  ;;  %v1189_v48 = vpop.f32.mrf.mxu3 }
 0x372   :  { %v948_v19 = vadd.f32 %v947_v43, %v3995_v55  ;;  %v4850_v32 = vpop.f32.mrf.mxu0 }
 0x373   :  { %6857 = vst [vmem:[#allocation175_spill] sm:$0xff] %v4850_v32 }
 0x374   :  { %v4853_v28 = vadd.f32 %v1189_v48, %v948_v19  ;;  %v6862_v19 = vld [vmem:[#allocation54_spill] sm:$0xff] }
 0x375   :  { %v4855_v37 = vpop.f32.mrf.mxu1  ;;  %1698 = vmatmul.f32.gmra.mxu0 %v6591_v14  ;;  %v6595_v58 = vmax.f32 %v6862_v19, 0.0 }
 0x376   :  { %6859 = vst [vmem:[#allocation176_spill] sm:$0xff] %v4853_v28  ;;  %v6592_v50 = vmax.f32 %v4853_v28, 0.0  ;;  %997 = vmatmul.f32.gmra.mxu2 %v3338_v5  ;;  %1239 = vmatmul.f32.gmra.mxu3 %v3339_v17  ;;  %v3340_v17 = vld [vmem:[#allocation2 + $0x450] sm:$0xff] }
 0x377   :  { %6860 = vst [vmem:[#allocation177_spill] sm:$0xff] %v4855_v37 }
 0x378   :  { %1892 = vmatmul.f32.gmra.mxu1 %v6592_v50  ;;  %v3341_v50 = vld [vmem:[#allocation2 + $0x458] sm:$0xff] }
 0x379   :  { %v950_v43 = vpop.f32.mrf.mxu2  ;;  %v1192_v13 = vpop.f32.mrf.mxu3 }
 0x37a   :  { %v951_v32 = vadd.f32 %v950_v43, %v3995_v55  ;;  %v4863_v48 = vpop.f32.mrf.mxu0  ;;  %v2602_v43 = vld [vmem:[%s6329_s5 + $0x18] sm:$0xff] }
 0x37b   :  { %6861 = vst [vmem:[#allocation178_spill] sm:$0xff] %v4863_v48  ;;  %2647 = vmatpush.msra.mxu0 %v2602_v43  ;;  %v2618_v43 = vld [vmem:[%s6329_s5 + $0x98] sm:$0xff] }
 0x37c   :  { %v4866_v37 = vadd.f32 %v1192_v13, %v951_v32  ;;  %2889 = vmatpush.msra.mxu1 %v2618_v43  ;;  %v3344_v43 = vld [vmem:[#allocation2 + $0x470] sm:$0xff] }
 0x37d   :  { %v4868_v14 = vpop.f32.mrf.mxu1  ;;  %1701 = vmatmul.f32.gmra.mxu0 %v6595_v58  ;;  %v6599_v58 = vmax.f32 %v3895_v26, 0.0 }
 0x37e   :  { %6863 = vst [vmem:[#allocation179_spill] sm:$0xff] %v4866_v37  ;;  %v6596_v5 = vmax.f32 %v4866_v37, 0.0  ;;  %1000 = vmatmul.f32.gmra.mxu2 %v3340_v17  ;;  %1242 = vmatmul.f32.gmra.mxu3 %v3341_v50  ;;  %v3343_v37 = vld [vmem:[#allocation2 + $0x468] sm:$0xff] }
 0x380   :  { %1895 = vmatmul.f32.gmra.mxu1 %v6596_v5  ;;  %v3342_v5 = vld [vmem:[#allocation2 + $0x460] sm:$0xff] }
 0x381   :  { %v953_v32 = vpop.f32.mrf.mxu2  ;;  %v1195_v13 = vpop.f32.mrf.mxu3 }
 0x382   :  { %v954_v2 = vadd.f32 %v953_v32, %v3995_v55  ;;  %v4879_v19 = vpop.f32.mrf.mxu0 }
 0x383   :  { %6864 = vst [vmem:[#allocation180_spill] sm:$0xff] %v4879_v19 }
 0x384   :  { %v4882_v48 = vadd.f32 %v1195_v13, %v954_v2 }
 0x385   :  { %v4884_v17 = vpop.f32.mrf.mxu1  ;;  %1704 = vmatmul.f32.gmra.mxu0 %v6599_v58  ;;  %v6867_v58 = vld [vmem:[#allocation58_spill] sm:$0xff] }
 0x386   :  { %6865 = vst [vmem:[#allocation181_spill] sm:$0xff] %v4882_v48  ;;  %v6601_v50 = vmax.f32 %v4882_v48, 0.0  ;;  %1003 = vmatmul.f32.gmra.mxu2 %v3342_v5  ;;  %1245 = vmatmul.f32.gmra.mxu3 %v3343_v37  ;;  %v6603_v19 = vmax.f32 %v6867_v58, 0.0 }
 0x388   :  { %1898 = vmatmul.f32.gmra.mxu1 %v6601_v50  ;;  %v3345_v50 = vld [vmem:[#allocation2 + $0x478] sm:$0xff] }
 0x389   :  { %v956_v2 = vpop.f32.mrf.mxu2  ;;  %v1198_v32 = vpop.f32.mrf.mxu3 }
 0x38a   :  { %v957_v13 = vadd.f32 %v956_v2, %v3995_v55  ;;  %v4895_v26 = vpop.f32.mrf.mxu0  ;;  %v2601_v2 = vld [vmem:[%s6329_s5 + $0x10] sm:$0xff] }
 0x38b   :  { %6866 = vst [vmem:[#allocation182_spill] sm:$0xff] %v4895_v26  ;;  %2648 = vmatpush.msra.mxu0 %v2601_v2 }
 0x38c   :  { %v4898_v28 = vadd.f32 %v1198_v32, %v957_v13 }
 0x38d   :  { %v4900_v5 = vpop.f32.mrf.mxu1  ;;  %1707 = vmatmul.f32.gmra.mxu0 %v6603_v19  ;;  %v6871_v19 = vld [vmem:[#allocation60_spill] sm:$0xff] }
 0x38e   :  { %6868 = vst [vmem:[#allocation183_spill] sm:$0xff] %v4898_v28  ;;  %v6605_v37 = vmax.f32 %v4898_v28, 0.0  ;;  %1006 = vmatmul.f32.gmra.mxu2 %v3344_v43  ;;  %1248 = vmatmul.f32.gmra.mxu3 %v3345_v50  ;;  %v2600_v43 = vld [vmem:[%s6329_s5 + $0x8] sm:$0xff]  ;;  %v6608_v50 = vmax.f32 %v6871_v19, 0.0 }
 0x38f   :  { %6869 = vst [vmem:[#allocation184_spill] sm:$0xff] %v4900_v5  ;;  %2649 = vmatpush.msra.mxu0 %v2600_v43 }
 0x390   :  { %1901 = vmatmul.f32.gmra.mxu1 %v6605_v37  ;;  %v2599_v37 = vld [vmem:[%s6329_s5] sm:$0xff] }
 0x391   :  { %v959_v32 = vpop.f32.mrf.mxu2  ;;  %v1201_v13 = vpop.f32.mrf.mxu3  ;;  %2650 = vmatpush.msra.mxu0 %v2599_v37  ;;  %v3348_v37 = vld [vmem:[#allocation2 + $0x490] sm:$0xff] }
 0x392   :  { %v960_v26 = vadd.f32 %v959_v32, %v3995_v55  ;;  %v4911_v58 = vpop.f32.mrf.mxu0  ;;  %v3346_v32 = vld [vmem:[#allocation2 + $0x480] sm:$0xff] }
 0x393   :  { %6870 = vst [vmem:[#allocation185_spill] sm:$0xff] %v4911_v58  ;;  %v3347_v58 = vld [vmem:[#allocation2 + $0x488] sm:$0xff] }
 0x394   :  { %v4917_v28 = vadd.f32 %v1201_v13, %v960_v26 }
 0x395   :  { %v4922_v48 = vpop.f32.mrf.mxu1  ;;  %1710 = vmatmul.f32.gmra.mxu0 %v6608_v50 }
 0x396   :  { %6872 = vst [vmem:[#allocation186_spill] sm:$0xff] %v4917_v28  ;;  %v6609_v2 = vmax.f32 %v4917_v28, 0.0  ;;  %1009 = vmatmul.f32.gmra.mxu2 %v3346_v32  ;;  %1251 = vmatmul.f32.gmra.mxu3 %v3347_v58  ;;  %v3349_v32 = vld [vmem:[#allocation2 + $0x498] sm:$0xff] }
 0x397   :  { %6873 = vst [vmem:[#allocation187_spill] sm:$0xff] %v4922_v48  ;;  %v6611_v48 = vmax.f32 %v3955_v7, 0.0 }
 0x398   :  { %1904 = vmatmul.f32.gmra.mxu1 %v6609_v2 }
 0x399   :  { %v962_v26 = vpop.f32.mrf.mxu2  ;;  %v1204_v13 = vpop.f32.mrf.mxu3 }
 0x39a   :  { %v963_v43 = vadd.f32 %v962_v26, %v3995_v55  ;;  %v4930_v5 = vpop.f32.mrf.mxu0 }
 0x39b   :  { %6874 = vst [vmem:[#allocation188_spill] sm:$0xff] %v4930_v5 }
 0x39c   :  { %v4933_v19 = vadd.f32 %v1204_v13, %v963_v43  ;;  %v6613_v43 = vmax.f32 %v3971_v51, 0.0 }
 0x39d   :  { %v4935_v50 = vpop.f32.mrf.mxu1  ;;  %1713 = vmatmul.f32.gmra.mxu0 %v6611_v48 }
 0x39e   :  { %6875 = vst [vmem:[#allocation189_spill] sm:$0xff] %v4933_v19  ;;  %v6612_v58 = vmax.f32 %v4933_v19, 0.0  ;;  %1012 = vmatmul.f32.gmra.mxu2 %v3348_v37  ;;  %1254 = vmatmul.f32.gmra.mxu3 %v3349_v32  ;;  %v4955_v37 = vld [vmem:[%s6328_s4] sm:$0x3] }
 0x3a0   :  { %1907 = vmatmul.f32.gmra.mxu1 %v6612_v58  ;;  %v3350_v58 = vld [vmem:[#allocation2 + $0x4a0] sm:$0xff] }
 0x3a1   :  { %v965_v26 = vpop.f32.mrf.mxu2  ;;  %v1207_v2 = vpop.f32.mrf.mxu3 }
 0x3a2   :  { %v966_v5 = vadd.f32 %v965_v26, %v3995_v55  ;;  %v4943_v13 = vpop.f32.mrf.mxu0  ;;  %v3351_v26 = vld [vmem:[#allocation2 + $0x4a8] sm:$0xff] }
 0x3a3   :  { %6876 = vst [vmem:[#allocation190_spill] sm:$0xff] %v4943_v13 }
 0x3a4   :  { %v4946_v28 = vadd.f32 %v1207_v2, %v966_v5  ;;  %v2617_v5 = vld [vmem:[%s6329_s5 + $0x90] sm:$0xff]  ;;  %v4964_v2 = vperm.slane %v4955_v37, 0 }
 0x3a5   :  { %v4948_v48 = vpop.f32.mrf.mxu1  ;;  %1716 = vmatmul.f32.gmra.mxu0 %v6613_v43  ;;  %2890 = vmatpush.msra.mxu1 %v2617_v5 }
 0x3a6   :  { %6877 = vst [vmem:[#allocation191_spill] sm:$0xff] %v4946_v28  ;;  %v6616_v32 = vmax.f32 %v4946_v28, 0.0  ;;  %1015 = vmatmul.f32.gmra.mxu2 %v3350_v58  ;;  %1257 = vmatmul.f32.gmra.mxu3 %v3351_v26  ;;  %v6619_v58 = vmax.f32 %v3987_v29, 0.0 }
 0x3a7   :  { %6878 = vst [vmem:[#allocation192_spill] sm:$0xff] %v4948_v48  ;;  %v6881_v48 = vld [vmem:[#allocation35_spill] sm:$0xff] }
 0x3a8   :  { %1910 = vmatmul.f32.gmra.mxu1 %v6616_v32  ;;  %v1499_v32 = vadd.f32 %v4001_v31, %v4964_v2  ;;  %v6882_v5 = vmax.f32 %v6881_v48, 0.0  ;;  %v1502_v48 = vadd.f32 %v4020_v30, %v4964_v2 }
 0x3a9   :  { %v968_v43 = vpop.f32.mrf.mxu2  ;;  %v1210_v51 = vpop.f32.mrf.mxu3 }
 0x3aa   :  { %v969_v7 = vadd.f32 %v968_v43, %v3995_v55  ;;  %v4967_v13 = vpop.f32.mrf.mxu0  ;;  %v6883_v43 = vmax.f32 %v4008_v52, 0.0 }
 0x3ab   :  { %6879 = vst [vmem:[#allocation193_spill] sm:$0xff] %v4967_v13  ;;  %v1741_v13 = vadd.f32 %v4330_v0, %v1499_v32  ;;  %v6884_v0 = vld [vmem:[#allocation37_spill] sm:$0xff] }
 0x3ac   :  { %v4970_v26 = vadd.f32 %v1210_v51, %v969_v7  ;;  %v6885_v32 = vmax.f32 %v6884_v0, 0.0  ;;  %v1505_v0 = vadd.f32 %v4045_v27, %v4964_v2 }
 0x3ad   :  { %v4974_v28 = vpop.f32.mrf.mxu1  ;;  %1719 = vmatmul.f32.gmra.mxu0 %v6619_v58  ;;  %v2449_v58 = vmax.f32 %v1741_v13, 0.0 }
 0x3ae   :  { %6880 = vst [vmem:[#allocation194_spill] sm:$0xff] %v4974_v28  ;;  %v6621_v19 = vmax.f32 %v4970_v26, 0.0  ;;  %1981 = vmatmul.f32.vlgmr.msra.gmra.mxu2 %v6882_v5  ;;  %2223 = vmatmul.f32.vlgmr.msra.gmra.mxu3 %v6883_v43  ;;  %v6886_v43 = vmax.f32 %v4025_v62, 0.0 }
 0x3b0   :  { %1913 = vmatmul.f32.gmra.mxu1 %v6621_v19 }
 0x3b1   :  { %v971_v7 = vpop.f32.mrf.mxu2  ;;  %v1213_v51 = vpop.f32.mrf.mxu3 }
 0x3b2   :  { %v972_v31 = vadd.f32 %v971_v7, %v3995_v55  ;;  %v4987_v28 = vpop.f32.mrf.mxu0  ;;  %v1744_v7 = vadd.f32 %v4349_v4, %v1502_v48  ;;  %v6887_v4 = vld [vmem:[#allocation39_spill] sm:$0xff] }
 0x3b3   :  { %v6888_v48 = vmax.f32 %v6887_v4, 0.0  ;;  %v1508_v4 = vadd.f32 %v4064_v60, %v4964_v2 }
 0x3b4   :  { %v4989_v29 = vadd.f32 %v1213_v51, %v972_v31 }
 0x3b5   :  { %v4993_v5 = vpop.f32.mrf.mxu1  ;;  %2651 = vmatmul.f32.vlgmr.msra.gmra.mxu0 %v2449_v58  ;;  %v2451_v58 = vmax.f32 %v1744_v7, 0.0 }
 0x3b6   :  { %v6622_v52 = vmax.f32 %v4989_v29, 0.0  ;;  %1984 = vmatmul.f32.gmra.mxu2 %v6885_v32  ;;  %2226 = vmatmul.f32.gmra.mxu3 %v6886_v43  ;;  %v6889_v43 = vmax.f32 %v4050_v9, 0.0 }
 0x3b8   :  { %1916 = vmatmul.f32.gmra.mxu1 %v6622_v52 }
 0x3b9   :  { %v974_v13 = vpop.f32.mrf.mxu2  ;;  %v1216_v51 = vpop.f32.mrf.mxu3 }
 0x3ba   :  { %v975_v30 = vadd.f32 %v974_v13, %v3995_v55  ;;  %v5004_v31 = vpop.f32.mrf.mxu0  ;;  %v1747_v13 = vadd.f32 %v4368_v42, %v1505_v0  ;;  %v6891_v42 = vld [vmem:[#allocation41_spill] sm:$0xff] }
 0x3bb   :  { %v6892_v0 = vmax.f32 %v6891_v42, 0.0  ;;  %v1511_v42 = vadd.f32 %v4083_v16, %v4964_v2  ;;  %v2616_v16 = vld [vmem:[%s6329_s5 + $0x88] sm:$0xff] }
 0x3bc   :  { %v5006_v19 = vadd.f32 %v1216_v51, %v975_v30  ;;  %2891 = vmatpush.msra.mxu1 %v2616_v16 }
 0x3bd   :  { %v5010_v32 = vpop.f32.mrf.mxu1  ;;  %2654 = vmatmul.f32.gmra.mxu0 %v2451_v58  ;;  %v2453_v58 = vmax.f32 %v1747_v13, 0.0 }
 0x3be   :  { %v6623_v62 = vmax.f32 %v5006_v19, 0.0  ;;  %1987 = vmatmul.f32.gmra.mxu2 %v6888_v48  ;;  %2229 = vmatmul.f32.gmra.mxu3 %v6889_v43  ;;  %v6893_v43 = vmax.f32 %v4069_v54, 0.0 }
 0x3c0   :  { %1919 = vmatmul.f32.gmra.mxu1 %v6623_v62 }
 0x3c1   :  { %v977_v7 = vpop.f32.mrf.mxu2  ;;  %v1219_v51 = vpop.f32.mrf.mxu3 }
 0x3c2   :  { %v978_v27 = vadd.f32 %v977_v7, %v3995_v55  ;;  %v5021_v30 = vpop.f32.mrf.mxu0  ;;  %v1750_v7 = vadd.f32 %v4387_v34, %v1508_v4  ;;  %v6896_v34 = vld [vmem:[#allocation43_spill] sm:$0xff] }
 0x3c3   :  { %v6897_v4 = vmax.f32 %v6896_v34, 0.0 }
 0x3c4   :  { %v5023_v52 = vadd.f32 %v1219_v51, %v978_v27 }
 0x3c5   :  { %v5027_v48 = vpop.f32.mrf.mxu1  ;;  %2657 = vmatmul.f32.gmra.mxu0 %v2453_v58  ;;  %v2455_v58 = vmax.f32 %v1750_v7, 0.0 }
 0x3c6   :  { %6890 = vst [vmem:[#allocation35_spill] sm:$0xff] %v5023_v52  ;;  %v6625_v9 = vmax.f32 %v5023_v52, 0.0  ;;  %1990 = vmatmul.f32.gmra.mxu2 %v6892_v0  ;;  %2232 = vmatmul.f32.gmra.mxu3 %v6893_v43  ;;  %v6898_v43 = vmax.f32 %v4088_v22, 0.0  ;;  %v6901_v22 = vld [vmem:[#allocation71_spill] sm:$0xff] }
 0x3c8   :  { %1922 = vmatmul.f32.gmra.mxu1 %v6625_v9 }
 0x3c9   :  { %v980_v13 = vpop.f32.mrf.mxu2  ;;  %v1222_v51 = vpop.f32.mrf.mxu3 }
 0x3ca   :  { %v981_v60 = vadd.f32 %v980_v13, %v3995_v55  ;;  %v5038_v27 = vpop.f32.mrf.mxu0  ;;  %v1753_v13 = vadd.f32 %v4406_v21, %v1511_v42  ;;  %v1514_v21 = vadd.f32 %v6901_v22, %v4964_v2 }
 0x3cb   :  { %6894 = vst [vmem:[#allocation37_spill] sm:$0xff] %v5038_v27 }
 0x3cc   :  { %v5040_v62 = vadd.f32 %v1222_v51, %v981_v60  ;;  %v2457_v34 = vmax.f32 %v1753_v13, 0.0 }
 0x3cd   :  { %v5044_v0 = vpop.f32.mrf.mxu1  ;;  %2660 = vmatmul.f32.gmra.mxu0 %v2455_v58 }
 0x3ce   :  { %6895 = vst [vmem:[#allocation39_spill] sm:$0xff] %v5040_v62  ;;  %v6624_v54 = vmax.f32 %v5040_v62, 0.0  ;;  %1993 = vmatmul.f32.gmra.mxu2 %v6897_v4  ;;  %2235 = vmatmul.f32.gmra.mxu3 %v6898_v43  ;;  %v6904_v62 = vld [vmem:[#allocation72_spill] sm:$0xff] }
 0x3cf   :  { %v6905_v16 = vmax.f32 %v6904_v62, 0.0  ;;  %v6909_v62 = vld [vmem:[#allocation47_spill] sm:$0xff] }
 0x3d0   :  { %1925 = vmatmul.f32.gmra.mxu1 %v6624_v54  ;;  %v6902_v54 = vld [vmem:[#allocation45_spill] sm:$0xff] }
 0x3d1   :  { %v983_v7 = vpop.f32.mrf.mxu2  ;;  %v1225_v51 = vpop.f32.mrf.mxu3  ;;  %v6903_v9 = vmax.f32 %v6902_v54, 0.0  ;;  %v6908_v54 = vld [vmem:[#allocation73_spill] sm:$0xff] }
 0x3d2   :  { %v984_v60 = vadd.f32 %v983_v7, %v3995_v55  ;;  %v5058_v58 = vpop.f32.mrf.mxu0  ;;  %v1756_v7 = vadd.f32 %v4429_v44, %v1514_v21  ;;  %v6910_v21 = vmax.f32 %v6909_v62, 0.0  ;;  %v1520_v62 = vadd.f32 %v4144_v12, %v4964_v2 }
 0x3d3   :  { %6899 = vst [vmem:[#allocation41_spill] sm:$0xff] %v5058_v58 }
 0x3d4   :  { %v5060_v4 = vadd.f32 %v1225_v51, %v984_v60 }
 0x3d5   :  { %v5064_v42 = vpop.f32.mrf.mxu1  ;;  %2663 = vmatmul.f32.gmra.mxu0 %v2457_v34  ;;  %v2459_v34 = vmax.f32 %v1756_v7, 0.0 }
 0x3d6   :  { %6900 = vst [vmem:[#allocation43_spill] sm:$0xff] %v5060_v4  ;;  %v6627_v43 = vmax.f32 %v5060_v4, 0.0  ;;  %1996 = vmatmul.f32.gmra.mxu2 %v6903_v9  ;;  %2238 = vmatmul.f32.gmra.mxu3 %v6905_v16  ;;  %v1517_v9 = vadd.f32 %v6908_v54, %v4964_v2  ;;  %v6911_v16 = vmax.f32 %v4124_v1, 0.0 }
 0x3d8   :  { %1928 = vmatmul.f32.gmra.mxu1 %v6627_v43 }
 0x3d9   :  { %v986_v13 = vpop.f32.mrf.mxu2  ;;  %v1228_v51 = vpop.f32.mrf.mxu3 }
 0x3da   :  { %v987_v60 = vadd.f32 %v986_v13, %v3995_v55  ;;  %v5075_v22 = vpop.f32.mrf.mxu0  ;;  %v1759_v13 = vadd.f32 %v4442_v23, %v1517_v9  ;;  %v6914_v23 = vld [vmem:[#allocation49_spill] sm:$0xff] }
 0x3db   :  { %6906 = vst [vmem:[#allocation71_spill] sm:$0xff] %v5075_v22  ;;  %v6915_v9 = vmax.f32 %v6914_v23, 0.0  ;;  %v1523_v23 = vadd.f32 %v4163_v41, %v4964_v2 }
 0x3dc   :  { %v5077_v58 = vadd.f32 %v1228_v51, %v987_v60 }
 0x3dd   :  { %v5081_v27 = vpop.f32.mrf.mxu1  ;;  %2666 = vmatmul.f32.gmra.mxu0 %v2459_v34  ;;  %v2461_v34 = vmax.f32 %v1759_v13, 0.0 }
 0x3de   :  { %6907 = vst [vmem:[#allocation45_spill] sm:$0xff] %v5077_v58  ;;  %v6628_v44 = vmax.f32 %v5077_v58, 0.0  ;;  %1999 = vmatmul.f32.gmra.mxu2 %v6910_v21  ;;  %2241 = vmatmul.f32.gmra.mxu3 %v6911_v16  ;;  %v6916_v16 = vmax.f32 %v4149_v53, 0.0 }
 0x3e0   :  { %1931 = vmatmul.f32.gmra.mxu1 %v6628_v44 }
 0x3e1   :  { %v989_v7 = vpop.f32.mrf.mxu2  ;;  %v1231_v51 = vpop.f32.mrf.mxu3 }
 0x3e2   :  { %v990_v60 = vadd.f32 %v989_v7, %v3995_v55  ;;  %v5092_v54 = vpop.f32.mrf.mxu0  ;;  %v1762_v7 = vadd.f32 %v4455_v63, %v1520_v62  ;;  %v6919_v63 = vld [vmem:[#allocation51_spill] sm:$0xff] }
 0x3e3   :  { %6912 = vst [vmem:[#allocation72_spill] sm:$0xff] %v5092_v54  ;;  %v6920_v62 = vmax.f32 %v6919_v63, 0.0  ;;  %v1526_v63 = vadd.f32 %v4182_v15, %v4964_v2 }
 0x3e4   :  { %v5094_v43 = vadd.f32 %v1231_v51, %v990_v60 }
 0x3e5   :  { %v5098_v21 = vpop.f32.mrf.mxu1  ;;  %2669 = vmatmul.f32.gmra.mxu0 %v2461_v34  ;;  %v2463_v34 = vmax.f32 %v1762_v7, 0.0 }
 0x3e6   :  { %6913 = vst [vmem:[#allocation73_spill] sm:$0xff] %v5094_v43  ;;  %v6629_v1 = vmax.f32 %v5094_v43, 0.0  ;;  %2002 = vmatmul.f32.gmra.mxu2 %v6915_v9  ;;  %2244 = vmatmul.f32.gmra.mxu3 %v6916_v16  ;;  %v6921_v16 = vmax.f32 %v4168_v8, 0.0 }
 0x3e8   :  { %1934 = vmatmul.f32.gmra.mxu1 %v6629_v1 }
 0x3e9   :  { %v992_v13 = vpop.f32.mrf.mxu2  ;;  %v1234_v51 = vpop.f32.mrf.mxu3 }
 0x3ea   :  { %v993_v12 = vadd.f32 %v992_v13, %v3995_v55  ;;  %v5109_v60 = vpop.f32.mrf.mxu0  ;;  %v1765_v13 = vadd.f32 %v4468_v10, %v1523_v23  ;;  %v6924_v10 = vld [vmem:[#allocation53_spill] sm:$0xff] }
 0x3eb   :  { %6917 = vst [vmem:[#allocation47_spill] sm:$0xff] %v5109_v60  ;;  %v6925_v23 = vmax.f32 %v6924_v10, 0.0 }
 0x3ec   :  { %v5111_v44 = vadd.f32 %v1234_v51, %v993_v12 }
 0x3ed   :  { %v5115_v9 = vpop.f32.mrf.mxu1  ;;  %2672 = vmatmul.f32.gmra.mxu0 %v2463_v34  ;;  %v2465_v34 = vmax.f32 %v1765_v13, 0.0  ;;  %v2615_v13 = vld [vmem:[%s6329_s5 + $0x80] sm:$0xff] }
 0x3ee   :  { %6918 = vst [vmem:[#allocation49_spill] sm:$0xff] %v5111_v44  ;;  %v6631_v53 = vmax.f32 %v5111_v44, 0.0  ;;  %2005 = vmatmul.f32.gmra.mxu2 %v6920_v62  ;;  %2247 = vmatmul.f32.gmra.mxu3 %v6921_v16  ;;  %v6926_v16 = vmax.f32 %v4187_v49, 0.0  ;;  %v1529_v49 = vadd.f32 %v4199_v59, %v4964_v2 }
 0x3ef   :  { %2892 = vmatpush.msra.mxu1 %v2615_v13 }
 0x3f0   :  { %1937 = vmatmul.f32.gmra.mxu1 %v6631_v53 }
 0x3f1   :  { %v995_v7 = vpop.f32.mrf.mxu2  ;;  %v1237_v51 = vpop.f32.mrf.mxu3 }
 0x3f2   :  { %v996_v41 = vadd.f32 %v995_v7, %v3995_v55  ;;  %v5126_v12 = vpop.f32.mrf.mxu0  ;;  %v1768_v7 = vadd.f32 %v4484_v47, %v1526_v63  ;;  %v6929_v63 = vld [vmem:[#allocation55_spill] sm:$0xff] }
 0x3f3   :  { %6922 = vst [vmem:[#allocation51_spill] sm:$0xff] %v5126_v12  ;;  %v6930_v13 = vmax.f32 %v6929_v63, 0.0  ;;  %v1532_v63 = vadd.f32 %v4221_v56, %v4964_v2 }
 0x3f4   :  { %v5128_v1 = vadd.f32 %v1237_v51, %v996_v41  ;;  %v2467_v10 = vmax.f32 %v1768_v7, 0.0 }
 0x3f5   :  { %v5132_v62 = vpop.f32.mrf.mxu1  ;;  %2675 = vmatmul.f32.gmra.mxu0 %v2465_v34 }
 0x3f6   :  { %6923 = vst [vmem:[#allocation195_spill] sm:$0xff] %v5128_v1  ;;  %v6630_v8 = vmax.f32 %v5128_v1, 0.0  ;;  %2008 = vmatmul.f32.gmra.mxu2 %v6925_v23  ;;  %2250 = vmatmul.f32.gmra.mxu3 %v6926_v16 }
 0x3f8   :  { %1940 = vmatmul.f32.gmra.mxu1 %v6630_v8  ;;  %v6931_v8 = vmax.f32 %v4206_v18, 0.0 }
 0x3f9   :  { %v998_v15 = vpop.f32.mrf.mxu2  ;;  %v1240_v51 = vpop.f32.mrf.mxu3 }
 0x3fa   :  { %v999_v41 = vadd.f32 %v998_v15, %v3995_v55  ;;  %v5146_v34 = vpop.f32.mrf.mxu0  ;;  %v1771_v15 = vadd.f32 %v4500_v35, %v1529_v49  ;;  %v6934_v35 = vld [vmem:[#allocation57_spill] sm:$0xff]  ;;  %v6936_v49 = vmax.f32 %v4226_v61, 0.0 }
 0x3fb   :  { %6927 = vst [vmem:[#allocation53_spill] sm:$0xff] %v5146_v34 }
 0x3fc   :  { %v5148_v23 = vadd.f32 %v1240_v51, %v999_v41 }
 0x3fd   :  { %v5152_v16 = vpop.f32.mrf.mxu1  ;;  %2678 = vmatmul.f32.gmra.mxu0 %v2467_v10  ;;  %v2469_v10 = vmax.f32 %v1771_v15, 0.0 }
 0x3fe   :  { %6928 = vst [vmem:[#allocation196_spill] sm:$0xff] %v5148_v23  ;;  %v6632_v47 = vmax.f32 %v5148_v23, 0.0  ;;  %2011 = vmatmul.f32.gmra.mxu2 %v6930_v13  ;;  %2253 = vmatmul.f32.gmra.mxu3 %v6931_v8  ;;  %v6935_v8 = vmax.f32 %v6934_v35, 0.0  ;;  %v1535_v35 = vadd.f32 %v4243_v24, %v4964_v2 }
 0x400   :  { %1943 = vmatmul.f32.gmra.mxu1 %v6632_v47 }
 0x401   :  { %v1001_v7 = vpop.f32.mrf.mxu2  ;;  %v1243_v51 = vpop.f32.mrf.mxu3 }
 0x402   :  { %v1002_v59 = vadd.f32 %v1001_v7, %v3995_v55  ;;  %v5163_v41 = vpop.f32.mrf.mxu0  ;;  %v1774_v7 = vadd.f32 %v4513_v36, %v1532_v63  ;;  %v6939_v36 = vld [vmem:[#allocation59_spill] sm:$0xff] }
 0x403   :  { %6932 = vst [vmem:[#allocation55_spill] sm:$0xff] %v5163_v41  ;;  %v6940_v63 = vmax.f32 %v6939_v36, 0.0  ;;  %v1538_v36 = vadd.f32 %v4262_v6, %v4964_v2 }
 0x404   :  { %v5165_v53 = vadd.f32 %v1243_v51, %v1002_v59 }
 0x405   :  { %v5169_v13 = vpop.f32.mrf.mxu1  ;;  %2681 = vmatmul.f32.gmra.mxu0 %v2469_v10  ;;  %v2471_v10 = vmax.f32 %v1774_v7, 0.0 }
 0x406   :  { %6933 = vst [vmem:[#allocation197_spill] sm:$0xff] %v5165_v53  ;;  %v6633_v18 = vmax.f32 %v5165_v53, 0.0  ;;  %2014 = vmatmul.f32.gmra.mxu2 %v6935_v8  ;;  %2256 = vmatmul.f32.gmra.mxu3 %v6936_v49  ;;  %v6941_v49 = vmax.f32 %v4248_v20, 0.0 }
 0x408   :  { %1946 = vmatmul.f32.gmra.mxu1 %v6633_v18 }
 0x409   :  { %v1004_v15 = vpop.f32.mrf.mxu2  ;;  %v1246_v51 = vpop.f32.mrf.mxu3 }
 0x40a   :  { %v1005_v56 = vadd.f32 %v1004_v15, %v3995_v55  ;;  %v5180_v59 = vpop.f32.mrf.mxu0  ;;  %v1777_v15 = vadd.f32 %v4526_v40, %v1535_v35  ;;  %v6944_v40 = vld [vmem:[#allocation61_spill] sm:$0xff] }
 0x40b   :  { %6937 = vst [vmem:[#allocation57_spill] sm:$0xff] %v5180_v59  ;;  %v6945_v35 = vmax.f32 %v6944_v40, 0.0  ;;  %v1541_v40 = vadd.f32 %v4281_v3, %v4964_v2 }
 0x40c   :  { %v5182_v47 = vadd.f32 %v1246_v51, %v1005_v56 }
 0x40d   :  { %v5186_v8 = vpop.f32.mrf.mxu1  ;;  %2684 = vmatmul.f32.gmra.mxu0 %v2471_v10  ;;  %v2473_v10 = vmax.f32 %v1777_v15, 0.0 }
 0x40e   :  { %6938 = vst [vmem:[#allocation198_spill] sm:$0xff] %v5182_v47  ;;  %v6634_v61 = vmax.f32 %v5182_v47, 0.0  ;;  %2017 = vmatmul.f32.gmra.mxu2 %v6940_v63  ;;  %2259 = vmatmul.f32.gmra.mxu3 %v6941_v49  ;;  %v6946_v49 = vmax.f32 %v4267_v11, 0.0 }
 0x410   :  { %1949 = vmatmul.f32.gmra.mxu1 %v6634_v61 }
 0x411   :  { %v1007_v7 = vpop.f32.mrf.mxu2  ;;  %v1249_v51 = vpop.f32.mrf.mxu3 }
 0x412   :  { %v1008_v24 = vadd.f32 %v1007_v7, %v3995_v55  ;;  %v5197_v56 = vpop.f32.mrf.mxu0  ;;  %v1780_v7 = vadd.f32 %v4539_v25, %v1538_v36  ;;  %v6949_v25 = vld [vmem:[#allocation63_spill] sm:$0xff] }
 0x413   :  { %6942 = vst [vmem:[#allocation59_spill] sm:$0xff] %v5197_v56  ;;  %v6950_v36 = vmax.f32 %v6949_v25, 0.0  ;;  %v1544_v25 = vadd.f32 %v4298_v45, %v4964_v2 }
 0x414   :  { %v5199_v18 = vadd.f32 %v1249_v51, %v1008_v24 }
 0x415   :  { %v5203_v63 = vpop.f32.mrf.mxu1  ;;  %2687 = vmatmul.f32.gmra.mxu0 %v2473_v10  ;;  %v2475_v10 = vmax.f32 %v1780_v7, 0.0 }
 0x416   :  { %6943 = vst [vmem:[#allocation199_spill] sm:$0xff] %v5199_v18  ;;  %v6635_v20 = vmax.f32 %v5199_v18, 0.0  ;;  %2020 = vmatmul.f32.gmra.mxu2 %v6945_v35  ;;  %2262 = vmatmul.f32.gmra.mxu3 %v6946_v49  ;;  %v6951_v49 = vmax.f32 %v4286_v33, 0.0 }
 0x418   :  { %1952 = vmatmul.f32.gmra.mxu1 %v6635_v20 }
 0x419   :  { %v1010_v15 = vpop.f32.mrf.mxu2  ;;  %v1252_v51 = vpop.f32.mrf.mxu3 }
 0x41a   :  { %v1011_v6 = vadd.f32 %v1010_v15, %v3995_v55  ;;  %v5214_v24 = vpop.f32.mrf.mxu0  ;;  %v1783_v15 = vadd.f32 %v4558_v39, %v1541_v40  ;;  %v6954_v39 = vld [vmem:[#allocation65_spill] sm:$0xff] }
 0x41b   :  { %6947 = vst [vmem:[#allocation61_spill] sm:$0xff] %v5214_v24  ;;  %v6955_v40 = vmax.f32 %v6954_v39, 0.0  ;;  %v1547_v39 = vadd.f32 %v4323_v38, %v4964_v2 }
 0x41c   :  { %v5216_v61 = vadd.f32 %v1252_v51, %v1011_v6 }
 0x41d   :  { %v5220_v35 = vpop.f32.mrf.mxu1  ;;  %2690 = vmatmul.f32.gmra.mxu0 %v2475_v10  ;;  %v2477_v10 = vmax.f32 %v1783_v15, 0.0 }
 0x41e   :  { %6948 = vst [vmem:[#allocation200_spill] sm:$0xff] %v5216_v61  ;;  %v6636_v11 = vmax.f32 %v5216_v61, 0.0  ;;  %2023 = vmatmul.f32.gmra.mxu2 %v6950_v36  ;;  %2265 = vmatmul.f32.gmra.mxu3 %v6951_v49  ;;  %v6956_v49 = vmax.f32 %v4305_v46, 0.0 }
 0x420   :  { %1955 = vmatmul.f32.gmra.mxu1 %v6636_v11 }
 0x421   :  { %v1013_v7 = vpop.f32.mrf.mxu2  ;;  %v1255_v51 = vpop.f32.mrf.mxu3 }
 0x422   :  { %v1014_v3 = vadd.f32 %v1013_v7, %v3995_v55  ;;  %v5231_v6 = vpop.f32.mrf.mxu0  ;;  %v1786_v7 = vadd.f32 %v4571_v57, %v1544_v25  ;;  %v6959_v57 = vld [vmem:[#allocation67_spill] sm:$0xff] }
 0x423   :  { %6952 = vst [vmem:[#allocation63_spill] sm:$0xff] %v5231_v6  ;;  %v6960_v25 = vmax.f32 %v6959_v57, 0.0 }
 0x424   :  { %v5233_v20 = vadd.f32 %v1255_v51, %v1014_v3 }
 0x425   :  { %v5237_v36 = vpop.f32.mrf.mxu1  ;;  %2693 = vmatmul.f32.gmra.mxu0 %v2477_v10  ;;  %v2479_v10 = vmax.f32 %v1786_v7, 0.0  ;;  %v6963_v7 = vld [vmem:[#allocation120_spill] sm:$0xff] }
 0x426   :  { %6953 = vst [vmem:[#allocation201_spill] sm:$0xff] %v5233_v20  ;;  %v6637_v33 = vmax.f32 %v5233_v20, 0.0  ;;  %2026 = vmatmul.f32.gmra.mxu2 %v6955_v40  ;;  %2268 = vmatmul.f32.gmra.mxu3 %v6956_v49  ;;  %v6961_v49 = vld [vmem:[#allocation82_spill] sm:$0xff]  ;;  %v6965_v20 = vld [vmem:[#allocation68_spill] sm:$0xff] }
 0x428   :  { %1958 = vmatmul.f32.gmra.mxu1 %v6637_v33  ;;  %v6962_v33 = vmax.f32 %v6961_v49, 0.0 }
 0x429   :  { %v1016_v15 = vpop.f32.mrf.mxu2  ;;  %v1258_v51 = vpop.f32.mrf.mxu3 }
 0x42a   :  { %v1017_v45 = vadd.f32 %v1016_v15, %v3995_v55  ;;  %v5248_v3 = vpop.f32.mrf.mxu0  ;;  %v5262_v55 = vperm.slane %v4955_v37, 1  ;;  %v1789_v15 = vadd.f32 %v6963_v7, %v1547_v39  ;;  %v6966_v39 = vmax.f32 %v6965_v20, 0.0  ;;  %v6967_v7 = vld [vmem:[#allocation85_spill] sm:$0xff] }
 0x42b   :  { %6957 = vst [vmem:[#allocation65_spill] sm:$0xff] %v5248_v3 }
 0x42c   :  { %v5250_v11 = vadd.f32 %v1258_v51, %v1017_v45  ;;  %v2481_v3 = vmax.f32 %v1789_v15, 0.0 }
 0x42d   :  { %v5254_v40 = vpop.f32.mrf.mxu1  ;;  %2696 = vmatmul.f32.gmra.mxu0 %v2479_v10 }
 0x42e   :  { %6958 = vst [vmem:[#allocation202_spill] sm:$0xff] %v5250_v11  ;;  %v6639_v46 = vmax.f32 %v5250_v11, 0.0  ;;  %2029 = vmatmul.f32.gmra.mxu2 %v6960_v25  ;;  %2271 = vmatmul.f32.gmra.mxu3 %v6962_v33  ;;  %v6964_v25 = vld [vmem:[#allocation84_spill] sm:$0xff]  ;;  %v6969_v11 = vld [vmem:[#allocation123_spill] sm:$0xff] }
 0x42f   :  { %v1550_v49 = vadd.f32 %v6964_v25, %v4964_v2 }
 0x430   :  { %1961 = vmatmul.f32.gmra.mxu1 %v6639_v46  ;;  %v6968_v46 = vmax.f32 %v6967_v7, 0.0 }
 0x431   :  { %v1982_v38 = vpop.f32.mrf.mxu2  ;;  %v2224_v51 = vpop.f32.mrf.mxu3  ;;  %v1792_v6 = vadd.f32 %v6969_v11, %v1550_v49  ;;  %v6973_v11 = vld [vmem:[#allocation88_spill] sm:$0xff] }
 0x432   :  { %v1983_v45 = vadd.f32 %v1982_v38, %v5262_v55  ;;  %v5268_v10 = vpop.f32.mrf.mxu0  ;;  %v6974_v49 = vmax.f32 %v6973_v11, 0.0 }
 0x434   :  { %v2225_v57 = vadd.f32 %v2224_v51, %v1983_v45  ;;  %v2483_v45 = vmax.f32 %v1792_v6, 0.0 }
 0x435   :  { %v5272_v33 = vpop.f32.mrf.mxu1  ;;  %2699 = vmatmul.f32.gmra.mxu0 %v2481_v3  ;;  %v6970_v3 = vld [vmem:[#allocation87_spill] sm:$0xff] }
 0x436   :  { %v2450_v37 = vmax.f32 %v2225_v57, 0.0  ;;  %2032 = vmatmul.f32.gmra.mxu2 %v6966_v39  ;;  %2274 = vmatmul.f32.gmra.mxu3 %v6968_v46  ;;  %v1553_v57 = vadd.f32 %v6970_v3, %v4964_v2  ;;  %v6971_v39 = vld [vmem:[#allocation69_spill] sm:$0xff] }
 0x437   :  { %v6972_v46 = vmax.f32 %v6971_v39, 0.0 }
 0x438   :  { %2893 = vmatmul.f32.vlgmr.msra.gmra.mxu1 %v2450_v37  ;;  %v6975_v37 = vld [vmem:[#allocation126_spill] sm:$0xff] }
 0x439   :  { %v1985_v38 = vpop.f32.mrf.mxu2  ;;  %v2227_v61 = vpop.f32.mrf.mxu3  ;;  %v1795_v7 = vadd.f32 %v6975_v37, %v1553_v57  ;;  %v6980_v57 = vld [vmem:[#allocation91_spill] sm:$0xff] }
 0x43a   :  { %v1986_v15 = vadd.f32 %v1985_v38, %v5262_v55  ;;  %v5280_v51 = vpop.f32.mrf.mxu0 }
 0x43c   :  { %v2228_v25 = vadd.f32 %v2227_v61, %v1986_v15  ;;  %v2485_v15 = vmax.f32 %v1795_v7, 0.0 }
 0x43d   :  { %v5284_v24 = vpop.f32.mrf.mxu1  ;;  %2702 = vmatmul.f32.gmra.mxu0 %v2483_v45  ;;  %v6976_v45 = vld [vmem:[#allocation90_spill] sm:$0xff] }
 0x43e   :  { %v2452_v20 = vmax.f32 %v2228_v25, 0.0  ;;  %2035 = vmatmul.f32.gmra.mxu2 %v6972_v46  ;;  %2277 = vmatmul.f32.gmra.mxu3 %v6974_v49  ;;  %v1556_v25 = vadd.f32 %v6976_v45, %v4964_v2  ;;  %v6978_v46 = vld [vmem:[#allocation70_spill] sm:$0xff]  ;;  %v6982_v49 = vld [vmem:[#allocation129_spill] sm:$0xff] }
 0x43f   :  { %v6979_v11 = vmax.f32 %v6978_v46, 0.0 }
 0x440   :  { %2896 = vmatmul.f32.gmra.mxu1 %v2452_v20  ;;  %v6981_v20 = vmax.f32 %v6980_v57, 0.0  ;;  %v1798_v37 = vadd.f32 %v6982_v49, %v1556_v25  ;;  %v6987_v25 = vld [vmem:[#allocation94_spill] sm:$0xff] }
 0x441   :  { %v1988_v38 = vpop.f32.mrf.mxu2  ;;  %v2230_v18 = vpop.f32.mrf.mxu3 }
 0x442   :  { %v1989_v61 = vadd.f32 %v1988_v38, %v5262_v55  ;;  %v5292_v6 = vpop.f32.mrf.mxu0 }
 0x444   :  { %v2231_v3 = vadd.f32 %v2230_v18, %v1989_v61  ;;  %v2487_v61 = vmax.f32 %v1798_v37, 0.0 }
 0x445   :  { %v5296_v56 = vpop.f32.mrf.mxu1  ;;  %2705 = vmatmul.f32.gmra.mxu0 %v2485_v15  ;;  %v6983_v15 = vld [vmem:[#allocation93_spill] sm:$0xff] }
 0x446   :  { %6977 = vst [vmem:[#allocation67_spill] sm:$0xff] %v5296_v56  ;;  %v2454_v39 = vmax.f32 %v2231_v3, 0.0  ;;  %2038 = vmatmul.f32.gmra.mxu2 %v6979_v11  ;;  %2280 = vmatmul.f32.gmra.mxu3 %v6981_v20  ;;  %v1559_v3 = vadd.f32 %v6983_v15, %v4964_v2  ;;  %v6985_v11 = vld [vmem:[#allocation25_spill] sm:$0xff]  ;;  %v6989_v20 = vld [vmem:[#allocation132_spill] sm:$0xff]  ;;  %v7079_v56 = vld [vmem:[#allocation171_spill] sm:$0xff] }
 0x447   :  { %v6986_v57 = vmax.f32 %v6985_v11, 0.0 }
 0x448   :  { %2899 = vmatmul.f32.gmra.mxu1 %v2454_v39  ;;  %v6988_v39 = vmax.f32 %v6987_v25, 0.0  ;;  %v1801_v49 = vadd.f32 %v6989_v20, %v1559_v3  ;;  %v6994_v3 = vld [vmem:[#allocation97_spill] sm:$0xff] }
 0x449   :  { %v1991_v38 = vpop.f32.mrf.mxu2  ;;  %v2233_v47 = vpop.f32.mrf.mxu3 }
 0x44a   :  { %v1992_v18 = vadd.f32 %v1991_v38, %v5262_v55  ;;  %v5304_v7 = vpop.f32.mrf.mxu0 }
 0x44c   :  { %v2234_v45 = vadd.f32 %v2233_v47, %v1992_v18  ;;  %v2489_v18 = vmax.f32 %v1801_v49, 0.0 }
 0x44d   :  { %v5308_v59 = vpop.f32.mrf.mxu1  ;;  %2708 = vmatmul.f32.gmra.mxu0 %v2487_v61  ;;  %v6990_v61 = vld [vmem:[#allocation96_spill] sm:$0xff] }
 0x44e   :  { %6984 = vst [vmem:[#allocation82_spill] sm:$0xff] %v5308_v59  ;;  %v2456_v46 = vmax.f32 %v2234_v45, 0.0  ;;  %2041 = vmatmul.f32.gmra.mxu2 %v6986_v57  ;;  %2283 = vmatmul.f32.gmra.mxu3 %v6988_v39  ;;  %v1562_v45 = vadd.f32 %v6990_v61, %v4964_v2  ;;  %v6992_v57 = vld [vmem:[#allocation27_spill] sm:$0xff]  ;;  %v7077_v59 = vld [vmem:[#allocation122_spill] sm:$0xff] }
 0x44f   :  { %v6993_v25 = vmax.f32 %v6992_v57, 0.0  ;;  %v6996_v39 = vld [vmem:[#allocation135_spill] sm:$0xff] }
 0x450   :  { %2902 = vmatmul.f32.gmra.mxu1 %v2456_v46  ;;  %v6995_v46 = vmax.f32 %v6994_v3, 0.0  ;;  %v1804_v20 = vadd.f32 %v6996_v39, %v1562_v45  ;;  %v7001_v45 = vld [vmem:[#allocation99_spill] sm:$0xff] }
 0x451   :  { %v1994_v38 = vpop.f32.mrf.mxu2  ;;  %v2236_v53 = vpop.f32.mrf.mxu3 }
 0x452   :  { %v1995_v47 = vadd.f32 %v1994_v38, %v5262_v55  ;;  %v5316_v37 = vpop.f32.mrf.mxu0 }
 0x454   :  { %v2237_v15 = vadd.f32 %v2236_v53, %v1995_v47  ;;  %v2491_v47 = vmax.f32 %v1804_v20, 0.0 }
 0x455   :  { %v5320_v41 = vpop.f32.mrf.mxu1  ;;  %2711 = vmatmul.f32.gmra.mxu0 %v2489_v18  ;;  %v6997_v18 = vld [vmem:[#allocation98_spill] sm:$0xff] }
 0x456   :  { %6991 = vst [vmem:[#allocation120_spill] sm:$0xff] %v5320_v41  ;;  %v2458_v11 = vmax.f32 %v2237_v15, 0.0  ;;  %2044 = vmatmul.f32.gmra.mxu2 %v6993_v25  ;;  %2286 = vmatmul.f32.gmra.mxu3 %v6995_v46  ;;  %v1565_v15 = vadd.f32 %v6997_v18, %v4964_v2  ;;  %v6999_v25 = vld [vmem:[#allocation29_spill] sm:$0xff]  ;;  %v7003_v46 = vld [vmem:[#allocation138_spill] sm:$0xff] }
 0x457   :  { %v7000_v3 = vmax.f32 %v6999_v25, 0.0 }
 0x458   :  { %2905 = vmatmul.f32.gmra.mxu1 %v2458_v11  ;;  %v7002_v11 = vmax.f32 %v7001_v45, 0.0  ;;  %v1807_v39 = vadd.f32 %v7003_v46, %v1565_v15  ;;  %v7008_v15 = vld [vmem:[#allocation101_spill] sm:$0xff] }
 0x459   :  { %v1997_v38 = vpop.f32.mrf.mxu2  ;;  %v2239_v23 = vpop.f32.mrf.mxu3 }
 0x45a   :  { %v1998_v53 = vadd.f32 %v1997_v38, %v5262_v55  ;;  %v5328_v49 = vpop.f32.mrf.mxu0 }
 0x45c   :  { %v2240_v61 = vadd.f32 %v2239_v23, %v1998_v53  ;;  %v2493_v53 = vmax.f32 %v1807_v39, 0.0 }
 0x45d   :  { %v5332_v34 = vpop.f32.mrf.mxu1  ;;  %2714 = vmatmul.f32.gmra.mxu0 %v2491_v47  ;;  %v7004_v47 = vld [vmem:[#allocation100_spill] sm:$0xff] }
 0x45e   :  { %6998 = vst [vmem:[#allocation84_spill] sm:$0xff] %v5332_v34  ;;  %v2460_v57 = vmax.f32 %v2240_v61, 0.0  ;;  %2047 = vmatmul.f32.gmra.mxu2 %v7000_v3  ;;  %2289 = vmatmul.f32.gmra.mxu3 %v7002_v11  ;;  %v1568_v61 = vadd.f32 %v7004_v47, %v4964_v2  ;;  %v7006_v3 = vld [vmem:[#allocation31_spill] sm:$0xff]  ;;  %v7010_v11 = vld [vmem:[#allocation141_spill] sm:$0xff] }
 0x45f   :  { %v7007_v45 = vmax.f32 %v7006_v3, 0.0 }
 0x460   :  { %2908 = vmatmul.f32.gmra.mxu1 %v2460_v57  ;;  %v7009_v57 = vmax.f32 %v7008_v15, 0.0  ;;  %v1810_v46 = vadd.f32 %v7010_v11, %v1568_v61  ;;  %v7015_v61 = vld [vmem:[#allocation103_spill] sm:$0xff] }
 0x461   :  { %v2000_v38 = vpop.f32.mrf.mxu2  ;;  %v2242_v1 = vpop.f32.mrf.mxu3 }
 0x462   :  { %v2001_v23 = vadd.f32 %v2000_v38, %v5262_v55  ;;  %v5340_v20 = vpop.f32.mrf.mxu0 }
 0x464   :  { %v2243_v18 = vadd.f32 %v2242_v1, %v2001_v23  ;;  %v2495_v23 = vmax.f32 %v1810_v46, 0.0 }
 0x465   :  { %v5344_v12 = vpop.f32.mrf.mxu1  ;;  %2717 = vmatmul.f32.gmra.mxu0 %v2493_v53  ;;  %v7011_v53 = vld [vmem:[#allocation102_spill] sm:$0xff] }
 0x466   :  { %7005 = vst [vmem:[#allocation68_spill] sm:$0xff] %v5344_v12  ;;  %v2462_v25 = vmax.f32 %v2243_v18, 0.0  ;;  %2050 = vmatmul.f32.gmra.mxu2 %v7007_v45  ;;  %2292 = vmatmul.f32.gmra.mxu3 %v7009_v57  ;;  %v1571_v18 = vadd.f32 %v7011_v53, %v4964_v2  ;;  %v7013_v45 = vld [vmem:[#allocation74_spill] sm:$0xff]  ;;  %v7017_v57 = vld [vmem:[#allocation144_spill] sm:$0xff] }
 0x467   :  { %v7014_v15 = vmax.f32 %v7013_v45, 0.0 }
 0x468   :  { %2911 = vmatmul.f32.gmra.mxu1 %v2462_v25  ;;  %v7016_v25 = vmax.f32 %v7015_v61, 0.0  ;;  %v1813_v11 = vadd.f32 %v7017_v57, %v1571_v18  ;;  %v7022_v18 = vld [vmem:[#allocation105_spill] sm:$0xff] }
 0x469   :  { %v2003_v38 = vpop.f32.mrf.mxu2  ;;  %v2245_v44 = vpop.f32.mrf.mxu3 }
 0x46a   :  { %v2004_v1 = vadd.f32 %v2003_v38, %v5262_v55  ;;  %v5352_v39 = vpop.f32.mrf.mxu0 }
 0x46c   :  { %v2246_v47 = vadd.f32 %v2245_v44, %v2004_v1  ;;  %v2497_v1 = vmax.f32 %v1813_v11, 0.0 }
 0x46d   :  { %v5356_v60 = vpop.f32.mrf.mxu1  ;;  %2720 = vmatmul.f32.gmra.mxu0 %v2495_v23  ;;  %v7018_v23 = vld [vmem:[#allocation104_spill] sm:$0xff] }
 0x46e   :  { %7012 = vst [vmem:[#allocation85_spill] sm:$0xff] %v5356_v60  ;;  %v2464_v3 = vmax.f32 %v2246_v47, 0.0  ;;  %2053 = vmatmul.f32.gmra.mxu2 %v7014_v15  ;;  %2295 = vmatmul.f32.gmra.mxu3 %v7016_v25  ;;  %v1574_v47 = vadd.f32 %v7018_v23, %v4964_v2  ;;  %v7020_v15 = vld [vmem:[#allocation34_spill] sm:$0xff]  ;;  %v7024_v25 = vld [vmem:[#allocation147_spill] sm:$0xff] }
 0x46f   :  { %v7021_v61 = vmax.f32 %v7020_v15, 0.0 }
 0x470   :  { %2914 = vmatmul.f32.gmra.mxu1 %v2464_v3  ;;  %v7023_v3 = vmax.f32 %v7022_v18, 0.0  ;;  %v1816_v57 = vadd.f32 %v7024_v25, %v1574_v47  ;;  %v7029_v47 = vld [vmem:[#allocation107_spill] sm:$0xff] }
 0x471   :  { %v2006_v38 = vpop.f32.mrf.mxu2  ;;  %v2248_v12 = vpop.f32.mrf.mxu3 }
 0x472   :  { %v2007_v44 = vadd.f32 %v2006_v38, %v5262_v55  ;;  %v5364_v46 = vpop.f32.mrf.mxu0 }
 0x474   :  { %v2249_v53 = vadd.f32 %v2248_v12, %v2007_v44  ;;  %v2499_v44 = vmax.f32 %v1816_v57, 0.0 }
 0x475   :  { %v5368_v60 = vpop.f32.mrf.mxu1  ;;  %2723 = vmatmul.f32.gmra.mxu0 %v2497_v1  ;;  %v7025_v1 = vld [vmem:[#allocation106_spill] sm:$0xff] }
 0x476   :  { %7019 = vst [vmem:[#allocation123_spill] sm:$0xff] %v5368_v60  ;;  %v2466_v45 = vmax.f32 %v2249_v53, 0.0  ;;  %2056 = vmatmul.f32.gmra.mxu2 %v7021_v61  ;;  %2298 = vmatmul.f32.gmra.mxu3 %v7023_v3  ;;  %v1577_v53 = vadd.f32 %v7025_v1, %v4964_v2  ;;  %v7027_v61 = vld [vmem:[#allocation75_spill] sm:$0xff]  ;;  %v7031_v3 = vld [vmem:[#allocation150_spill] sm:$0xff] }
 0x477   :  { %v7028_v18 = vmax.f32 %v7027_v61, 0.0 }
 0x478   :  { %2917 = vmatmul.f32.gmra.mxu1 %v2466_v45  ;;  %v7030_v45 = vmax.f32 %v7029_v47, 0.0  ;;  %v1819_v25 = vadd.f32 %v7031_v3, %v1577_v53  ;;  %v7036_v53 = vld [vmem:[#allocation109_spill] sm:$0xff] }
 0x479   :  { %v2009_v38 = vpop.f32.mrf.mxu2  ;;  %v2251_v43 = vpop.f32.mrf.mxu3 }
 0x47a   :  { %v2010_v12 = vadd.f32 %v2009_v38, %v5262_v55  ;;  %v5376_v11 = vpop.f32.mrf.mxu0 }
 0x47c   :  { %v2252_v23 = vadd.f32 %v2251_v43, %v2010_v12  ;;  %v2501_v12 = vmax.f32 %v1819_v25, 0.0 }
 0x47d   :  { %v5380_v60 = vpop.f32.mrf.mxu1  ;;  %2726 = vmatmul.f32.gmra.mxu0 %v2499_v44  ;;  %v7032_v44 = vld [vmem:[#allocation108_spill] sm:$0xff] }
 0x47e   :  { %7026 = vst [vmem:[#allocation87_spill] sm:$0xff] %v5380_v60  ;;  %v2468_v15 = vmax.f32 %v2252_v23, 0.0  ;;  %2059 = vmatmul.f32.gmra.mxu2 %v7028_v18  ;;  %2301 = vmatmul.f32.gmra.mxu3 %v7030_v45  ;;  %v1580_v23 = vadd.f32 %v7032_v44, %v4964_v2  ;;  %v7034_v18 = vld [vmem:[#allocation76_spill] sm:$0xff]  ;;  %v7038_v45 = vld [vmem:[#allocation153_spill] sm:$0xff] }
 0x47f   :  { %v7035_v47 = vmax.f32 %v7034_v18, 0.0 }
 0x480   :  { %2920 = vmatmul.f32.gmra.mxu1 %v2468_v15  ;;  %v7037_v15 = vmax.f32 %v7036_v53, 0.0  ;;  %v1822_v3 = vadd.f32 %v7038_v45, %v1580_v23  ;;  %v7043_v23 = vld [vmem:[#allocation111_spill] sm:$0xff] }
 0x481   :  { %v2012_v38 = vpop.f32.mrf.mxu2  ;;  %v2254_v54 = vpop.f32.mrf.mxu3 }
 0x482   :  { %v2013_v43 = vadd.f32 %v2012_v38, %v5262_v55  ;;  %v5388_v57 = vpop.f32.mrf.mxu0 }
 0x484   :  { %v2255_v1 = vadd.f32 %v2254_v54, %v2013_v43  ;;  %v2503_v43 = vmax.f32 %v1822_v3, 0.0 }
 0x485   :  { %v5392_v60 = vpop.f32.mrf.mxu1  ;;  %2729 = vmatmul.f32.gmra.mxu0 %v2501_v12  ;;  %v7039_v12 = vld [vmem:[#allocation110_spill] sm:$0xff] }
 0x486   :  { %7033 = vst [vmem:[#allocation69_spill] sm:$0xff] %v5392_v60  ;;  %v2470_v61 = vmax.f32 %v2255_v1, 0.0  ;;  %2062 = vmatmul.f32.gmra.mxu2 %v7035_v47  ;;  %2304 = vmatmul.f32.gmra.mxu3 %v7037_v15  ;;  %v1583_v1 = vadd.f32 %v7039_v12, %v4964_v2  ;;  %v7041_v47 = vld [vmem:[#allocation77_spill] sm:$0xff]  ;;  %v7045_v15 = vld [vmem:[#allocation156_spill] sm:$0xff] }
 0x487   :  { %v7042_v53 = vmax.f32 %v7041_v47, 0.0 }
 0x488   :  { %2923 = vmatmul.f32.gmra.mxu1 %v2470_v61  ;;  %v7044_v61 = vmax.f32 %v7043_v23, 0.0  ;;  %v1825_v45 = vadd.f32 %v7045_v15, %v1583_v1  ;;  %v7050_v1 = vld [vmem:[#allocation113_spill] sm:$0xff] }
 0x489   :  { %v2015_v38 = vpop.f32.mrf.mxu2  ;;  %v2257_v34 = vpop.f32.mrf.mxu3 }
 0x48a   :  { %v2016_v54 = vadd.f32 %v2015_v38, %v5262_v55  ;;  %v5400_v25 = vpop.f32.mrf.mxu0 }
 0x48c   :  { %v2258_v44 = vadd.f32 %v2257_v34, %v2016_v54  ;;  %v2505_v54 = vmax.f32 %v1825_v45, 0.0 }
 0x48d   :  { %v5404_v60 = vpop.f32.mrf.mxu1  ;;  %2732 = vmatmul.f32.gmra.mxu0 %v2503_v43  ;;  %v7046_v43 = vld [vmem:[#allocation112_spill] sm:$0xff] }
 0x48e   :  { %7040 = vst [vmem:[#allocation88_spill] sm:$0xff] %v5404_v60  ;;  %v2472_v18 = vmax.f32 %v2258_v44, 0.0  ;;  %2065 = vmatmul.f32.gmra.mxu2 %v7042_v53  ;;  %2307 = vmatmul.f32.gmra.mxu3 %v7044_v61  ;;  %v1586_v44 = vadd.f32 %v7046_v43, %v4964_v2  ;;  %v7048_v53 = vld [vmem:[#allocation78_spill] sm:$0xff]  ;;  %v7052_v61 = vld [vmem:[#allocation159_spill] sm:$0xff] }
 0x48f   :  { %v7049_v23 = vmax.f32 %v7048_v53, 0.0 }
 0x490   :  { %2926 = vmatmul.f32.gmra.mxu1 %v2472_v18  ;;  %v7051_v18 = vmax.f32 %v7050_v1, 0.0  ;;  %v1828_v15 = vadd.f32 %v7052_v61, %v1586_v44  ;;  %v7057_v44 = vld [vmem:[#allocation115_spill] sm:$0xff] }
 0x491   :  { %v2018_v38 = vpop.f32.mrf.mxu2  ;;  %v2260_v58 = vpop.f32.mrf.mxu3 }
 0x492   :  { %v2019_v34 = vadd.f32 %v2018_v38, %v5262_v55  ;;  %v5412_v3 = vpop.f32.mrf.mxu0 }
 0x494   :  { %v2261_v12 = vadd.f32 %v2260_v58, %v2019_v34  ;;  %v2507_v34 = vmax.f32 %v1828_v15, 0.0 }
 0x495   :  { %v5416_v60 = vpop.f32.mrf.mxu1  ;;  %2735 = vmatmul.f32.gmra.mxu0 %v2505_v54  ;;  %v7053_v54 = vld [vmem:[#allocation114_spill] sm:$0xff] }
 0x496   :  { %7047 = vst [vmem:[#allocation126_spill] sm:$0xff] %v5416_v60  ;;  %v2474_v47 = vmax.f32 %v2261_v12, 0.0  ;;  %2068 = vmatmul.f32.gmra.mxu2 %v7049_v23  ;;  %2310 = vmatmul.f32.gmra.mxu3 %v7051_v18  ;;  %v1589_v12 = vadd.f32 %v7053_v54, %v4964_v2  ;;  %v7055_v23 = vld [vmem:[#allocation79_spill] sm:$0xff]  ;;  %v7059_v18 = vld [vmem:[#allocation162_spill] sm:$0xff] }
 0x497   :  { %v7056_v1 = vmax.f32 %v7055_v23, 0.0 }
 0x498   :  { %2929 = vmatmul.f32.gmra.mxu1 %v2474_v47  ;;  %v7058_v47 = vmax.f32 %v7057_v44, 0.0  ;;  %v1831_v61 = vadd.f32 %v7059_v18, %v1589_v12  ;;  %v7064_v12 = vld [vmem:[#allocation117_spill] sm:$0xff] }
 0x499   :  { %v2021_v38 = vpop.f32.mrf.mxu2  ;;  %v2263_v22 = vpop.f32.mrf.mxu3 }
 0x49a   :  { %v2022_v58 = vadd.f32 %v2021_v38, %v5262_v55  ;;  %v5424_v45 = vpop.f32.mrf.mxu0 }
 0x49c   :  { %v2264_v43 = vadd.f32 %v2263_v22, %v2022_v58  ;;  %v2509_v58 = vmax.f32 %v1831_v61, 0.0 }
 0x49d   :  { %v5428_v60 = vpop.f32.mrf.mxu1  ;;  %2738 = vmatmul.f32.gmra.mxu0 %v2507_v34  ;;  %v7060_v34 = vld [vmem:[#allocation116_spill] sm:$0xff] }
 0x49e   :  { %7054 = vst [vmem:[#allocation90_spill] sm:$0xff] %v5428_v60  ;;  %v2476_v53 = vmax.f32 %v2264_v43, 0.0  ;;  %2071 = vmatmul.f32.gmra.mxu2 %v7056_v1  ;;  %2313 = vmatmul.f32.gmra.mxu3 %v7058_v47  ;;  %v1592_v43 = vadd.f32 %v7060_v34, %v4964_v2  ;;  %v7062_v1 = vld [vmem:[#allocation80_spill] sm:$0xff]  ;;  %v7066_v47 = vld [vmem:[#allocation165_spill] sm:$0xff] }
 0x49f   :  { %v7063_v44 = vmax.f32 %v7062_v1, 0.0 }
 0x4a0   :  { %2932 = vmatmul.f32.gmra.mxu1 %v2476_v53  ;;  %v7065_v53 = vmax.f32 %v7064_v12, 0.0  ;;  %v1834_v18 = vadd.f32 %v7066_v47, %v1592_v43  ;;  %v7071_v43 = vld [vmem:[#allocation119_spill] sm:$0xff] }
 0x4a1   :  { %v2024_v38 = vpop.f32.mrf.mxu2  ;;  %v2266_v41 = vpop.f32.mrf.mxu3 }
 0x4a2   :  { %v2025_v22 = vadd.f32 %v2024_v38, %v5262_v55  ;;  %v5436_v15 = vpop.f32.mrf.mxu0 }
 0x4a4   :  { %v2267_v54 = vadd.f32 %v2266_v41, %v2025_v22  ;;  %v2511_v22 = vmax.f32 %v1834_v18, 0.0  ;;  %v5462_v18 = vld [vmem:[%s6330_s6] ss:$0 sm:$0xff] }
 0x4a5   :  { %v5440_v60 = vpop.f32.mrf.mxu1  ;;  %2741 = vmatmul.f32.gmra.mxu0 %v2509_v58  ;;  %v7067_v58 = vld [vmem:[#allocation118_spill] sm:$0xff] }
 0x4a6   :  { %7061 = vst [vmem:[#allocation70_spill] sm:$0xff] %v5440_v60  ;;  %v2478_v23 = vmax.f32 %v2267_v54, 0.0  ;;  %2074 = vmatmul.f32.gmra.mxu2 %v7063_v44  ;;  %2316 = vmatmul.f32.gmra.mxu3 %v7065_v53  ;;  %v1595_v54 = vadd.f32 %v7067_v58, %v4964_v2  ;;  %v7069_v44 = vld [vmem:[#allocation81_spill] sm:$0xff]  ;;  %v7073_v53 = vld [vmem:[#allocation168_spill] sm:$0xff]  ;;  %v2653_v58 = vadd.f32 %v5462_v18, %v5268_v10 }
 0x4a7   :  { %v7070_v12 = vmax.f32 %v7069_v44, 0.0 }
 0x4a8   :  { %2935 = vmatmul.f32.gmra.mxu1 %v2478_v23  ;;  %v7072_v23 = vmax.f32 %v7071_v43, 0.0  ;;  %v1837_v47 = vadd.f32 %v7073_v53, %v1595_v54 }
 0x4a9   :  { %v2027_v38 = vpop.f32.mrf.mxu2  ;;  %v2269_v4 = vpop.f32.mrf.mxu3 }
 0x4aa   :  { %v2028_v41 = vadd.f32 %v2027_v38, %v5262_v55  ;;  %v5448_v61 = vpop.f32.mrf.mxu0 }
 0x4ac   :  { %v2270_v34 = vadd.f32 %v2269_v4, %v2028_v41 }
 0x4ad   :  { %v5452_v60 = vpop.f32.mrf.mxu1  ;;  %2744 = vmatmul.f32.gmra.mxu0 %v2511_v22 }
 0x4ae   :  { %7068 = vst [vmem:[#allocation91_spill] sm:$0xff] %v5452_v60  ;;  %v2480_v1 = vmax.f32 %v2270_v34, 0.0  ;;  %2077 = vmatmul.f32.gmra.mxu2 %v7070_v12  ;;  %2319 = vmatmul.f32.gmra.mxu3 %v7072_v23  ;;  %v2513_v34 = vmax.f32 %v1837_v47, 0.0  ;;  %v7074_v12 = vld [vmem:[#allocation121_spill] sm:$0xff] }
 0x4af   :  { %v1598_v54 = vadd.f32 %v7074_v12, %v4964_v2 }
 0x4b0   :  { %2938 = vmatmul.f32.gmra.mxu1 %v2480_v1  ;;  %v7075_v1 = vld [vmem:[#allocation83_spill] sm:$0xff] }
 0x4b1   :  { %v2030_v4 = vpop.f32.mrf.mxu2  ;;  %v2272_v38 = vpop.f32.mrf.mxu3  ;;  %v7076_v60 = vmax.f32 %v7075_v1, 0.0  ;;  %v1840_v47 = vadd.f32 %v7079_v56, %v1598_v54  ;;  %v7083_v1 = vld [vmem:[#allocation125_spill] sm:$0xff] }
 0x4b2   :  { %v2031_v41 = vadd.f32 %v2030_v4, %v5262_v55  ;;  %v5465_v22 = vpop.f32.mrf.mxu0  ;;  %v7078_v4 = vmax.f32 %v7077_v59, 0.0 }
 0x4b4   :  { %v2273_v44 = vadd.f32 %v2272_v38, %v2031_v41 }
 0x4b5   :  { %v2894_v43 = vpop.f32.mrf.mxu1  ;;  %2747 = vmatmul.f32.gmra.mxu0 %v2513_v34 }
 0x4b6   :  { %v2482_v23 = vmax.f32 %v2273_v44, 0.0  ;;  %v2895_v53 = vadd.f32 %v2894_v43, %v2653_v58  ;;  %2080 = vmatmul.f32.gmra.mxu2 %v7076_v60  ;;  %2322 = vmatmul.f32.gmra.mxu3 %v7078_v4  ;;  %v2515_v58 = vmax.f32 %v1840_v47, 0.0  ;;  %v2656_v60 = vadd.f32 %v5462_v18, %v5280_v51  ;;  %v7080_v44 = vld [vmem:[#allocation124_spill] sm:$0xff] }
 0x4b7   :  { %v1601_v56 = vadd.f32 %v7080_v44, %v4964_v2  ;;  %v7084_v4 = vmax.f32 %v7083_v1, 0.0  ;;  %v7086_v44 = vld [vmem:[#allocation127_spill] sm:$0xff]  ;;  %v7089_v1 = vld [vmem:[#allocation128_spill] sm:$0xff] }
 0x4b8   :  { %3120 = vst.msk [vmem:[%s6331_s7] sm:$0xff] %vm3119_vm0, %v2895_v53  ;;  %2941 = vmatmul.f32.gmra.mxu1 %v2482_v23  ;;  %v7081_v53 = vld [vmem:[#allocation86_spill] sm:$0xff] }
 0x4b9   :  { %v2033_v10 = vpop.f32.mrf.mxu2  ;;  %v2275_v38 = vpop.f32.mrf.mxu3  ;;  %v7082_v23 = vmax.f32 %v7081_v53, 0.0 }
 0x4ba   :  { %v2034_v41 = vadd.f32 %v2033_v10, %v5262_v55  ;;  %v5481_v34 = vpop.f32.mrf.mxu0  ;;  %v7085_v10 = vld [vmem:[#allocation174_spill] sm:$0xff] }
 0x4bb   :  { %v1843_v52 = vadd.f32 %v7085_v10, %v1601_v56  ;;  %v1604_v56 = vadd.f32 %v7086_v44, %v4964_v2 }
 0x4bc   :  { %v2276_v59 = vadd.f32 %v2275_v38, %v2034_v41 }
 0x4bd   :  { %v2897_v12 = vpop.f32.mrf.mxu1  ;;  %2750 = vmatmul.f32.gmra.mxu0 %v2515_v58  ;;  %v2517_v41 = vmax.f32 %v1843_v52, 0.0  ;;  %v2659_v58 = vadd.f32 %v5462_v18, %v5292_v6  ;;  %v7091_v52 = vld [vmem:[#allocation177_spill] sm:$0xff] }
 0x4be   :  { %v2484_v54 = vmax.f32 %v2276_v59, 0.0  ;;  %v2898_v43 = vadd.f32 %v2897_v12, %v2656_v60  ;;  %2083 = vmatmul.f32.gmra.mxu2 %v7082_v23  ;;  %2325 = vmatmul.f32.gmra.mxu3 %v7084_v4  ;;  %v7090_v4 = vmax.f32 %v7089_v1, 0.0  ;;  %v1846_v10 = vadd.f32 %v7091_v52, %v1604_v56  ;;  %v7095_v1 = vld [vmem:[#allocation131_spill] sm:$0xff] }
 0x4c0   :  { %3121 = vst.msk [vmem:[%s6331_s7 + $0x8] sm:$0xff] %vm3119_vm0, %v2898_v43  ;;  %2944 = vmatmul.f32.gmra.mxu1 %v2484_v54  ;;  %v7087_v43 = vld [vmem:[#allocation89_spill] sm:$0xff] }
 0x4c1   :  { %v2036_v51 = vpop.f32.mrf.mxu2  ;;  %v2278_v47 = vpop.f32.mrf.mxu3  ;;  %v7088_v54 = vmax.f32 %v7087_v43, 0.0 }
 0x4c2   :  { %v2037_v38 = vadd.f32 %v2036_v51, %v5262_v55  ;;  %v5499_v59 = vpop.f32.mrf.mxu0 }
 0x4c4   :  { %v2279_v60 = vadd.f32 %v2278_v47, %v2037_v38  ;;  %v2519_v38 = vmax.f32 %v1846_v10, 0.0 }
 0x4c5   :  { %v2900_v12 = vpop.f32.mrf.mxu1  ;;  %2753 = vmatmul.f32.gmra.mxu0 %v2517_v41  ;;  %v2662_v41 = vadd.f32 %v5462_v18, %v5304_v7 }
 0x4c6   :  { %v2486_v53 = vmax.f32 %v2279_v60, 0.0  ;;  %v2901_v23 = vadd.f32 %v2900_v12, %v2659_v58  ;;  %2086 = vmatmul.f32.gmra.mxu2 %v7088_v54  ;;  %2328 = vmatmul.f32.gmra.mxu3 %v7090_v4  ;;  %v7092_v60 = vld [vmem:[#allocation130_spill] sm:$0xff]  ;;  %v7096_v4 = vmax.f32 %v7095_v1, 0.0 }
 0x4c7   :  { %v1607_v44 = vadd.f32 %v7092_v60, %v4964_v2 }
 0x4c8   :  { %3122 = vst.msk [vmem:[%s6331_s7 + $0x10] sm:$0xff] %vm3119_vm0, %v2901_v23  ;;  %2947 = vmatmul.f32.gmra.mxu1 %v2486_v53  ;;  %v7093_v23 = vld [vmem:[#allocation92_spill] sm:$0xff] }
 0x4c9   :  { %v2039_v6 = vpop.f32.mrf.mxu2  ;;  %v2281_v51 = vpop.f32.mrf.mxu3  ;;  %v7094_v53 = vmax.f32 %v7093_v23, 0.0  ;;  %v1849_v52 = vadd.f32 %v4868_v14, %v1607_v44 }
 0x4ca   :  { %v2040_v47 = vadd.f32 %v2039_v6, %v5262_v55  ;;  %v5517_v43 = vpop.f32.mrf.mxu0 }
 0x4cc   :  { %v2282_v58 = vadd.f32 %v2281_v51, %v2040_v47  ;;  %v2521_v51 = vmax.f32 %v1849_v52, 0.0  ;;  %v2665_v47 = vadd.f32 %v5462_v18, %v5316_v37 }
 0x4cd   :  { %v2903_v12 = vpop.f32.mrf.mxu1  ;;  %2756 = vmatmul.f32.gmra.mxu0 %v2519_v38 }
 0x4ce   :  { %v2488_v56 = vmax.f32 %v2282_v58, 0.0  ;;  %v2904_v54 = vadd.f32 %v2903_v12, %v2662_v41  ;;  %2089 = vmatmul.f32.gmra.mxu2 %v7094_v53  ;;  %2331 = vmatmul.f32.gmra.mxu3 %v7096_v4  ;;  %v7097_v41 = vld [vmem:[#allocation133_spill] sm:$0xff]  ;;  %v7098_v12 = vld [vmem:[#allocation95_spill] sm:$0xff] }
 0x4cf   :  { %v1610_v58 = vadd.f32 %v7097_v41, %v4964_v2  ;;  %v7099_v23 = vmax.f32 %v7098_v12, 0.0  ;;  %v7107_v12 = vld [vmem:[#allocation184_spill] sm:$0xff] }
 0x4d0   :  { %3123 = vst.msk [vmem:[%s6331_s7 + $0x18] sm:$0xff] %vm3119_vm0, %v2904_v54  ;;  %2950 = vmatmul.f32.gmra.mxu1 %v2488_v56  ;;  %v7100_v56 = vld [vmem:[#allocation134_spill] sm:$0xff] }
 0x4d1   :  { %v2042_v7 = vpop.f32.mrf.mxu2  ;;  %v2284_v10 = vpop.f32.mrf.mxu3  ;;  %v7101_v54 = vmax.f32 %v7100_v56, 0.0  ;;  %v1852_v53 = vadd.f32 %v4884_v17, %v1610_v58  ;;  %v7103_v58 = vld [vmem:[#allocation9_spill] sm:$0xff] }
 0x4d2   :  { %v2043_v6 = vadd.f32 %v2042_v7, %v5262_v55  ;;  %v5538_v1 = vpop.f32.mrf.mxu0 }
 0x4d3   :  { %v2523_v7 = vmax.f32 %v1852_v53, 0.0 }
 0x4d4   :  { %v2285_v38 = vadd.f32 %v2284_v10, %v2043_v6  ;;  %v2668_v10 = vadd.f32 %v5462_v18, %v5328_v49 }
 0x4d5   :  { %v2906_v60 = vpop.f32.mrf.mxu1  ;;  %2759 = vmatmul.f32.gmra.mxu0 %v2521_v51  ;;  %v7102_v51 = vld [vmem:[#allocation136_spill] sm:$0xff] }
 0x4d6   :  { %v2490_v14 = vmax.f32 %v2285_v38, 0.0  ;;  %v2907_v44 = vadd.f32 %v2906_v60, %v2665_v47  ;;  %2092 = vmatmul.f32.gmra.mxu2 %v7099_v23  ;;  %2334 = vmatmul.f32.gmra.mxu3 %v7101_v54  ;;  %v1613_v17 = vadd.f32 %v7102_v51, %v4964_v2  ;;  %v7104_v60 = vmax.f32 %v7103_v58, 0.0 }
 0x4d8   :  { %3124 = vst.msk [vmem:[%s6331_s7 + $0x20] sm:$0xff] %vm3119_vm0, %v2907_v44  ;;  %2953 = vmatmul.f32.gmra.mxu1 %v2490_v14  ;;  %v7105_v14 = vld [vmem:[#allocation137_spill] sm:$0xff]  ;;  %v1855_v23 = vadd.f32 %v7107_v12, %v1613_v17 }
 0x4d9   :  { %v2045_v37 = vpop.f32.mrf.mxu2  ;;  %v2287_v4 = vpop.f32.mrf.mxu3  ;;  %v7106_v44 = vmax.f32 %v7105_v14, 0.0 }
 0x4da   :  { %v2046_v52 = vadd.f32 %v2045_v37, %v5262_v55  ;;  %v5558_v54 = vpop.f32.mrf.mxu0  ;;  %v2525_v37 = vmax.f32 %v1855_v23, 0.0 }
 0x4dc   :  { %v2288_v6 = vadd.f32 %v2287_v4, %v2046_v52  ;;  %v2671_v4 = vadd.f32 %v5462_v18, %v5340_v20 }
 0x4dd   :  { %v2909_v47 = vpop.f32.mrf.mxu1  ;;  %2762 = vmatmul.f32.gmra.mxu0 %v2523_v7  ;;  %v7108_v7 = vld [vmem:[#allocation139_spill] sm:$0xff] }
 0x4de   :  { %v2492_v38 = vmax.f32 %v2288_v6, 0.0  ;;  %v2910_v41 = vadd.f32 %v2909_v47, %v2668_v10  ;;  %2095 = vmatmul.f32.gmra.mxu2 %v7104_v60  ;;  %2337 = vmatmul.f32.gmra.mxu3 %v7106_v44  ;;  %v1616_v10 = vadd.f32 %v7108_v7, %v4964_v2  ;;  %v7109_v47 = vld [vmem:[#allocation10_spill] sm:$0xff]  ;;  %v7113_v60 = vld [vmem:[#allocation187_spill] sm:$0xff] }
 0x4e0   :  { %3125 = vst.msk [vmem:[%s6331_s7 + $0x28] sm:$0xff] %vm3119_vm0, %v2910_v41  ;;  %2956 = vmatmul.f32.gmra.mxu1 %v2492_v38  ;;  %v7110_v38 = vmax.f32 %v7109_v47, 0.0  ;;  %v7111_v41 = vld [vmem:[#allocation140_spill] sm:$0xff]  ;;  %v1858_v14 = vadd.f32 %v7113_v60, %v1616_v10 }
 0x4e1   :  { %v2048_v49 = vpop.f32.mrf.mxu2  ;;  %v2290_v56 = vpop.f32.mrf.mxu3  ;;  %v7112_v58 = vmax.f32 %v7111_v41, 0.0 }
 0x4e2   :  { %v2049_v53 = vadd.f32 %v2048_v49, %v5262_v55  ;;  %v2527_v23 = vmax.f32 %v1858_v14, 0.0  ;;  %v2674_v49 = vadd.f32 %v5462_v18, %v5352_v39  ;;  %v2677_v14 = vadd.f32 %v5462_v18, %v5364_v46 }
 0x4e4   :  { %v2291_v52 = vadd.f32 %v2290_v56, %v2049_v53  ;;  %v5577_v56 = vpop.f32.mrf.mxu0 }
 0x4e5   :  { %v2912_v6 = vpop.f32.mrf.mxu1  ;;  %2765 = vmatmul.f32.gmra.mxu0 %v2525_v37  ;;  %v7114_v37 = vld [vmem:[#allocation142_spill] sm:$0xff] }
 0x4e6   :  { %v2494_v51 = vmax.f32 %v2291_v52, 0.0  ;;  %v2913_v17 = vadd.f32 %v2912_v6, %v2671_v4  ;;  %2098 = vmatmul.f32.gmra.mxu2 %v7110_v38  ;;  %2340 = vmatmul.f32.gmra.mxu3 %v7112_v58  ;;  %v1619_v4 = vadd.f32 %v7114_v37, %v4964_v2  ;;  %v7115_v6 = vld [vmem:[#allocation11_spill] sm:$0xff]  ;;  %v7120_v37 = vld [vmem:[#allocation12_spill] sm:$0xff] }
 0x4e8   :  { %3126 = vst.msk [vmem:[%s6331_s7 + $0x30] sm:$0xff] %vm3119_vm0, %v2913_v17  ;;  %2959 = vmatmul.f32.gmra.mxu1 %v2494_v51  ;;  %v7116_v51 = vmax.f32 %v7115_v6, 0.0  ;;  %v7117_v17 = vld [vmem:[#allocation143_spill] sm:$0xff]  ;;  %v1861_v38 = vadd.f32 %v4935_v50, %v1619_v4  ;;  %v7121_v4 = vmax.f32 %v7120_v37, 0.0 }
 0x4e9   :  { %v2051_v20 = vpop.f32.mrf.mxu2  ;;  %v2293_v44 = vpop.f32.mrf.mxu3  ;;  %v7118_v47 = vmax.f32 %v7117_v17, 0.0 }
 0x4ea   :  { %v2052_v12 = vadd.f32 %v2051_v20, %v5262_v55  ;;  %v2529_v60 = vmax.f32 %v1861_v38, 0.0  ;;  %v2680_v38 = vadd.f32 %v5462_v18, %v5376_v11 }
 0x4ec   :  { %v2294_v53 = vadd.f32 %v2293_v44, %v2052_v12  ;;  %v7119_v44 = vld [vmem:[#allocation145_spill] sm:$0xff]  ;;  %v5595_v50 = vpop.f32.mrf.mxu0 }
 0x4ed   :  { %v2915_v52 = vpop.f32.mrf.mxu1  ;;  %2768 = vmatmul.f32.gmra.mxu0 %v2527_v23  ;;  %v1622_v12 = vadd.f32 %v7119_v44, %v4964_v2  ;;  %v7126_v44 = vld [vmem:[#allocation13_spill] sm:$0xff] }
 0x4ee   :  { %v2496_v7 = vmax.f32 %v2294_v53, 0.0  ;;  %v2916_v10 = vadd.f32 %v2915_v52, %v2674_v49  ;;  %2101 = vmatmul.f32.gmra.mxu2 %v7116_v51  ;;  %2343 = vmatmul.f32.gmra.mxu3 %v7118_v47  ;;  %v7122_v52 = vld [vmem:[#allocation146_spill] sm:$0xff] }
 0x4f0   :  { %3127 = vst.msk [vmem:[%s6331_s7 + $0x38] sm:$0xff] %vm3119_vm0, %v2916_v10  ;;  %2962 = vmatmul.f32.gmra.mxu1 %v2496_v7  ;;  %v7123_v7 = vmax.f32 %v7122_v52, 0.0  ;;  %v7124_v10 = vld [vmem:[#allocation192_spill] sm:$0xff] }
 0x4f1   :  { %v2054_v39 = vpop.f32.mrf.mxu2  ;;  %v2296_v41 = vpop.f32.mrf.mxu3  ;;  %v1864_v6 = vadd.f32 %v7124_v10, %v1622_v12  ;;  %v7127_v12 = vmax.f32 %v7126_v44, 0.0 }
 0x4f2   :  { %v2055_v58 = vadd.f32 %v2054_v39, %v5262_v55 }
 0x4f3   :  { %v2531_v47 = vmax.f32 %v1864_v6, 0.0  ;;  %v2683_v6 = vadd.f32 %v5462_v18, %v5388_v57 }
 0x4f4   :  { %v2297_v20 = vadd.f32 %v2296_v41, %v2055_v58  ;;  %v7125_v41 = vld [vmem:[#allocation148_spill] sm:$0xff] }
 0x4f5   :  { %v2918_v23 = vpop.f32.mrf.mxu1  ;;  %2771 = vmatmul.f32.gmra.mxu0 %v2529_v60  ;;  %v1625_v58 = vadd.f32 %v7125_v41, %v4964_v2  ;;  %v7132_v41 = vld [vmem:[#allocation14_spill] sm:$0xff] }
 0x4f6   :  { %v2498_v49 = vmax.f32 %v2297_v20, 0.0  ;;  %v2919_v53 = vadd.f32 %v2918_v23, %v2677_v14  ;;  %2104 = vmatmul.f32.gmra.mxu2 %v7121_v4  ;;  %2346 = vmatmul.f32.gmra.mxu3 %v7123_v7  ;;  %v7128_v23 = vld [vmem:[#allocation149_spill] sm:$0xff]  ;;  %v5616_v4 = vpop.f32.mrf.mxu0 }
 0x4f8   :  { %3128 = vst.msk [vmem:[%s6331_s7 + $0x40] sm:$0xff] %vm3119_vm0, %v2919_v53  ;;  %2965 = vmatmul.f32.gmra.mxu1 %v2498_v49  ;;  %v7129_v49 = vmax.f32 %v7128_v23, 0.0  ;;  %v7130_v53 = vld [vmem:[#allocation194_spill] sm:$0xff] }
 0x4f9   :  { %v2057_v46 = vpop.f32.mrf.mxu2  ;;  %v2299_v51 = vpop.f32.mrf.mxu3  ;;  %v1867_v37 = vadd.f32 %v7130_v53, %v1625_v58  ;;  %v7133_v58 = vmax.f32 %v7132_v41, 0.0  ;;  %v2686_v53 = vadd.f32 %v5462_v18, %v5400_v25 }
 0x4fa   :  { %v2058_v17 = vadd.f32 %v2057_v46, %v5262_v55 }
 0x4fb   :  { %v2533_v10 = vmax.f32 %v1867_v37, 0.0 }
 0x4fc   :  { %v2300_v39 = vadd.f32 %v2299_v51, %v2058_v17  ;;  %v7131_v51 = vld [vmem:[#allocation151_spill] sm:$0xff] }
 0x4fd   :  { %v2921_v60 = vpop.f32.mrf.mxu1  ;;  %2774 = vmatmul.f32.gmra.mxu0 %v2531_v47  ;;  %v1628_v17 = vadd.f32 %v7131_v51, %v4964_v2  ;;  %v7139_v51 = vld [vmem:[#allocation155_spill] sm:$0xff] }
 0x4fe   :  { %v2500_v14 = vmax.f32 %v2300_v39, 0.0  ;;  %v2922_v20 = vadd.f32 %v2921_v60, %v2680_v38  ;;  %2107 = vmatmul.f32.gmra.mxu2 %v7127_v12  ;;  %2349 = vmatmul.f32.gmra.mxu3 %v7129_v49  ;;  %v7134_v60 = vld [vmem:[#allocation152_spill] sm:$0xff]  ;;  %v5636_v12 = vpop.f32.mrf.mxu0 }
 0x500   :  { %3129 = vst.msk [vmem:[%s6331_s7 + $0x48] sm:$0xff] %vm3119_vm0, %v2922_v20  ;;  %2968 = vmatmul.f32.gmra.mxu1 %v2500_v14  ;;  %v7135_v14 = vmax.f32 %v7134_v60, 0.0  ;;  %v1870_v20 = vadd.f32 %v4993_v5, %v1628_v17  ;;  %v7140_v17 = vmax.f32 %v7139_v51, 0.0  ;;  %v7146_v51 = vld [vmem:[#allocation160_spill] sm:$0xff] }
 0x501   :  { %v2060_v11 = vpop.f32.mrf.mxu2  ;;  %v2302_v52 = vpop.f32.mrf.mxu3 }
 0x502   :  { %v2061_v7 = vadd.f32 %v2060_v11, %v5262_v55  ;;  %v2535_v49 = vmax.f32 %v1870_v20, 0.0  ;;  %v7136_v11 = vld [vmem:[#allocation154_spill] sm:$0xff]  ;;  %v7141_v20 = vld [vmem:[#allocation157_spill] sm:$0xff] }
 0x503   :  { %v1631_v5 = vadd.f32 %v7136_v11, %v4964_v2 }
 0x504   :  { %v2303_v46 = vadd.f32 %v2302_v52, %v2061_v7 }
 0x505   :  { %v2924_v47 = vpop.f32.mrf.mxu1  ;;  %2777 = vmatmul.f32.gmra.mxu0 %v2533_v10 }
 0x506   :  { %v2502_v38 = vmax.f32 %v2303_v46, 0.0  ;;  %v2925_v39 = vadd.f32 %v2924_v47, %v2683_v6  ;;  %2110 = vmatmul.f32.gmra.mxu2 %v7133_v58  ;;  %2352 = vmatmul.f32.gmra.mxu3 %v7135_v14  ;;  %v7137_v6 = vld [vmem:[#allocation15_spill] sm:$0xff]  ;;  %v1873_v47 = vadd.f32 %v5010_v32, %v1631_v5  ;;  %v2689_v58 = vadd.f32 %v5462_v18, %v5412_v3  ;;  %v5655_v60 = vpop.f32.mrf.mxu0 }
 0x507   :  { %v7138_v46 = vmax.f32 %v7137_v6, 0.0  ;;  %v1634_v32 = vadd.f32 %v7141_v20, %v4964_v2  ;;  %v2692_v6 = vadd.f32 %v5462_v18, %v5424_v45 }
 0x508   :  { %3130 = vst.msk [vmem:[%s6331_s7 + $0x50] sm:$0xff] %vm3119_vm0, %v2925_v39  ;;  %2971 = vmatmul.f32.gmra.mxu1 %v2502_v38  ;;  %v2537_v41 = vmax.f32 %v1873_v47, 0.0 }
 0x509   :  { %v2063_v57 = vpop.f32.mrf.mxu2  ;;  %v2305_v44 = vpop.f32.mrf.mxu3  ;;  %v1876_v5 = vadd.f32 %v5027_v48, %v1634_v32 }
 0x50a   :  { %v2064_v23 = vadd.f32 %v2063_v57, %v5262_v55 }
 0x50c   :  { %v2306_v37 = vadd.f32 %v2305_v44, %v2064_v23 }
 0x50d   :  { %v2927_v52 = vpop.f32.mrf.mxu1  ;;  %2780 = vmatmul.f32.gmra.mxu0 %v2535_v49  ;;  %v7142_v49 = vld [vmem:[#allocation16_spill] sm:$0xff] }
 0x50e   :  { %v2504_v7 = vmax.f32 %v2306_v37, 0.0  ;;  %v2928_v10 = vadd.f32 %v2927_v52, %v2686_v53  ;;  %2113 = vmatmul.f32.gmra.mxu2 %v7138_v46  ;;  %2355 = vmatmul.f32.gmra.mxu3 %v7140_v17  ;;  %v7143_v53 = vmax.f32 %v7142_v49, 0.0  ;;  %v7144_v37 = vld [vmem:[#allocation158_spill] sm:$0xff]  ;;  %v1637_v17 = vadd.f32 %v7146_v51, %v4964_v2  ;;  %v5673_v48 = vpop.f32.mrf.mxu0 }
 0x50f   :  { %v7145_v11 = vmax.f32 %v7144_v37, 0.0 }
 0x510   :  { %3131 = vst.msk [vmem:[%s6331_s7 + $0x58] sm:$0xff] %vm3119_vm0, %v2928_v10  ;;  %2974 = vmatmul.f32.gmra.mxu1 %v2504_v7  ;;  %v2539_v10 = vmax.f32 %v1876_v5, 0.0  ;;  %v1879_v20 = vadd.f32 %v5044_v0, %v1637_v17 }
 0x511   :  { %v2066_v25 = vpop.f32.mrf.mxu2  ;;  %v2308_v38 = vpop.f32.mrf.mxu3 }
 0x512   :  { %v2067_v39 = vadd.f32 %v2066_v25, %v5262_v55 }
 0x514   :  { %v2309_v14 = vadd.f32 %v2308_v38, %v2067_v39  ;;  %v7147_v39 = vld [vmem:[#allocation17_spill] sm:$0xff] }
 0x515   :  { %v2930_v57 = vpop.f32.mrf.mxu1  ;;  %2783 = vmatmul.f32.gmra.mxu0 %v2537_v41  ;;  %v7148_v41 = vmax.f32 %v7147_v39, 0.0  ;;  %v7156_v39 = vld [vmem:[#allocation166_spill] sm:$0xff] }
 0x516   :  { %v2506_v44 = vmax.f32 %v2309_v14, 0.0  ;;  %v2931_v23 = vadd.f32 %v2930_v57, %v2689_v58  ;;  %2116 = vmatmul.f32.gmra.mxu2 %v7143_v53  ;;  %2358 = vmatmul.f32.gmra.mxu3 %v7145_v11  ;;  %v7149_v58 = vld [vmem:[#allocation161_spill] sm:$0xff]  ;;  %v7151_v53 = vld [vmem:[#allocation163_spill] sm:$0xff] }
 0x517   :  { %v7150_v14 = vmax.f32 %v7149_v58, 0.0  ;;  %v1640_v37 = vadd.f32 %v7151_v53, %v4964_v2 }
 0x518   :  { %3132 = vst.msk [vmem:[%s6331_s7 + $0x60] sm:$0xff] %vm3119_vm0, %v2931_v23  ;;  %2977 = vmatmul.f32.gmra.mxu1 %v2506_v44  ;;  %v2541_v44 = vmax.f32 %v1879_v20, 0.0  ;;  %v2695_v23 = vadd.f32 %v5462_v18, %v5436_v15  ;;  %v7157_v20 = vld [vmem:[#allocation19_spill] sm:$0xff] }
 0x519   :  { %v2069_v3 = vpop.f32.mrf.mxu2  ;;  %v2311_v52 = vpop.f32.mrf.mxu3 }
 0x51a   :  { %v2070_v7 = vadd.f32 %v2069_v3, %v5262_v55  ;;  %v7152_v3 = vld [vmem:[#allocation18_spill] sm:$0xff] }
 0x51c   :  { %v2312_v46 = vadd.f32 %v2311_v52, %v2070_v7  ;;  %v7153_v52 = vmax.f32 %v7152_v3, 0.0  ;;  %v7154_v7 = vld [vmem:[#allocation164_spill] sm:$0xff] }
 0x51d   :  { %v2933_v47 = vpop.f32.mrf.mxu1  ;;  %2786 = vmatmul.f32.gmra.mxu0 %v2539_v10  ;;  %v7155_v10 = vmax.f32 %v7154_v7, 0.0 }
 0x51e   :  { %v2508_v25 = vmax.f32 %v2312_v46, 0.0  ;;  %v2934_v38 = vadd.f32 %v2933_v47, %v2692_v6  ;;  %2119 = vmatmul.f32.gmra.mxu2 %v7148_v41  ;;  %2361 = vmatmul.f32.gmra.mxu3 %v7150_v14  ;;  %v1882_v6 = vadd.f32 %v5064_v42, %v1640_v37  ;;  %v5694_v46 = vpop.f32.mrf.mxu0  ;;  %v1643_v42 = vadd.f32 %v7156_v39, %v4964_v2 }
 0x51f   :  { %v2704_v39 = vadd.f32 %v5462_v18, %v5481_v34 }
 0x520   :  { %3133 = vst.msk [vmem:[%s6331_s7 + $0x68] sm:$0xff] %vm3119_vm0, %v2934_v38  ;;  %2980 = vmatmul.f32.gmra.mxu1 %v2508_v25  ;;  %v2543_v47 = vmax.f32 %v1882_v6, 0.0  ;;  %v2698_v25 = vadd.f32 %v5462_v18, %v5448_v61 }
 0x521   :  { %v2072_v45 = vpop.f32.mrf.mxu2  ;;  %v2314_v32 = vpop.f32.mrf.mxu3 }
 0x522   :  { %v2073_v57 = vadd.f32 %v2072_v45, %v5262_v55  ;;  %v7158_v45 = vmax.f32 %v7157_v20, 0.0 }
 0x524   :  { %v2315_v49 = vadd.f32 %v2314_v32, %v2073_v57  ;;  %v7159_v32 = vld [vmem:[#allocation167_spill] sm:$0xff] }
 0x525   :  { %v2936_v11 = vpop.f32.mrf.mxu1  ;;  %2789 = vmatmul.f32.gmra.mxu0 %v2541_v44  ;;  %v7160_v57 = vmax.f32 %v7159_v32, 0.0  ;;  %v1885_v44 = vadd.f32 %v5081_v27, %v1643_v42  ;;  %v7167_v32 = vld [vmem:[#allocation21_spill] sm:$0xff] }
 0x526   :  { %v2510_v0 = vmax.f32 %v2315_v49, 0.0  ;;  %v2937_v5 = vadd.f32 %v2936_v11, %v2695_v23  ;;  %2122 = vmatmul.f32.gmra.mxu2 %v7153_v52  ;;  %2364 = vmatmul.f32.gmra.mxu3 %v7155_v10  ;;  %v5714_v49 = vpop.f32.mrf.mxu0  ;;  %v2701_v11 = vadd.f32 %v5462_v18, %v5465_v22  ;;  %v7162_v10 = vld [vmem:[#allocation20_spill] sm:$0xff] }
 0x527   :  { %v2545_v37 = vmax.f32 %v1885_v44, 0.0  ;;  %v7163_v6 = vmax.f32 %v7162_v10, 0.0  ;;  %v7169_v44 = vld [vmem:[#allocation173_spill] sm:$0xff] }
 0x528   :  { %3134 = vst.msk [vmem:[%s6331_s7 + $0x70] sm:$0xff] %vm3119_vm0, %v2937_v5  ;;  %2983 = vmatmul.f32.gmra.mxu1 %v2510_v0  ;;  %v7161_v5 = vld [vmem:[#allocation169_spill] sm:$0xff] }
 0x529   :  { %v2075_v15 = vpop.f32.mrf.mxu2  ;;  %v2317_v51 = vpop.f32.mrf.mxu3  ;;  %v1646_v27 = vadd.f32 %v7161_v5, %v4964_v2 }
 0x52a   :  { %v2076_v17 = vadd.f32 %v2075_v15, %v5262_v55  ;;  %v7164_v15 = vld [vmem:[#allocation170_spill] sm:$0xff] }
 0x52c   :  { %v2318_v38 = vadd.f32 %v2317_v51, %v2076_v17  ;;  %v7165_v51 = vmax.f32 %v7164_v15, 0.0  ;;  %v1888_v17 = vadd.f32 %v5098_v21, %v1646_v27  ;;  %v7171_v27 = vld [vmem:[#allocation175_spill] sm:$0xff] }
 0x52d   :  { %v2939_v41 = vpop.f32.mrf.mxu1  ;;  %2792 = vmatmul.f32.gmra.mxu0 %v2543_v47 }
 0x52e   :  { %v2512_v58 = vmax.f32 %v2318_v38, 0.0  ;;  %v2940_v14 = vadd.f32 %v2939_v41, %v2698_v25  ;;  %2125 = vmatmul.f32.gmra.mxu2 %v7158_v45  ;;  %2367 = vmatmul.f32.gmra.mxu3 %v7160_v57  ;;  %v2547_v38 = vmax.f32 %v1888_v17, 0.0  ;;  %v5733_v42 = vpop.f32.mrf.mxu0  ;;  %v7168_v57 = vmax.f32 %v7167_v32, 0.0 }
 0x530   :  { %3135 = vst.msk [vmem:[%s6331_s7 + $0x78] sm:$0xff] %vm3119_vm0, %v2940_v14  ;;  %2986 = vmatmul.f32.gmra.mxu1 %v2512_v58  ;;  %v7166_v58 = vld [vmem:[#allocation172_spill] sm:$0xff] }
 0x531   :  { %v2078_v61 = vpop.f32.mrf.mxu2  ;;  %v2320_v23 = vpop.f32.mrf.mxu3  ;;  %v1649_v21 = vadd.f32 %v7166_v58, %v4964_v2  ;;  %v7176_v58 = vld [vmem:[#allocation178_spill] sm:$0xff] }
 0x532   :  { %v2079_v53 = vadd.f32 %v2078_v61, %v5262_v55  ;;  %v7170_v61 = vmax.f32 %v7169_v44, 0.0 }
 0x534   :  { %v2321_v0 = vadd.f32 %v2320_v23, %v2079_v53  ;;  %v1891_v23 = vadd.f32 %v5115_v9, %v1649_v21  ;;  %v1655_v21 = vadd.f32 %v7176_v58, %v4964_v2 }
 0x535   :  { %v2942_v3 = vpop.f32.mrf.mxu1  ;;  %2795 = vmatmul.f32.gmra.mxu0 %v2545_v37 }
 0x536   :  { %v2514_v52 = vmax.f32 %v2321_v0, 0.0  ;;  %v2943_v7 = vadd.f32 %v2942_v3, %v2701_v11  ;;  %2128 = vmatmul.f32.gmra.mxu2 %v7163_v6  ;;  %2370 = vmatmul.f32.gmra.mxu3 %v7165_v51  ;;  %v2549_v11 = vmax.f32 %v1891_v23, 0.0  ;;  %v2707_v0 = vadd.f32 %v5462_v18, %v5499_v59  ;;  %v5751_v9 = vpop.f32.mrf.mxu0  ;;  %v7172_v6 = vld [vmem:[#allocation22_spill] sm:$0xff]  ;;  %v7174_v51 = vld [vmem:[#allocation176_spill] sm:$0xff] }
 0x537   :  { %v1652_v3 = vadd.f32 %v7171_v27, %v4964_v2  ;;  %v7173_v15 = vmax.f32 %v7172_v6, 0.0  ;;  %v7175_v17 = vmax.f32 %v7174_v51, 0.0  ;;  %v7184_v6 = vld [vmem:[#allocation181_spill] sm:$0xff] }
 0x538   :  { %3136 = vst.msk [vmem:[%s6331_s7 + $0x80] sm:$0xff] %vm3119_vm0, %v2943_v7  ;;  %2989 = vmatmul.f32.gmra.mxu1 %v2514_v52 }
 0x539   :  { %v2081_v22 = vpop.f32.mrf.mxu2  ;;  %v2323_v47 = vpop.f32.mrf.mxu3 }
 0x53a   :  { %v2082_v25 = vadd.f32 %v2081_v22, %v5262_v55  ;;  %v1894_v22 = vadd.f32 %v5132_v62, %v1652_v3 }
 0x53c   :  { %v2324_v41 = vadd.f32 %v2323_v47, %v2082_v25 }
 0x53d   :  { %v2945_v14 = vpop.f32.mrf.mxu1  ;;  %2798 = vmatmul.f32.gmra.mxu0 %v2547_v38  ;;  %v2551_v38 = vmax.f32 %v1894_v22, 0.0 }
 0x53e   :  { %v2516_v20 = vmax.f32 %v2324_v41, 0.0  ;;  %v2946_v45 = vadd.f32 %v2945_v14, %v2704_v39  ;;  %2131 = vmatmul.f32.gmra.mxu2 %v7168_v57  ;;  %2373 = vmatmul.f32.gmra.mxu3 %v7170_v61  ;;  %v2710_v39 = vadd.f32 %v5462_v18, %v5517_v43  ;;  %v7179_v57 = vld [vmem:[#allocation179_spill] sm:$0xff]  ;;  %v1897_v61 = vadd.f32 %v5152_v16, %v1655_v21  ;;  %v5772_v23 = vpop.f32.mrf.mxu0 }
 0x53f   :  { %v7180_v44 = vmax.f32 %v7179_v57, 0.0 }
 0x540   :  { %3137 = vst.msk [vmem:[%s6331_s7 + $0x88] sm:$0xff] %vm3119_vm0, %v2946_v45  ;;  %2992 = vmatmul.f32.gmra.mxu1 %v2516_v20  ;;  %v7177_v45 = vld [vmem:[#allocation23_spill] sm:$0xff] }
 0x541   :  { %v2084_v34 = vpop.f32.mrf.mxu2  ;;  %v2326_v53 = vpop.f32.mrf.mxu3  ;;  %v7178_v32 = vmax.f32 %v7177_v45, 0.0 }
 0x542   :  { %v2085_v37 = vadd.f32 %v2084_v34, %v5262_v55 }
 0x544   :  { %v2327_v5 = vadd.f32 %v2326_v53, %v2085_v37  ;;  %v2553_v37 = vmax.f32 %v1897_v61, 0.0 }
 0x545   :  { %v2948_v52 = vpop.f32.mrf.mxu1  ;;  %2801 = vmatmul.f32.gmra.mxu0 %v2549_v11  ;;  %v2713_v11 = vadd.f32 %v5462_v18, %v5538_v1 }
 0x546   :  { %v2518_v7 = vmax.f32 %v2327_v5, 0.0  ;;  %v2949_v10 = vadd.f32 %v2948_v52, %v2707_v0  ;;  %2134 = vmatmul.f32.gmra.mxu2 %v7173_v15  ;;  %2376 = vmatmul.f32.gmra.mxu3 %v7175_v17  ;;  %v7181_v5 = vld [vmem:[#allocation180_spill] sm:$0xff]  ;;  %v7185_v15 = vmax.f32 %v7184_v6, 0.0  ;;  %v5792_v22 = vpop.f32.mrf.mxu0 }
 0x547   :  { %v1658_v16 = vadd.f32 %v7181_v5, %v4964_v2 }
 0x548   :  { %3138 = vst.msk [vmem:[%s6331_s7 + $0x90] sm:$0xff] %vm3119_vm0, %v2949_v10  ;;  %2995 = vmatmul.f32.gmra.mxu1 %v2518_v7  ;;  %v7182_v7 = vld [vmem:[#allocation24_spill] sm:$0xff] }
 0x549   :  { %v2087_v59 = vpop.f32.mrf.mxu2  ;;  %v2329_v47 = vpop.f32.mrf.mxu3  ;;  %v7183_v10 = vmax.f32 %v7182_v7, 0.0  ;;  %v1900_v51 = vadd.f32 %v5169_v13, %v1658_v16  ;;  %v7192_v16 = vld [vmem:[#allocation28_spill] sm:$0xff] }
 0x54a   :  { %v2088_v25 = vadd.f32 %v2087_v59, %v5262_v55 }
 0x54c   :  { %v2330_v41 = vadd.f32 %v2329_v47, %v2088_v25  ;;  %v2555_v47 = vmax.f32 %v1900_v51, 0.0  ;;  %v2716_v25 = vadd.f32 %v5462_v18, %v5558_v54  ;;  %v2722_v51 = vadd.f32 %v5462_v18, %v5595_v50 }
 0x54d   :  { %v2951_v14 = vpop.f32.mrf.mxu1  ;;  %2804 = vmatmul.f32.gmra.mxu0 %v2551_v38 }
 0x54e   :  { %v2520_v62 = vmax.f32 %v2330_v41, 0.0  ;;  %v2952_v20 = vadd.f32 %v2951_v14, %v2710_v39  ;;  %2137 = vmatmul.f32.gmra.mxu2 %v7178_v32  ;;  %2379 = vmatmul.f32.gmra.mxu3 %v7180_v44  ;;  %v7186_v39 = vld [vmem:[#allocation182_spill] sm:$0xff] }
 0x54f   :  { %v1661_v13 = vadd.f32 %v7186_v39, %v4964_v2  ;;  %v7187_v14 = vld [vmem:[#allocation26_spill] sm:$0xff] }
 0x550   :  { %3139 = vst.msk [vmem:[%s6331_s7 + $0x98] sm:$0xff] %vm3119_vm0, %v2952_v20  ;;  %2998 = vmatmul.f32.gmra.mxu1 %v2520_v62  ;;  %v7188_v62 = vmax.f32 %v7187_v14, 0.0  ;;  %v7189_v20 = vld [vmem:[#allocation183_spill] sm:$0xff]  ;;  %v7197_v39 = vld [vmem:[#allocation30_spill] sm:$0xff] }
 0x551   :  { %v2090_v43 = vpop.f32.mrf.mxu2  ;;  %v2332_v34 = vpop.f32.mrf.mxu3  ;;  %v7190_v45 = vmax.f32 %v7189_v20, 0.0  ;;  %v1903_v32 = vadd.f32 %v5186_v8, %v1661_v13  ;;  %v7198_v13 = vmax.f32 %v7197_v39, 0.0  ;;  %v2731_v39 = vadd.f32 %v5462_v18, %v5655_v60 }
 0x552   :  { %v2091_v53 = vadd.f32 %v2090_v43, %v5262_v55  ;;  %v2719_v43 = vadd.f32 %v5462_v18, %v5577_v56 }
 0x553   :  { %v2557_v61 = vmax.f32 %v1903_v32, 0.0 }
 0x554   :  { %v2333_v0 = vadd.f32 %v2332_v34, %v2091_v53  ;;  %v5811_v34 = vpop.f32.mrf.mxu0 }
 0x555   :  { %v2954_v27 = vpop.f32.mrf.mxu1  ;;  %2807 = vmatmul.f32.gmra.mxu0 %v2553_v37  ;;  %v7191_v37 = vld [vmem:[#allocation185_spill] sm:$0xff] }
 0x556   :  { %v2522_v3 = vmax.f32 %v2333_v0, 0.0  ;;  %v2955_v52 = vadd.f32 %v2954_v27, %v2713_v11  ;;  %2140 = vmatmul.f32.gmra.mxu2 %v7183_v10  ;;  %2382 = vmatmul.f32.gmra.mxu3 %v7185_v15  ;;  %v1664_v8 = vadd.f32 %v7191_v37, %v4964_v2  ;;  %v7193_v27 = vmax.f32 %v7192_v16, 0.0  ;;  %v7204_v37 = vld [vmem:[#allocation191_spill] sm:$0xff] }
 0x558   :  { %3140 = vst.msk [vmem:[%s6331_s7 + $0xa0] sm:$0xff] %vm3119_vm0, %v2955_v52  ;;  %3001 = vmatmul.f32.gmra.mxu1 %v2522_v3  ;;  %v7194_v3 = vld [vmem:[#allocation186_spill] sm:$0xff]  ;;  %v1906_v7 = vadd.f32 %v5203_v63, %v1664_v8  ;;  %v7205_v8 = vmax.f32 %v7204_v37, 0.0 }
 0x559   :  { %v2093_v1 = vpop.f32.mrf.mxu2  ;;  %v2335_v17 = vpop.f32.mrf.mxu3  ;;  %v7195_v52 = vmax.f32 %v7194_v3, 0.0  ;;  %v2728_v3 = vadd.f32 %v5462_v18, %v5636_v12 }
 0x55a   :  { %v2094_v59 = vadd.f32 %v2093_v1, %v5262_v55  ;;  %v2559_v15 = vmax.f32 %v1906_v7, 0.0  ;;  %v7206_v7 = vld [vmem:[#allocation193_spill] sm:$0xff] }
 0x55c   :  { %v2336_v38 = vadd.f32 %v2335_v17, %v2094_v59  ;;  %v7196_v17 = vld [vmem:[#allocation188_spill] sm:$0xff]  ;;  %v5829_v63 = vpop.f32.mrf.mxu0 }
 0x55d   :  { %v2957_v41 = vpop.f32.mrf.mxu1  ;;  %2810 = vmatmul.f32.gmra.mxu0 %v2555_v47  ;;  %v1667_v59 = vadd.f32 %v7196_v17, %v4964_v2 }
 0x55e   :  { %v2524_v58 = vmax.f32 %v2336_v38, 0.0  ;;  %v2958_v21 = vadd.f32 %v2957_v41, %v2716_v25  ;;  %2143 = vmatmul.f32.gmra.mxu2 %v7188_v62  ;;  %2385 = vmatmul.f32.gmra.mxu3 %v7190_v45  ;;  %v7199_v41 = vld [vmem:[#allocation189_spill] sm:$0xff]  ;;  %v2725_v45 = vadd.f32 %v5462_v18, %v5616_v4 }
 0x560   :  { %3141 = vst.msk [vmem:[%s6331_s7 + $0xa8] sm:$0xff] %vm3119_vm0, %v2958_v21  ;;  %3004 = vmatmul.f32.gmra.mxu1 %v2524_v58  ;;  %v7200_v58 = vmax.f32 %v7199_v41, 0.0  ;;  %v1909_v21 = vadd.f32 %v5220_v35, %v1667_v59 }
 0x561   :  { %v2096_v54 = vpop.f32.mrf.mxu2  ;;  %v2338_v57 = vpop.f32.mrf.mxu3 }
 0x562   :  { %v2097_v44 = vadd.f32 %v2096_v54, %v5262_v55  ;;  %v2561_v20 = vmax.f32 %v1909_v21, 0.0  ;;  %v7201_v54 = vld [vmem:[#allocation190_spill] sm:$0xff]  ;;  %v7210_v21 = vld [vmem:[#allocation36_spill] sm:$0xff] }
 0x564   :  { %v2339_v53 = vadd.f32 %v2338_v57, %v2097_v44  ;;  %v1670_v57 = vadd.f32 %v7201_v54, %v4964_v2 }
 0x565   :  { %v2960_v11 = vpop.f32.mrf.mxu1  ;;  %2813 = vmatmul.f32.gmra.mxu0 %v2557_v61 }
 0x566   :  { %v2526_v0 = vmax.f32 %v2339_v53, 0.0  ;;  %v2961_v5 = vadd.f32 %v2960_v11, %v2719_v43  ;;  %2146 = vmatmul.f32.gmra.mxu2 %v7193_v27  ;;  %2388 = vmatmul.f32.gmra.mxu3 %v7195_v52  ;;  %v7202_v43 = vld [vmem:[#allocation32_spill] sm:$0xff]  ;;  %v1912_v11 = vadd.f32 %v5237_v36, %v1670_v57  ;;  %v1673_v36 = vadd.f32 %v7206_v7, %v4964_v2 }
 0x567   :  { %v7203_v53 = vmax.f32 %v7202_v43, 0.0 }
 0x568   :  { %3142 = vst.msk [vmem:[%s6331_s7 + $0xb0] sm:$0xff] %vm3119_vm0, %v2961_v5  ;;  %3007 = vmatmul.f32.gmra.mxu1 %v2526_v0  ;;  %v5850_v0 = vpop.f32.mrf.mxu0  ;;  %v2563_v27 = vmax.f32 %v1912_v11, 0.0  ;;  %v1915_v17 = vadd.f32 %v5254_v40, %v1673_v36  ;;  %v1676_v40 = vadd.f32 %v4987_v28, %v4964_v2  ;;  %v7218_v36 = vld [vmem:[#allocation35_spill] sm:$0xff] }
 0x569   :  { %v2099_v56 = vpop.f32.mrf.mxu2  ;;  %v2341_v10 = vpop.f32.mrf.mxu3 }
 0x56a   :  { %v2100_v6 = vadd.f32 %v2099_v56, %v5262_v55 }
 0x56c   :  { %v2342_v1 = vadd.f32 %v2341_v10, %v2100_v6 }
 0x56d   :  { %v2963_v47 = vpop.f32.mrf.mxu1  ;;  %2816 = vmatmul.f32.gmra.mxu0 %v2559_v15  ;;  %v7207_v15 = vld [vmem:[#allocation33_spill] sm:$0xff] }
 0x56e   :  { %v2528_v25 = vmax.f32 %v2342_v1, 0.0  ;;  %v2964_v38 = vadd.f32 %v2963_v47, %v2722_v51  ;;  %2149 = vmatmul.f32.gmra.mxu2 %v7198_v13  ;;  %2391 = vmatmul.f32.gmra.mxu3 %v7200_v58  ;;  %v7208_v51 = vmax.f32 %v7207_v15, 0.0  ;;  %v7209_v1 = vmax.f32 %v4970_v26, 0.0 }
 0x570   :  { %3143 = vst.msk [vmem:[%s6331_s7 + $0xb8] sm:$0xff] %vm3119_vm0, %v2964_v38  ;;  %3010 = vmatmul.f32.gmra.mxu1 %v2528_v25  ;;  %v5870_v47 = vpop.f32.mrf.mxu0  ;;  %v2565_v38 = vmax.f32 %v1915_v17, 0.0 }
 0x571   :  { %v2102_v50 = vpop.f32.mrf.mxu2  ;;  %v2344_v14 = vpop.f32.mrf.mxu3 }
 0x572   :  { %v2103_v62 = vadd.f32 %v2102_v50, %v5262_v55  ;;  %v7211_v50 = vmax.f32 %v7210_v21, 0.0 }
 0x574   :  { %v2345_v32 = vadd.f32 %v2344_v14, %v2103_v62  ;;  %v7212_v14 = vmax.f32 %v4989_v29, 0.0  ;;  %v1918_v62 = vadd.f32 %v5272_v33, %v1676_v40  ;;  %v1679_v33 = vadd.f32 %v5004_v31, %v4964_v2 }
 0x575   :  { %v2966_v44 = vpop.f32.mrf.mxu1  ;;  %2819 = vmatmul.f32.gmra.mxu0 %v2561_v20 }
 0x576   :  { %v2530_v35 = vmax.f32 %v2345_v32, 0.0  ;;  %v2967_v61 = vadd.f32 %v2966_v44, %v2725_v45  ;;  %2152 = vmatmul.f32.gmra.mxu2 %v7203_v53  ;;  %2394 = vmatmul.f32.gmra.mxu3 %v7205_v8  ;;  %v2567_v45 = vmax.f32 %v1918_v62, 0.0  ;;  %v2734_v32 = vadd.f32 %v5462_v18, %v5673_v48 }
 0x577   :  { %v7215_v53 = vmax.f32 %v5006_v19, 0.0  ;;  %v1921_v37 = vadd.f32 %v5284_v24, %v1679_v33  ;;  %v1682_v19 = vadd.f32 %v5021_v30, %v4964_v2 }
 0x578   :  { %3144 = vst.msk [vmem:[%s6331_s7 + $0xc0] sm:$0xff] %vm3119_vm0, %v2967_v61  ;;  %3013 = vmatmul.f32.gmra.mxu1 %v2530_v35  ;;  %v5889_v54 = vpop.f32.mrf.mxu0  ;;  %v7213_v61 = vld [vmem:[#allocation38_spill] sm:$0xff] }
 0x579   :  { %v2105_v4 = vpop.f32.mrf.mxu2  ;;  %v2347_v5 = vpop.f32.mrf.mxu3  ;;  %v7214_v43 = vmax.f32 %v7213_v61, 0.0  ;;  %v2569_v11 = vmax.f32 %v1921_v37, 0.0  ;;  %v7230_v61 = vld [vmem:[#allocation43_spill] sm:$0xff] }
 0x57a   :  { %v2106_v16 = vadd.f32 %v2105_v4, %v5262_v55  ;;  %v2737_v4 = vadd.f32 %v5462_v18, %v5694_v46 }
 0x57c   :  { %v2348_v52 = vadd.f32 %v2347_v5, %v2106_v16 }
 0x57d   :  { %v2969_v56 = vpop.f32.mrf.mxu1  ;;  %2822 = vmatmul.f32.gmra.mxu0 %v2563_v27 }
 0x57e   :  { %v2532_v10 = vmax.f32 %v2348_v52, 0.0  ;;  %v2970_v6 = vadd.f32 %v2969_v56, %v2728_v3  ;;  %2155 = vmatmul.f32.gmra.mxu2 %v7208_v51  ;;  %2397 = vmatmul.f32.gmra.mxu3 %v7209_v1  ;;  %v7216_v52 = vld [vmem:[#allocation40_spill] sm:$0xff]  ;;  %v7219_v56 = vmax.f32 %v7218_v36, 0.0  ;;  %v2740_v1 = vadd.f32 %v5462_v18, %v5714_v49 }
 0x57f   :  { %v7217_v7 = vmax.f32 %v7216_v52, 0.0 }
 0x580   :  { %3145 = vst.msk [vmem:[%s6331_s7 + $0xc8] sm:$0xff] %vm3119_vm0, %v2970_v6  ;;  %3016 = vmatmul.f32.gmra.mxu1 %v2532_v10  ;;  %v5907_v24 = vpop.f32.mrf.mxu0  ;;  %v7220_v10 = vld [vmem:[#allocation67_spill] sm:$0xff] }
 0x581   :  { %v2108_v12 = vpop.f32.mrf.mxu2  ;;  %v2350_v59 = vpop.f32.mrf.mxu3  ;;  %v1924_v6 = vadd.f32 %v7220_v10, %v1682_v19  ;;  %v7233_v19 = vld [vmem:[#allocation71_spill] sm:$0xff] }
 0x582   :  { %v2109_v25 = vadd.f32 %v2108_v12, %v5262_v55  ;;  %v7221_v12 = vld [vmem:[#allocation37_spill] sm:$0xff] }
 0x583   :  { %v2571_v51 = vmax.f32 %v1924_v6, 0.0  ;;  %v7238_v6 = vld [vmem:[#allocation84_spill] sm:$0xff] }
 0x584   :  { %v2351_v26 = vadd.f32 %v2350_v59, %v2109_v25  ;;  %v1685_v59 = vadd.f32 %v7221_v12, %v4964_v2 }
 0x585   :  { %v2972_v13 = vpop.f32.mrf.mxu1  ;;  %2825 = vmatmul.f32.gmra.mxu0 %v2565_v38 }
 0x586   :  { %v2534_v41 = vmax.f32 %v2351_v26, 0.0  ;;  %v2973_v58 = vadd.f32 %v2972_v13, %v2731_v39  ;;  %2158 = vmatmul.f32.gmra.mxu2 %v7211_v50  ;;  %2400 = vmatmul.f32.gmra.mxu3 %v7212_v14  ;;  %v7222_v26 = vld [vmem:[#allocation42_spill] sm:$0xff]  ;;  %v7224_v13 = vld [vmem:[#allocation39_spill] sm:$0xff] }
 0x587   :  { %v7223_v40 = vmax.f32 %v7222_v26, 0.0 }
 0x588   :  { %3146 = vst.msk [vmem:[%s6331_s7 + $0xd0] sm:$0xff] %vm3119_vm0, %v2973_v58  ;;  %3019 = vmatmul.f32.gmra.mxu1 %v2534_v41  ;;  %v7225_v41 = vmax.f32 %v7224_v13, 0.0  ;;  %v7226_v58 = vld [vmem:[#allocation82_spill] sm:$0xff]  ;;  %v5928_v50 = vpop.f32.mrf.mxu0 }
 0x589   :  { %v2111_v60 = vpop.f32.mrf.mxu2  ;;  %v2353_v28 = vpop.f32.mrf.mxu3  ;;  %v1927_v21 = vadd.f32 %v7226_v58, %v1685_v59  ;;  %v7239_v59 = vld [vmem:[#allocation72_spill] sm:$0xff] }
 0x58a   :  { %v2112_v20 = vadd.f32 %v2111_v60, %v5262_v55  ;;  %v5938_v60 = vld [vmem:[%s6330_s6] ss:$0 sm:$0xff] }
 0x58b   :  { %v2573_v62 = vmax.f32 %v1927_v21, 0.0  ;;  %v7244_v21 = vld [vmem:[#allocation68_spill] sm:$0xff] }
 0x58c   :  { %v2354_v29 = vadd.f32 %v2353_v28, %v2112_v20  ;;  %v2743_v28 = vadd.f32 %v5938_v60, %v5733_v42 }
 0x58d   :  { %v2975_v57 = vpop.f32.mrf.mxu1  ;;  %2828 = vmatmul.f32.gmra.mxu0 %v2567_v45  ;;  %v7227_v45 = vld [vmem:[#allocation41_spill] sm:$0xff] }
 0x58e   :  { %v2536_v44 = vmax.f32 %v2354_v29, 0.0  ;;  %v2976_v35 = vadd.f32 %v2975_v57, %v2734_v32  ;;  %2161 = vmatmul.f32.gmra.mxu2 %v7214_v43  ;;  %2403 = vmatmul.f32.gmra.mxu3 %v7215_v53  ;;  %v1688_v32 = vadd.f32 %v7227_v45, %v4964_v2  ;;  %v7231_v43 = vmax.f32 %v7230_v61, 0.0  ;;  %v7232_v53 = vld [vmem:[#allocation120_spill] sm:$0xff]  ;;  %v7245_v45 = vld [vmem:[#allocation47_spill] sm:$0xff] }
 0x590   :  { %3147 = vst.msk [vmem:[%s6331_s7 + $0xd8] sm:$0xff] %vm3119_vm0, %v2976_v35  ;;  %3022 = vmatmul.f32.gmra.mxu1 %v2536_v44  ;;  %v7228_v44 = vld [vmem:[#allocation44_spill] sm:$0xff]  ;;  %v1930_v37 = vadd.f32 %v7232_v53, %v1688_v32  ;;  %v1697_v32 = vadd.f32 %v7245_v45, %v4964_v2  ;;  %v7263_v45 = vld [vmem:[#allocation55_spill] sm:$0xff] }
 0x591   :  { %v2114_v48 = vpop.f32.mrf.mxu2  ;;  %v2356_v31 = vpop.f32.mrf.mxu3  ;;  %v7229_v35 = vmax.f32 %v7228_v44, 0.0 }
 0x592   :  { %v2115_v8 = vadd.f32 %v2114_v48, %v5262_v55 }
 0x594   :  { %v2357_v5 = vadd.f32 %v2356_v31, %v2115_v8  ;;  %v5953_v31 = vpop.f32.mrf.mxu0 }
 0x595   :  { %v2978_v16 = vpop.f32.mrf.mxu1  ;;  %2831 = vmatmul.f32.gmra.mxu0 %v2569_v11  ;;  %v2575_v11 = vmax.f32 %v1930_v37, 0.0  ;;  %v7250_v37 = vld [vmem:[#allocation85_spill] sm:$0xff] }
 0x596   :  { %v2538_v27 = vmax.f32 %v2357_v5, 0.0  ;;  %v2979_v3 = vadd.f32 %v2978_v16, %v2737_v4  ;;  %2164 = vmatmul.f32.gmra.mxu2 %v7217_v7  ;;  %2406 = vmatmul.f32.gmra.mxu3 %v7219_v56  ;;  %v2746_v4 = vadd.f32 %v5938_v60, %v5751_v9  ;;  %v1691_v16 = vadd.f32 %v7233_v19, %v4964_v2  ;;  %v7234_v7 = vld [vmem:[#allocation46_spill] sm:$0xff]  ;;  %v7236_v56 = vld [vmem:[#allocation45_spill] sm:$0xff]  ;;  %v7251_v19 = vld [vmem:[#allocation51_spill] sm:$0xff] }
 0x597   :  { %v7235_v36 = vmax.f32 %v7234_v7, 0.0  ;;  %v7237_v10 = vmax.f32 %v7236_v56, 0.0  ;;  %v7252_v7 = vld [vmem:[#allocation52_spill] sm:$0xff]  ;;  %v7254_v56 = vld [vmem:[#allocation195_spill] sm:$0xff] }
 0x598   :  { %3148 = vst.msk [vmem:[%s6331_s7 + $0xe0] sm:$0xff] %vm3119_vm0, %v2979_v3  ;;  %3025 = vmatmul.f32.gmra.mxu1 %v2538_v27 }
 0x599   :  { %v2117_v30 = vpop.f32.mrf.mxu2  ;;  %v2359_v46 = vpop.f32.mrf.mxu3 }
 0x59a   :  { %v2118_v15 = vadd.f32 %v2117_v30, %v5262_v55  ;;  %v1933_v30 = vadd.f32 %v7238_v6, %v1691_v16  ;;  %v1700_v16 = vadd.f32 %v7251_v19, %v4964_v2  ;;  %v7256_v6 = vld [vmem:[#allocation123_spill] sm:$0xff]  ;;  %v7269_v19 = vld [vmem:[#allocation57_spill] sm:$0xff] }
 0x59c   :  { %v2360_v17 = vadd.f32 %v2359_v46, %v2118_v15 }
 0x59d   :  { %v2981_v25 = vpop.f32.mrf.mxu1  ;;  %2834 = vmatmul.f32.gmra.mxu0 %v2571_v51  ;;  %v2577_v51 = vmax.f32 %v1933_v30, 0.0  ;;  %v1942_v30 = vadd.f32 %v7256_v6, %v1700_v16  ;;  %v1709_v16 = vadd.f32 %v7269_v19, %v4964_v2  ;;  %v7274_v6 = vld [vmem:[#allocation88_spill] sm:$0xff] }
 0x59e   :  { %v2540_v38 = vmax.f32 %v2360_v17, 0.0  ;;  %v2982_v39 = vadd.f32 %v2981_v25, %v2740_v1  ;;  %2167 = vmatmul.f32.gmra.mxu2 %v7223_v40  ;;  %2409 = vmatmul.f32.gmra.mxu3 %v7225_v41  ;;  %v2749_v1 = vadd.f32 %v5938_v60, %v5772_v23  ;;  %v5972_v17 = vpop.f32.mrf.mxu0  ;;  %v1694_v25 = vadd.f32 %v7239_v59, %v4964_v2  ;;  %v7240_v40 = vld [vmem:[#allocation48_spill] sm:$0xff]  ;;  %v7242_v41 = vld [vmem:[#allocation73_spill] sm:$0xff] }
 0x59f   :  { %v7241_v13 = vmax.f32 %v7240_v40, 0.0  ;;  %v7243_v58 = vmax.f32 %v7242_v41, 0.0  ;;  %v7257_v59 = vld [vmem:[#allocation53_spill] sm:$0xff]  ;;  %v7258_v40 = vld [vmem:[#allocation54_spill] sm:$0xff]  ;;  %v7260_v41 = vld [vmem:[#allocation196_spill] sm:$0xff] }
 0x5a0   :  { %3149 = vst.msk [vmem:[%s6331_s7 + $0xe8] sm:$0xff] %vm3119_vm0, %v2982_v39  ;;  %3028 = vmatmul.f32.gmra.mxu1 %v2540_v38 }
 0x5a1   :  { %v2120_v18 = vpop.f32.mrf.mxu2  ;;  %v2362_v49 = vpop.f32.mrf.mxu3 }
 0x5a2   :  { %v2121_v14 = vadd.f32 %v2120_v18, %v5262_v55  ;;  %v1936_v18 = vadd.f32 %v7244_v21, %v1694_v25  ;;  %v1703_v25 = vadd.f32 %v7257_v59, %v4964_v2  ;;  %v7262_v21 = vld [vmem:[#allocation87_spill] sm:$0xff] }
 0x5a4   :  { %v2363_v20 = vadd.f32 %v2362_v49, %v2121_v14 }
 0x5a5   :  { %v2984_v29 = vpop.f32.mrf.mxu1  ;;  %2837 = vmatmul.f32.gmra.mxu0 %v2573_v62  ;;  %v2579_v62 = vmax.f32 %v1936_v18, 0.0  ;;  %v1945_v18 = vadd.f32 %v7262_v21, %v1703_v25  ;;  %v7280_v21 = vld [vmem:[#allocation126_spill] sm:$0xff] }
 0x5a6   :  { %v2542_v33 = vmax.f32 %v2363_v20, 0.0  ;;  %v2985_v57 = vadd.f32 %v2984_v29, %v2743_v28  ;;  %2170 = vmatmul.f32.gmra.mxu2 %v7229_v35  ;;  %2412 = vmatmul.f32.gmra.mxu3 %v7231_v43  ;;  %v2752_v28 = vadd.f32 %v5938_v60, %v5792_v22  ;;  %v7246_v35 = vld [vmem:[#allocation50_spill] sm:$0xff]  ;;  %v7248_v43 = vld [vmem:[#allocation49_spill] sm:$0xff] }
 0x5a7   :  { %v7247_v61 = vmax.f32 %v7246_v35, 0.0  ;;  %v7249_v53 = vmax.f32 %v7248_v43, 0.0  ;;  %v7264_v35 = vld [vmem:[#allocation56_spill] sm:$0xff]  ;;  %v7266_v43 = vld [vmem:[#allocation197_spill] sm:$0xff] }
 0x5a8   :  { %3150 = vst.msk [vmem:[%s6331_s7 + $0xf0] sm:$0xff] %vm3119_vm0, %v2985_v57  ;;  %3031 = vmatmul.f32.gmra.mxu1 %v2542_v33  ;;  %v5990_v33 = vpop.f32.mrf.mxu0 }
 0x5a9   :  { %v2123_v42 = vpop.f32.mrf.mxu2  ;;  %v2365_v48 = vpop.f32.mrf.mxu3 }
 0x5aa   :  { %v2124_v8 = vadd.f32 %v2123_v42, %v5262_v55  ;;  %v1939_v42 = vadd.f32 %v7250_v37, %v1697_v32  ;;  %v1706_v32 = vadd.f32 %v7263_v45, %v4964_v2  ;;  %v7268_v37 = vld [vmem:[#allocation69_spill] sm:$0xff] }
 0x5ac   :  { %v2366_v5 = vadd.f32 %v2365_v48, %v2124_v8 }
 0x5ad   :  { %v2987_v27 = vpop.f32.mrf.mxu1  ;;  %2840 = vmatmul.f32.gmra.mxu0 %v2575_v11  ;;  %v2581_v11 = vmax.f32 %v1939_v42, 0.0  ;;  %v1948_v42 = vadd.f32 %v7268_v37, %v1706_v32 }
 0x5ae   :  { %v2544_v3 = vmax.f32 %v2366_v5, 0.0  ;;  %v2988_v52 = vadd.f32 %v2987_v27, %v2746_v4  ;;  %2173 = vmatmul.f32.gmra.mxu2 %v7235_v36  ;;  %2415 = vmatmul.f32.gmra.mxu3 %v7237_v10  ;;  %v2755_v4 = vadd.f32 %v5938_v60, %v5811_v34  ;;  %v7253_v36 = vmax.f32 %v7252_v7, 0.0  ;;  %v7270_v7 = vld [vmem:[#allocation58_spill] sm:$0xff] }
 0x5af   :  { %v7255_v10 = vmax.f32 %v7254_v56, 0.0  ;;  %v7272_v56 = vld [vmem:[#allocation198_spill] sm:$0xff] }
 0x5b0   :  { %3151 = vst.msk [vmem:[%s6331_s7 + $0xf8] sm:$0xff] %vm3119_vm0, %v2988_v52  ;;  %3034 = vmatmul.f32.gmra.mxu1 %v2544_v3 }
 0x5b1   :  { %v2126_v9 = vpop.f32.mrf.mxu2  ;;  %v2368_v46 = vpop.f32.mrf.mxu3 }
 0x5b2   :  { %v2127_v15 = vadd.f32 %v2126_v9, %v5262_v55  ;;  %v6011_v9 = vpop.f32.mrf.mxu0 }
 0x5b4   :  { %v2369_v12 = vadd.f32 %v2368_v46, %v2127_v15 }
 0x5b5   :  { %v2990_v38 = vpop.f32.mrf.mxu1  ;;  %2843 = vmatmul.f32.gmra.mxu0 %v2577_v51  ;;  %v2583_v51 = vmax.f32 %v1942_v30, 0.0  ;;  %v1951_v30 = vadd.f32 %v7274_v6, %v1709_v16 }
 0x5b6   :  { %v2546_v39 = vmax.f32 %v2369_v12, 0.0  ;;  %v2991_v26 = vadd.f32 %v2990_v38, %v2749_v1  ;;  %2176 = vmatmul.f32.gmra.mxu2 %v7241_v13  ;;  %2418 = vmatmul.f32.gmra.mxu3 %v7243_v58  ;;  %v2758_v1 = vadd.f32 %v5938_v60, %v5829_v63  ;;  %v7259_v13 = vmax.f32 %v7258_v40, 0.0  ;;  %v7276_v40 = vld [vmem:[#allocation60_spill] sm:$0xff] }
 0x5b7   :  { %v7261_v58 = vmax.f32 %v7260_v41, 0.0  ;;  %v7278_v41 = vld [vmem:[#allocation199_spill] sm:$0xff] }
 0x5b8   :  { %3152 = vst.msk [vmem:[%s6331_s7 + $0x100] sm:$0xff] %vm3119_vm0, %v2991_v26  ;;  %3037 = vmatmul.f32.gmra.mxu1 %v2546_v39 }
 0x5b9   :  { %v2129_v23 = vpop.f32.mrf.mxu2  ;;  %v2371_v49 = vpop.f32.mrf.mxu3 }
 0x5ba   :  { %v2130_v14 = vadd.f32 %v2129_v23, %v5262_v55 }
 0x5bc   :  { %v2372_v20 = vadd.f32 %v2371_v49, %v2130_v14  ;;  %v6031_v49 = vpop.f32.mrf.mxu0 }
 0x5bd   :  { %v2993_v29 = vpop.f32.mrf.mxu1  ;;  %2846 = vmatmul.f32.gmra.mxu0 %v2579_v62  ;;  %v2585_v62 = vmax.f32 %v1945_v18, 0.0 }
 0x5be   :  { %v2548_v57 = vmax.f32 %v2372_v20, 0.0  ;;  %v2994_v44 = vadd.f32 %v2993_v29, %v2752_v28  ;;  %2179 = vmatmul.f32.gmra.mxu2 %v7247_v61  ;;  %2421 = vmatmul.f32.gmra.mxu3 %v7249_v53  ;;  %v2761_v28 = vadd.f32 %v5938_v60, %v5850_v0  ;;  %v7265_v61 = vmax.f32 %v7264_v35, 0.0 }
 0x5bf   :  { %v7267_v53 = vmax.f32 %v7266_v43, 0.0 }
 0x5c0   :  { %3153 = vst.msk [vmem:[%s6331_s7 + $0x108] sm:$0xff] %vm3119_vm0, %v2994_v44  ;;  %3040 = vmatmul.f32.gmra.mxu1 %v2548_v57 }
 0x5c1   :  { %v2132_v22 = vpop.f32.mrf.mxu2  ;;  %v2374_v48 = vpop.f32.mrf.mxu3 }
 0x5c2   :  { %v2133_v8 = vadd.f32 %v2132_v22, %v5262_v55 }
 0x5c4   :  { %v2375_v5 = vadd.f32 %v2374_v48, %v2133_v8  ;;  %v2587_v8 = vmax.f32 %v1948_v42, 0.0 }
 0x5c5   :  { %v2996_v27 = vpop.f32.mrf.mxu1  ;;  %2849 = vmatmul.f32.gmra.mxu0 %v2581_v11  ;;  %v2764_v11 = vadd.f32 %v5938_v60, %v5870_v47 }
 0x5c6   :  { %v2550_v3 = vmax.f32 %v2375_v5, 0.0  ;;  %v2997_v52 = vadd.f32 %v2996_v27, %v2755_v4  ;;  %2182 = vmatmul.f32.gmra.mxu2 %v7253_v36  ;;  %2424 = vmatmul.f32.gmra.mxu3 %v7255_v10  ;;  %v6050_v4 = vpop.f32.mrf.mxu0  ;;  %v7271_v36 = vmax.f32 %v7270_v7, 0.0  ;;  %v7273_v10 = vmax.f32 %v7272_v56, 0.0 }
 0x5c8   :  { %3154 = vst.msk [vmem:[%s6331_s7 + $0x110] sm:$0xff] %vm3119_vm0, %v2997_v52  ;;  %3043 = vmatmul.f32.gmra.mxu1 %v2550_v3 }
 0x5c9   :  { %v2135_v34 = vpop.f32.mrf.mxu2  ;;  %v2377_v46 = vpop.f32.mrf.mxu3 }
 0x5ca   :  { %v2136_v15 = vadd.f32 %v2135_v34, %v5262_v55 }
 0x5cc   :  { %v2378_v12 = vadd.f32 %v2377_v46, %v2136_v15  ;;  %v2589_v15 = vmax.f32 %v1951_v30, 0.0 }
 0x5cd   :  { %v2999_v38 = vpop.f32.mrf.mxu1  ;;  %2852 = vmatmul.f32.gmra.mxu0 %v2583_v51  ;;  %v2767_v51 = vadd.f32 %v5938_v60, %v5889_v54 }
 0x5ce   :  { %v2552_v39 = vmax.f32 %v2378_v12, 0.0  ;;  %v3000_v26 = vadd.f32 %v2999_v38, %v2758_v1  ;;  %2185 = vmatmul.f32.gmra.mxu2 %v7259_v13  ;;  %2427 = vmatmul.f32.gmra.mxu3 %v7261_v58  ;;  %v7275_v12 = vld [vmem:[#allocation59_spill] sm:$0xff]  ;;  %v6068_v38 = vpop.f32.mrf.mxu0  ;;  %v7277_v13 = vmax.f32 %v7276_v40, 0.0  ;;  %v7279_v58 = vmax.f32 %v7278_v41, 0.0 }
 0x5cf   :  { %v1712_v59 = vadd.f32 %v7275_v12, %v4964_v2 }
 0x5d0   :  { %3155 = vst.msk [vmem:[%s6331_s7 + $0x118] sm:$0xff] %vm3119_vm0, %v3000_v26  ;;  %3046 = vmatmul.f32.gmra.mxu1 %v2552_v39 }
 0x5d1   :  { %v2138_v63 = vpop.f32.mrf.mxu2  ;;  %v2380_v23 = vpop.f32.mrf.mxu3  ;;  %v1954_v18 = vadd.f32 %v7280_v21, %v1712_v59 }
 0x5d2   :  { %v2139_v14 = vadd.f32 %v2138_v63, %v5262_v55 }
 0x5d4   :  { %v2381_v20 = vadd.f32 %v2380_v23, %v2139_v14  ;;  %v2591_v14 = vmax.f32 %v1954_v18, 0.0 }
 0x5d5   :  { %v3002_v29 = vpop.f32.mrf.mxu1  ;;  %2855 = vmatmul.f32.gmra.mxu0 %v2585_v62  ;;  %v2770_v62 = vadd.f32 %v5938_v60, %v5907_v24 }
 0x5d6   :  { %v2554_v57 = vmax.f32 %v2381_v20, 0.0  ;;  %v3003_v44 = vadd.f32 %v3002_v29, %v2761_v28  ;;  %2188 = vmatmul.f32.gmra.mxu2 %v7265_v61  ;;  %2430 = vmatmul.f32.gmra.mxu3 %v7267_v53  ;;  %v7281_v20 = vld [vmem:[#allocation61_spill] sm:$0xff]  ;;  %v7284_v61 = vld [vmem:[#allocation200_spill] sm:$0xff]  ;;  %v7286_v53 = vld [vmem:[#allocation90_spill] sm:$0xff]  ;;  %v6089_v42 = vpop.f32.mrf.mxu0 }
 0x5d7   :  { %v1715_v45 = vadd.f32 %v7281_v20, %v4964_v2  ;;  %v7285_v43 = vmax.f32 %v7284_v61, 0.0 }
 0x5d8   :  { %3156 = vst.msk [vmem:[%s6331_s7 + $0x120] sm:$0xff] %vm3119_vm0, %v3003_v44  ;;  %3049 = vmatmul.f32.gmra.mxu1 %v2554_v57  ;;  %v7282_v44 = vld [vmem:[#allocation62_spill] sm:$0xff] }
 0x5d9   :  { %v2141_v0 = vpop.f32.mrf.mxu2  ;;  %v2383_v22 = vpop.f32.mrf.mxu3  ;;  %v7283_v35 = vmax.f32 %v7282_v44, 0.0  ;;  %v1957_v37 = vadd.f32 %v7286_v53, %v1715_v45 }
 0x5da   :  { %v2142_v48 = vadd.f32 %v2141_v0, %v5262_v55 }
 0x5dc   :  { %v2384_v5 = vadd.f32 %v2383_v22, %v2142_v48  ;;  %v2593_v48 = vmax.f32 %v1957_v37, 0.0 }
 0x5dd   :  { %v3005_v27 = vpop.f32.mrf.mxu1  ;;  %2858 = vmatmul.f32.gmra.mxu0 %v2587_v8  ;;  %v2773_v8 = vadd.f32 %v5938_v60, %v5928_v50 }
 0x5de   :  { %v2556_v3 = vmax.f32 %v2384_v5, 0.0  ;;  %v3006_v52 = vadd.f32 %v3005_v27, %v2764_v11  ;;  %2191 = vmatmul.f32.gmra.mxu2 %v7271_v36  ;;  %2433 = vmatmul.f32.gmra.mxu3 %v7273_v10  ;;  %v7287_v5 = vld [vmem:[#allocation63_spill] sm:$0xff]  ;;  %v7290_v36 = vld [vmem:[#allocation201_spill] sm:$0xff]  ;;  %v7292_v10 = vld [vmem:[#allocation70_spill] sm:$0xff] }
 0x5df   :  { %v1718_v19 = vadd.f32 %v7287_v5, %v4964_v2  ;;  %v7291_v56 = vmax.f32 %v7290_v36, 0.0 }
 0x5e0   :  { %3157 = vst.msk [vmem:[%s6331_s7 + $0x128] sm:$0xff] %vm3119_vm0, %v3006_v52  ;;  %3052 = vmatmul.f32.gmra.mxu1 %v2556_v3  ;;  %v7288_v52 = vld [vmem:[#allocation64_spill] sm:$0xff] }
 0x5e1   :  { %v2144_v47 = vpop.f32.mrf.mxu2  ;;  %v2386_v34 = vpop.f32.mrf.mxu3  ;;  %v7289_v7 = vmax.f32 %v7288_v52, 0.0  ;;  %v1960_v6 = vadd.f32 %v7292_v10, %v1718_v19  ;;  %v2791_v10 = vadd.f32 %v5938_v60, %v6050_v4 }
 0x5e2   :  { %v2145_v46 = vadd.f32 %v2144_v47, %v5262_v55 }
 0x5e4   :  { %v2387_v1 = vadd.f32 %v2386_v34, %v2145_v46  ;;  %v2595_v34 = vmax.f32 %v1960_v6, 0.0  ;;  %v6110_v46 = vpop.f32.mrf.mxu0 }
 0x5e5   :  { %v3008_v25 = vpop.f32.mrf.mxu1  ;;  %2861 = vmatmul.f32.gmra.mxu0 %v2589_v15  ;;  %v2776_v15 = vadd.f32 %v5938_v60, %v5953_v31 }
 0x5e6   :  { %v2558_v39 = vmax.f32 %v2387_v1, 0.0  ;;  %v3009_v26 = vadd.f32 %v3008_v25, %v2767_v51  ;;  %2194 = vmatmul.f32.gmra.mxu2 %v7277_v13  ;;  %2436 = vmatmul.f32.gmra.mxu3 %v7279_v58  ;;  %v7293_v1 = vld [vmem:[#allocation65_spill] sm:$0xff]  ;;  %v7296_v13 = vld [vmem:[#allocation202_spill] sm:$0xff]  ;;  %v7298_v58 = vld [vmem:[#allocation91_spill] sm:$0xff] }
 0x5e7   :  { %v1721_v12 = vadd.f32 %v7293_v1, %v4964_v2  ;;  %v7297_v41 = vmax.f32 %v7296_v13, 0.0  ;;  %v2794_v1 = vadd.f32 %v5938_v60, %v6068_v38 }
 0x5e8   :  { %3158 = vst.msk [vmem:[%s6331_s7 + $0x130] sm:$0xff] %vm3119_vm0, %v3009_v26  ;;  %3055 = vmatmul.f32.gmra.mxu1 %v2558_v39  ;;  %v7294_v26 = vld [vmem:[#allocation66_spill] sm:$0xff] }
 0x5e9   :  { %v2147_v54 = vpop.f32.mrf.mxu2  ;;  %v2389_v63 = vpop.f32.mrf.mxu3  ;;  %v7295_v40 = vmax.f32 %v7294_v26, 0.0  ;;  %v1963_v21 = vadd.f32 %v7298_v58, %v1721_v12 }
 0x5ea   :  { %v2148_v23 = vadd.f32 %v2147_v54, %v5262_v55 }
 0x5eb   :  { %v2597_v54 = vmax.f32 %v1963_v21, 0.0 }
 0x5ec   :  { %v2390_v28 = vadd.f32 %v2389_v63, %v2148_v23  ;;  %v2779_v63 = vadd.f32 %v5938_v60, %v5972_v17  ;;  %v2782_v17 = vadd.f32 %v5938_v60, %v5990_v33 }
 0x5ed   :  { %v3011_v32 = vpop.f32.mrf.mxu1  ;;  %2864 = vmatmul.f32.gmra.mxu0 %v2591_v14  ;;  %v6128_v14 = vpop.f32.mrf.mxu0 }
 0x5ee   :  { %v2560_v29 = vmax.f32 %v2390_v28, 0.0  ;;  %v3012_v57 = vadd.f32 %v3011_v32, %v2770_v62  ;;  %2197 = vmatmul.f32.gmra.mxu2 %v7283_v35  ;;  %2439 = vmatmul.f32.gmra.mxu3 %v7285_v43 }
 0x5f0   :  { %3159 = vst.msk [vmem:[%s6331_s7 + $0x138] sm:$0xff] %vm3119_vm0, %v3012_v57  ;;  %3058 = vmatmul.f32.gmra.mxu1 %v2560_v29 }
 0x5f1   :  { %v2150_v24 = vpop.f32.mrf.mxu2  ;;  %v2392_v0 = vpop.f32.mrf.mxu3 }
 0x5f2   :  { %v2151_v22 = vadd.f32 %v2150_v24, %v5262_v55  ;;  %v2785_v24 = vadd.f32 %v5938_v60, %v6011_v9 }
 0x5f4   :  { %v2393_v11 = vadd.f32 %v2392_v0, %v2151_v22 }
 0x5f5   :  { %v3014_v16 = vpop.f32.mrf.mxu1  ;;  %2867 = vmatmul.f32.gmra.mxu0 %v2593_v48  ;;  %v6148_v5 = vpop.f32.mrf.mxu0 }
 0x5f6   :  { %v2562_v27 = vmax.f32 %v2393_v11, 0.0  ;;  %v3015_v3 = vadd.f32 %v3014_v16, %v2773_v8  ;;  %2200 = vmatmul.f32.gmra.mxu2 %v7289_v7  ;;  %2442 = vmatmul.f32.gmra.mxu3 %v7291_v56  ;;  %v2788_v16 = vadd.f32 %v5938_v60, %v6031_v49 }
 0x5f8   :  { %3160 = vst.msk [vmem:[%s6331_s7 + $0x140] sm:$0xff] %vm3119_vm0, %v3015_v3  ;;  %3061 = vmatmul.f32.gmra.mxu1 %v2562_v27 }
 0x5f9   :  { %v2153_v50 = vpop.f32.mrf.mxu2  ;;  %v2395_v30 = vpop.f32.mrf.mxu3 }
 0x5fa   :  { %v2154_v47 = vadd.f32 %v2153_v50, %v5262_v55 }
 0x5fc   :  { %v2396_v51 = vadd.f32 %v2395_v30, %v2154_v47 }
 0x5fd   :  { %v3017_v59 = vpop.f32.mrf.mxu1  ;;  %2870 = vmatmul.f32.gmra.mxu0 %v2595_v34  ;;  %v6160_v6 = vpop.f32.mrf.mxu0 }
 0x5fe   :  { %v2564_v25 = vmax.f32 %v2396_v51, 0.0  ;;  %v3018_v39 = vadd.f32 %v3017_v59, %v2776_v15  ;;  %2203 = vmatmul.f32.gmra.mxu2 %v7295_v40  ;;  %2445 = vmatmul.f32.gmra.mxu3 %v7297_v41  ;;  %v2797_v41 = vadd.f32 %v5938_v60, %v6089_v42 }
 0x600   :  { %3161 = vst.msk [vmem:[%s6331_s7 + $0x148] sm:$0xff] %vm3119_vm0, %v3018_v39  ;;  %3064 = vmatmul.f32.gmra.mxu1 %v2564_v25 }
 0x601   :  { %v2156_v31 = vpop.f32.mrf.mxu2  ;;  %v2398_v2 = vpop.f32.mrf.mxu3 }
 0x602   :  { %v2157_v18 = vadd.f32 %v2156_v31, %v5262_v55 }
 0x604   :  { %v2399_v23 = vadd.f32 %v2398_v2, %v2157_v18 }
 0x605   :  { %v3020_v62 = vpop.f32.mrf.mxu1  ;;  %2873 = vmatmul.f32.gmra.mxu0 %v2597_v54  ;;  %v2811_v59 = vpop.f32.mrf.mxu0 }
 0x606   :  { %v2566_v28 = vmax.f32 %v2399_v23, 0.0  ;;  %v3021_v20 = vadd.f32 %v3020_v62, %v2779_v63  ;;  %v2800_v23 = vadd.f32 %v5938_v60, %v6110_v46 }
 0x608   :  { %3162 = vst.msk [vmem:[%s6331_s7 + $0x150] sm:$0xff] %vm3119_vm0, %v3021_v20  ;;  %3067 = vmatmul.f32.gmra.mxu1 %v2566_v28 }
 0x609   :  { %v2159_v45 = vpop.f32.mrf.mxu2  ;;  %v2401_v32 = vpop.f32.mrf.mxu3 }
 0x60a   :  { %v2160_v29 = vadd.f32 %v2159_v45, %v5262_v55 }
 0x60c   :  { %v2402_v57 = vadd.f32 %v2401_v32, %v2160_v29 }
 0x60d   :  { %v3023_v44 = vpop.f32.mrf.mxu1  ;;  %v2814_v2 = vpop.f32.mrf.mxu0 }
 0x60e   :  { %v2568_v35 = vmax.f32 %v2402_v57, 0.0  ;;  %v3024_v61 = vadd.f32 %v3023_v44, %v2782_v17  ;;  %v2803_v57 = vadd.f32 %v5938_v60, %v6128_v14 }
 0x610   :  { %3163 = vst.msk [vmem:[%s6331_s7 + $0x158] sm:$0xff] %vm3119_vm0, %v3024_v61  ;;  %3070 = vmatmul.f32.gmra.mxu1 %v2568_v35 }
 0x611   :  { %v2162_v43 = vpop.f32.mrf.mxu2  ;;  %v2404_v53 = vpop.f32.mrf.mxu3 }
 0x612   :  { %v2163_v37 = vadd.f32 %v2162_v43, %v5262_v55 }
 0x614   :  { %v2405_v0 = vadd.f32 %v2404_v53, %v2163_v37 }
 0x615   :  { %v3026_v22 = vpop.f32.mrf.mxu1  ;;  %v2817_v29 = vpop.f32.mrf.mxu0 }
 0x616   :  { %v2570_v33 = vmax.f32 %v2405_v0, 0.0  ;;  %v3027_v48 = vadd.f32 %v3026_v22, %v2785_v24  ;;  %v2806_v24 = vadd.f32 %v5938_v60, %v6148_v5 }
 0x618   :  { %3164 = vst.msk [vmem:[%s6331_s7 + $0x160] sm:$0xff] %vm3119_vm0, %v3027_v48  ;;  %3073 = vmatmul.f32.gmra.mxu1 %v2570_v33 }
 0x619   :  { %v2165_v8 = vpop.f32.mrf.mxu2  ;;  %v2407_v11 = vpop.f32.mrf.mxu3 }
 0x61a   :  { %v2166_v19 = vadd.f32 %v2165_v8, %v5262_v55 }
 0x61c   :  { %v2408_v9 = vadd.f32 %v2407_v11, %v2166_v19 }
 0x61d   :  { %v3029_v27 = vpop.f32.mrf.mxu1  ;;  %v2820_v0 = vpop.f32.mrf.mxu0 }
 0x61e   :  { %v2572_v3 = vmax.f32 %v2408_v9, 0.0  ;;  %v3030_v52 = vadd.f32 %v3029_v27, %v2788_v16  ;;  %v2809_v16 = vadd.f32 %v5938_v60, %v6160_v6 }
 0x620   :  { %3165 = vst.msk [vmem:[%s6331_s7 + $0x168] sm:$0xff] %vm3119_vm0, %v3030_v52  ;;  %3076 = vmatmul.f32.gmra.mxu1 %v2572_v3 }
 0x621   :  { %v2168_v7 = vpop.f32.mrf.mxu2  ;;  %v2410_v36 = vpop.f32.mrf.mxu3 }
 0x622   :  { %v2169_v56 = vadd.f32 %v2168_v7, %v5262_v55 }
 0x624   :  { %v2411_v49 = vadd.f32 %v2410_v36, %v2169_v56 }
 0x625   :  { %v3032_v50 = vpop.f32.mrf.mxu1  ;;  %v2823_v27 = vpop.f32.mrf.mxu0 }
 0x626   :  { %v2574_v30 = vmax.f32 %v2411_v49, 0.0  ;;  %v3033_v47 = vadd.f32 %v3032_v50, %v2791_v10  ;;  %v2812_v10 = vadd.f32 %v5938_v60, %v2811_v59 }
 0x628   :  { %3166 = vst.msk [vmem:[%s6331_s7 + $0x170] sm:$0xff] %vm3119_vm0, %v3033_v47  ;;  %3079 = vmatmul.f32.gmra.mxu1 %v2574_v30 }
 0x629   :  { %v2171_v34 = vpop.f32.mrf.mxu2  ;;  %v2413_v15 = vpop.f32.mrf.mxu3 }
 0x62a   :  { %v2172_v51 = vadd.f32 %v2171_v34, %v5262_v55 }
 0x62c   :  { %v2414_v4 = vadd.f32 %v2413_v15, %v2172_v51 }
 0x62d   :  { %v3035_v12 = vpop.f32.mrf.mxu1  ;;  %v2826_v47 = vpop.f32.mrf.mxu0 }
 0x62e   :  { %v2576_v25 = vmax.f32 %v2414_v4, 0.0  ;;  %v3036_v39 = vadd.f32 %v3035_v12, %v2794_v1  ;;  %v2815_v1 = vadd.f32 %v5938_v60, %v2814_v2 }
 0x630   :  { %3167 = vst.msk [vmem:[%s6331_s7 + $0x178] sm:$0xff] %vm3119_vm0, %v3036_v39  ;;  %3082 = vmatmul.f32.gmra.mxu1 %v2576_v25 }
 0x631   :  { %v2174_v26 = vpop.f32.mrf.mxu2  ;;  %v2416_v40 = vpop.f32.mrf.mxu3 }
 0x632   :  { %v2175_v13 = vadd.f32 %v2174_v26, %v5262_v55 }
 0x634   :  { %v2417_v58 = vadd.f32 %v2416_v40, %v2175_v13 }
 0x635   :  { %v3038_v38 = vpop.f32.mrf.mxu1  ;;  %v2829_v13 = vpop.f32.mrf.mxu0 }
 0x636   :  { %v2578_v21 = vmax.f32 %v2417_v58, 0.0  ;;  %v3039_v31 = vadd.f32 %v3038_v38, %v2797_v41  ;;  %v2818_v41 = vadd.f32 %v5938_v60, %v2817_v29 }
 0x638   :  { %3168 = vst.msk [vmem:[%s6331_s7 + $0x180] sm:$0xff] %vm3119_vm0, %v3039_v31  ;;  %3085 = vmatmul.f32.gmra.mxu1 %v2578_v21 }
 0x639   :  { %v2177_v18 = vpop.f32.mrf.mxu2  ;;  %v2419_v54 = vpop.f32.mrf.mxu3 }
 0x63a   :  { %v2178_v63 = vadd.f32 %v2177_v18, %v5262_v55 }
 0x63c   :  { %v2420_v62 = vadd.f32 %v2419_v54, %v2178_v63  ;;  %v2821_v63 = vadd.f32 %v5938_v60, %v2820_v0 }
 0x63d   :  { %v3041_v42 = vpop.f32.mrf.mxu1 }
 0x63e   :  { %v2580_v28 = vmax.f32 %v2420_v62, 0.0  ;;  %v3042_v20 = vadd.f32 %v3041_v42, %v2800_v23  ;;  %v2832_v62 = vpop.f32.mrf.mxu0 }
 0x640   :  { %3169 = vst.msk [vmem:[%s6331_s7 + $0x188] sm:$0xff] %vm3119_vm0, %v3042_v20  ;;  %3088 = vmatmul.f32.gmra.mxu1 %v2580_v28 }
 0x641   :  { %v2180_v45 = vpop.f32.mrf.mxu2  ;;  %v2422_v32 = vpop.f32.mrf.mxu3 }
 0x642   :  { %v2181_v17 = vadd.f32 %v2180_v45, %v5262_v55 }
 0x644   :  { %v2423_v44 = vadd.f32 %v2422_v32, %v2181_v17  ;;  %v2824_v17 = vadd.f32 %v5938_v60, %v2823_v27 }
 0x645   :  { %v3044_v46 = vpop.f32.mrf.mxu1 }
 0x646   :  { %v2582_v35 = vmax.f32 %v2423_v44, 0.0  ;;  %v3045_v61 = vadd.f32 %v3044_v46, %v2803_v57 }
 0x648   :  { %3170 = vst.msk [vmem:[%s6331_s7 + $0x190] sm:$0xff] %vm3119_vm0, %v3045_v61  ;;  %3091 = vmatmul.f32.gmra.mxu1 %v2582_v35  ;;  %v2835_v61 = vpop.f32.mrf.mxu0 }
 0x649   :  { %v2183_v43 = vpop.f32.mrf.mxu2  ;;  %v2425_v53 = vpop.f32.mrf.mxu3  ;;  %v2836_v27 = vadd.f32 %v5938_v60, %v2835_v61 }
 0x64a   :  { %v2184_v37 = vadd.f32 %v2183_v43, %v5262_v55 }
 0x64c   :  { %v2426_v22 = vadd.f32 %v2425_v53, %v2184_v37 }
 0x64d   :  { %v3047_v14 = vpop.f32.mrf.mxu1 }
 0x64e   :  { %v2584_v33 = vmax.f32 %v2426_v22, 0.0  ;;  %v3048_v48 = vadd.f32 %v3047_v14, %v2806_v24  ;;  %v2827_v24 = vadd.f32 %v5938_v60, %v2826_v47 }
 0x650   :  { %3171 = vst.msk [vmem:[%s6331_s7 + $0x198] sm:$0xff] %vm3119_vm0, %v3048_v48  ;;  %3094 = vmatmul.f32.gmra.mxu1 %v2584_v33  ;;  %v2838_v48 = vpop.f32.mrf.mxu0 }
 0x651   :  { %v2186_v8 = vpop.f32.mrf.mxu2  ;;  %v2428_v11 = vpop.f32.mrf.mxu3 }
 0x652   :  { %v2187_v19 = vadd.f32 %v2186_v8, %v5262_v55  ;;  %v2830_v8 = vadd.f32 %v5938_v60, %v2829_v13 }
 0x654   :  { %v2429_v9 = vadd.f32 %v2428_v11, %v2187_v19 }
 0x655   :  { %v3050_v5 = vpop.f32.mrf.mxu1 }
 0x656   :  { %v2586_v3 = vmax.f32 %v2429_v9, 0.0  ;;  %v3051_v52 = vadd.f32 %v3050_v5, %v2809_v16  ;;  %v2833_v16 = vadd.f32 %v5938_v60, %v2832_v62 }
 0x658   :  { %3172 = vst.msk [vmem:[%s6331_s7 + $0x1a0] sm:$0xff] %vm3119_vm0, %v3051_v52  ;;  %3097 = vmatmul.f32.gmra.mxu1 %v2586_v3 }
 0x659   :  { %v2189_v7 = vpop.f32.mrf.mxu2  ;;  %v2431_v36 = vpop.f32.mrf.mxu3 }
 0x65a   :  { %v2190_v56 = vadd.f32 %v2189_v7, %v5262_v55 }
 0x65c   :  { %v2432_v49 = vadd.f32 %v2431_v36, %v2190_v56  ;;  %v2839_v36 = vadd.f32 %v5938_v60, %v2838_v48 }
 0x65d   :  { %v3053_v50 = vpop.f32.mrf.mxu1 }
 0x65e   :  { %v2588_v6 = vmax.f32 %v2432_v49, 0.0  ;;  %v3054_v30 = vadd.f32 %v3053_v50, %v2812_v10 }
 0x660   :  { %3173 = vst.msk [vmem:[%s6331_s7 + $0x1a8] sm:$0xff] %vm3119_vm0, %v3054_v30  ;;  %3100 = vmatmul.f32.gmra.mxu1 %v2588_v6 }
 0x661   :  { %v2192_v34 = vpop.f32.mrf.mxu2  ;;  %v2434_v15 = vpop.f32.mrf.mxu3 }
 0x662   :  { %v2193_v51 = vadd.f32 %v2192_v34, %v5262_v55 }
 0x664   :  { %v2435_v4 = vadd.f32 %v2434_v15, %v2193_v51 }
 0x665   :  { %v3056_v12 = vpop.f32.mrf.mxu1 }
 0x666   :  { %v2590_v59 = vmax.f32 %v2435_v4, 0.0  ;;  %v3057_v25 = vadd.f32 %v3056_v12, %v2815_v1 }
 0x668   :  { %3174 = vst.msk [vmem:[%s6331_s7 + $0x1b0] sm:$0xff] %vm3119_vm0, %v3057_v25  ;;  %3103 = vmatmul.f32.gmra.mxu1 %v2590_v59 }
 0x669   :  { %v2195_v39 = vpop.f32.mrf.mxu2  ;;  %v2437_v26 = vpop.f32.mrf.mxu3 }
 0x66a   :  { %v2196_v40 = vadd.f32 %v2195_v39, %v5262_v55 }
 0x66c   :  { %v2438_v58 = vadd.f32 %v2437_v26, %v2196_v40 }
 0x66d   :  { %v3059_v38 = vpop.f32.mrf.mxu1 }
 0x66e   :  { %v2592_v21 = vmax.f32 %v2438_v58, 0.0  ;;  %v3060_v31 = vadd.f32 %v3059_v38, %v2818_v41 }
 0x670   :  { %3175 = vst.msk [vmem:[%s6331_s7 + $0x1b8] sm:$0xff] %vm3119_vm0, %v3060_v31  ;;  %3106 = vmatmul.f32.gmra.mxu1 %v2592_v21 }
 0x671   :  { %v2198_v2 = vpop.f32.mrf.mxu2  ;;  %v2440_v18 = vpop.f32.mrf.mxu3 }
 0x672   :  { %v2199_v54 = vadd.f32 %v2198_v2, %v5262_v55 }
 0x674   :  { %v2441_v23 = vadd.f32 %v2440_v18, %v2199_v54 }
 0x675   :  { %v3062_v42 = vpop.f32.mrf.mxu1 }
 0x676   :  { %v2594_v28 = vmax.f32 %v2441_v23, 0.0  ;;  %v3063_v20 = vadd.f32 %v3062_v42, %v2821_v63 }
 0x678   :  { %3176 = vst.msk [vmem:[%s6331_s7 + $0x1c0] sm:$0xff] %vm3119_vm0, %v3063_v20  ;;  %3109 = vmatmul.f32.gmra.mxu1 %v2594_v28 }
 0x679   :  { %v2201_v45 = vpop.f32.mrf.mxu2  ;;  %v2443_v32 = vpop.f32.mrf.mxu3 }
 0x67a   :  { %v2202_v29 = vadd.f32 %v2201_v45, %v5262_v55 }
 0x67c   :  { %v2444_v57 = vadd.f32 %v2443_v32, %v2202_v29 }
 0x67d   :  { %v3065_v44 = vpop.f32.mrf.mxu1 }
 0x67e   :  { %v2596_v46 = vmax.f32 %v2444_v57, 0.0  ;;  %v3066_v35 = vadd.f32 %v3065_v44, %v2824_v17 }
 0x680   :  { %3177 = vst.msk [vmem:[%s6331_s7 + $0x1c8] sm:$0xff] %vm3119_vm0, %v3066_v35  ;;  %3112 = vmatmul.f32.gmra.mxu1 %v2596_v46 }
 0x681   :  { %v2204_v43 = vpop.f32.mrf.mxu2  ;;  %v2446_v37 = vpop.f32.mrf.mxu3 }
 0x682   :  { %v2205_v53 = vadd.f32 %v2204_v43, %v5262_v55  ;;  %v2841_v55 = vpop.f32.mrf.mxu0 }
 0x683   :  { %v2842_v50 = vadd.f32 %v5938_v60, %v2841_v55 }
 0x684   :  { %v2447_v0 = vadd.f32 %v2446_v37, %v2205_v53 }
 0x685   :  { %v3068_v22 = vpop.f32.mrf.mxu1 }
 0x686   :  { %v2598_v14 = vmax.f32 %v2447_v0, 0.0  ;;  %v3069_v33 = vadd.f32 %v3068_v22, %v2827_v24 }
 0x688   :  { %3178 = vst.msk [vmem:[%s6331_s7 + $0x1d0] sm:$0xff] %vm3119_vm0, %v3069_v33  ;;  %3115 = vmatmul.f32.gmra.mxu1 %v2598_v14 }
 0x68a   :  { %v2844_v3 = vpop.f32.mrf.mxu0 }
 0x68b   :  { %v2845_v34 = vadd.f32 %v5938_v60, %v2844_v3 }
 0x68d   :  { %v3071_v11 = vpop.f32.mrf.mxu1 }
 0x68e   :  { %v3072_v19 = vadd.f32 %v3071_v11, %v2830_v8 }
 0x690   :  { %3179 = vst.msk [vmem:[%s6331_s7 + $0x1d8] sm:$0xff] %vm3119_vm0, %v3072_v19 }
 0x692   :  { %v2847_v49 = vpop.f32.mrf.mxu0 }
 0x693   :  { %v2848_v4 = vadd.f32 %v5938_v60, %v2847_v49 }
 0x695   :  { %v3074_v9 = vpop.f32.mrf.mxu1 }
 0x696   :  { %v3075_v5 = vadd.f32 %v3074_v9, %v2833_v16 }
 0x698   :  { %3180 = vst.msk [vmem:[%s6331_s7 + $0x1e0] sm:$0xff] %vm3119_vm0, %v3075_v5 }
 0x69a   :  { %v2850_v47 = vpop.f32.mrf.mxu0 }
 0x69b   :  { %v2851_v25 = vadd.f32 %v5938_v60, %v2850_v47 }
 0x69d   :  { %v3077_v52 = vpop.f32.mrf.mxu1 }
 0x69e   :  { %v3078_v7 = vadd.f32 %v3077_v52, %v2836_v27 }
 0x6a0   :  { %3181 = vst.msk [vmem:[%s6331_s7 + $0x1e8] sm:$0xff] %vm3119_vm0, %v3078_v7 }
 0x6a2   :  { %v2853_v1 = vpop.f32.mrf.mxu0 }
 0x6a3   :  { %v2854_v13 = vadd.f32 %v5938_v60, %v2853_v1 }
 0x6a5   :  { %v3080_v56 = vpop.f32.mrf.mxu1 }
 0x6a6   :  { %v3081_v10 = vadd.f32 %v3080_v56, %v2839_v36 }
 0x6a8   :  { %3182 = vst.msk [vmem:[%s6331_s7 + $0x1f0] sm:$0xff] %vm3119_vm0, %v3081_v10 }
 0x6aa   :  { %v2856_v39 = vpop.f32.mrf.mxu0 }
 0x6ab   :  { %v2857_v21 = vadd.f32 %v5938_v60, %v2856_v39 }
 0x6ad   :  { %v3083_v6 = vpop.f32.mrf.mxu1 }
 0x6ae   :  { %v3084_v30 = vadd.f32 %v3083_v6, %v2842_v50 }
 0x6b0   :  { %3183 = vst.msk [vmem:[%s6331_s7 + $0x1f8] sm:$0xff] %vm3119_vm0, %v3084_v30 }
 0x6b2   :  { %v2859_v38 = vpop.f32.mrf.mxu0 }
 0x6b3   :  { %v2860_v54 = vadd.f32 %v5938_v60, %v2859_v38 }
 0x6b5   :  { %v3086_v15 = vpop.f32.mrf.mxu1 }
 0x6b6   :  { %v3087_v51 = vadd.f32 %v3086_v15, %v2845_v34 }
 0x6b8   :  { %3184 = vst.msk [vmem:[%s6331_s7 + $0x200] sm:$0xff] %vm3119_vm0, %v3087_v51 }
 0x6ba   :  { %v2862_v18 = vpop.f32.mrf.mxu0 }
 0x6bb   :  { %v2863_v42 = vadd.f32 %v5938_v60, %v2862_v18 }
 0x6bd   :  { %v3089_v12 = vpop.f32.mrf.mxu1 }
 0x6be   :  { %v3090_v59 = vadd.f32 %v3089_v12, %v2848_v4 }
 0x6c0   :  { %3185 = vst.msk [vmem:[%s6331_s7 + $0x208] sm:$0xff] %vm3119_vm0, %v3090_v59 }
 0x6c2   :  { %v2865_v62 = vpop.f32.mrf.mxu0 }
 0x6c3   :  { %v2866_v45 = vadd.f32 %v5938_v60, %v2865_v62 }
 0x6c5   :  { %v3092_v26 = vpop.f32.mrf.mxu1 }
 0x6c6   :  { %v3093_v40 = vadd.f32 %v3092_v26, %v2851_v25 }
 0x6c8   :  { %3186 = vst.msk [vmem:[%s6331_s7 + $0x210] sm:$0xff] %vm3119_vm0, %v3093_v40 }
 0x6ca   :  { %v2868_v32 = vpop.f32.mrf.mxu0 }
 0x6cb   :  { %v2869_v57 = vadd.f32 %v5938_v60, %v2868_v32 }
 0x6cd   :  { %v3095_v41 = vpop.f32.mrf.mxu1 }
 0x6ce   :  { %v3096_v58 = vadd.f32 %v3095_v41, %v2854_v13 }
 0x6d0   :  { %3187 = vst.msk [vmem:[%s6331_s7 + $0x218] sm:$0xff] %vm3119_vm0, %v3096_v58 }
 0x6d2   :  { %v2871_v35 = vpop.f32.mrf.mxu0 }
 0x6d3   :  { %v2872_v61 = vadd.f32 %v5938_v60, %v2871_v35 }
 0x6d5   :  { %v3098_v31 = vpop.f32.mrf.mxu1 }
 0x6d6   :  { %v3099_v2 = vadd.f32 %v3098_v31, %v2857_v21 }
 0x6d8   :  { %3188 = vst.msk [vmem:[%s6331_s7 + $0x220] sm:$0xff] %vm3119_vm0, %v3099_v2 }
 0x6da   :  { %v2874_v37 = vpop.f32.mrf.mxu0 }
 0x6db   :  { %v2875_v24 = vadd.f32 %v5938_v60, %v2874_v37 }
 0x6dd   :  { %v3101_v63 = vpop.f32.mrf.mxu1 }
 0x6de   :  { %v3102_v23 = vadd.f32 %v3101_v63, %v2860_v54 }
 0x6e0   :  { %3189 = vst.msk [vmem:[%s6331_s7 + $0x228] sm:$0xff] %vm3119_vm0, %v3102_v23 }
 0x6e5   :  { %v3104_v28 = vpop.f32.mrf.mxu1 }
 0x6e6   :  { %v3105_v20 = vadd.f32 %v3104_v28, %v2863_v42 }
 0x6e8   :  { %3190 = vst.msk [vmem:[%s6331_s7 + $0x230] sm:$0xff] %vm3119_vm0, %v3105_v20 }
 0x6ed   :  { %v3107_v29 = vpop.f32.mrf.mxu1 }
 0x6ee   :  { %v3108_v17 = vadd.f32 %v3107_v29, %v2866_v45 }
 0x6f0   :  { %3191 = vst.msk [vmem:[%s6331_s7 + $0x238] sm:$0xff] %vm3119_vm0, %v3108_v17 }
 0x6f5   :  { %v3110_v44 = vpop.f32.mrf.mxu1 }
 0x6f6   :  { %v3111_v46 = vadd.f32 %v3110_v44, %v2869_v57 }
 0x6f8   :  { %3192 = vst.msk [vmem:[%s6331_s7 + $0x240] sm:$0xff] %vm3119_vm0, %v3111_v46 }
 0x6fd   :  { %v3113_v43 = vpop.f32.mrf.mxu1 }
 0x6fe   :  { %v3114_v53 = vadd.f32 %v3113_v43, %v2872_v61 }
 0x700   :  { %3193 = vst.msk [vmem:[%s6331_s7 + $0x248] sm:$0xff] %vm3119_vm0, %v3114_v53 }
 0x705   :  { %v3116_v0 = vpop.f32.mrf.mxu1 }
 0x706   :  { %v3117_v22 = vadd.f32 %v3116_v0, %v2875_v24 }
 0x708   :  { %3194 = vst.msk [vmem:[%s6331_s7 + $0x250] sm:$0xff] %vm3119_vm0, %v3117_v22 }
 0x709   :  { %3199 = vsyncpa [#allocation3], 1 }
 0x70a   :  { %3200 = vsyncpa [#allocation5], 1 }

</bundles_post_ra>
